<compile_context>
chip_gen: v7x
topology: tpu7x:2x2x1
jax: 0.10.0
libtpu: 0.0.40
codegen_flags: <defaults>
</compile_context>

<pallas_src>
import functools

import jax
import jax.numpy as jnp
import numpy as np
from jax import lax
from jax.experimental import pallas as pl
from jax.experimental.pallas import tpu as pltpu


# ----------------------------------------------------------------------------
# In-kernel helpers (all shapes are Python-static; loops are fully unrolled).
# ----------------------------------------------------------------------------
def _conv_im2col(x_ref, rows, wmat, bias, hout, wp, relu):
    """One 3x3 stride-1 conv (flipped taps pre-folded into `wmat`) over a padded
    input held in VMEM as (rows, (hout+2)*wp + 2), channel-major / spatial-flat.

    Returns (Cout, hout*wp); columns p = i*wp + j with j < wp - 2 hold the true
    outputs, the remaining columns are junk that later stages mask / never read.
    """
    L = hout * wp
    taps = [x_ref[0:rows, dy * wp + dx: dy * wp + dx + L]      # (rows, L) views
            for dy in range(3) for dx in range(3)]
    xcol = jnp.concatenate(taps, axis=0)                       # (9*rows, L)
    out = jnp.dot(wmat, xcol, preferred_element_type=jnp.float32) + bias
    if relu:
        out = jnp.maximum(out, 0.0)
    return out


def _repad_same_into(out, mask, dst_ref, rows, wp):
    """Re-pad a stride-1 layer output that lives on the SAME padded grid:
    shift by wp+1 lanes; the mask kills the two junk columns of every row and
    the pre-zeroed buffer provides the 1-pixel border."""
    dst_ref[...] = jnp.zeros(dst_ref.shape, dst_ref.dtype)
    dst_ref[0:rows, wp + 1: wp + 1 + out.shape[1]] = out * mask


def _dilate_rows_into(src_ref, dst_ref, rows, n, wp_src, wp_dst):
    """Zero-dilate by 2 + pad the valid (n, n) block of `src_ref` (stored on a
    padded grid of row width wp_src) into the flat padded buffer `dst_ref`
    (grid width wp_dst = 2*n + 2).  Data lands at (1+2i)*wp_dst + (1+2j);
    everything else stays zero.  Entirely in VMEM."""
    dst_ref[...] = jnp.zeros(dst_ref.shape, dst_ref.dtype)
    jj = lax.broadcasted_iota(jnp.int32, (n, 2 * n), 0)
    xx = lax.broadcasted_iota(jnp.int32, (n, 2 * n), 1)
    spread = (xx == 2 * jj).astype(jnp.float32)                # j -> 2j (0/1)
    for i in range(n):
        row = src_ref[0:rows, i * wp_src: i * wp_src + n]      # valid columns only
        row_d = jnp.dot(row, spread, preferred_element_type=jnp.float32)
        base = (1 + 2 * i) * wp_dst
        dst_ref[0:rows, base + 1: base + 1 + 2 * n] = row_d


# ----------------------------------------------------------------------------
# Fused decoder kernel: one batch element per grid step.
# ----------------------------------------------------------------------------
def _decoder_kernel(h_ref, m_mid_ref, m_big_ref,
                    w1, b1, w2, b2, w3, b3, w4, b4, w5, b5, w6, b6,
                    o_ref, pad_s, pad_m, pad_l, stage, *, oc, base):
    c0 = 4 * oc
    s1, s2, s3 = base, 2 * base, 4 * base          # per-layer output spatial
    wp1, wp2, wp3 = s1 + 2, s2 + 2, s3 + 2         # padded-grid row widths

    # ---- place the linear activation (C0, 8*8) into the first padded grid ---
    pad_s[...] = jnp.zeros(pad_s.shape, pad_s.dtype)
    for i in range(s1):
        pad_s[:, (1 + i) * wp1 + 1: (1 + i) * wp1 + 1 + s1] = \
            h_ref[0, :, i * s1: (i + 1) * s1]

    # ---- layer 1: ConvT(4oc -> 4oc, s=1) + ReLU ------------------------------
    out = _conv_im2col(pad_s, c0, w1[...], b1[...], s1, wp1, relu=True)

    # ---- layer 2: ConvT(4oc -> 2oc, s=2, op=1) + ReLU ------------------------
    stage[:, 0:s1 * wp1] = out
    _dilate_rows_into(stage, pad_m, c0, s1, wp1, wp2)
    out = _conv_im2col(pad_m, c0, w2[...], b2[...], s2, wp2, relu=True)

    # ---- layer 3: ConvT(2oc -> 2oc, s=1) + ReLU ------------------------------
    _repad_same_into(out, m_mid_ref[...], pad_m, 2 * oc, wp2)
    out = _conv_im2col(pad_m, 2 * oc, w3[...], b3[...], s2, wp2, relu=True)

    # ---- layer 4: ConvT(2oc -> oc, s=2, op=1) + ReLU -------------------------
    stage[0:2 * oc, 0:s2 * wp2] = out
    _dilate_rows_into(stage, pad_l, 2 * oc, s2, wp2, wp3)
    out = _conv_im2col(pad_l, 2 * oc, w4[...], b4[...], s3, wp3, relu=True)

    # ---- layer 5: ConvT(oc -> oc, s=1) + ReLU --------------------------------
    _repad_same_into(out, m_big_ref[...], pad_l, oc, wp3)
    out = _conv_im2col(pad_l, oc, w5[...], b5[...], s3, wp3, relu=True)

    # ---- layer 6: ConvT(oc -> in_ch, s=1), no activation ---------------------
    _repad_same_into(out, m_big_ref[...], pad_l, oc, wp3)
    out = _conv_im2col(pad_l, oc, w6[...], b6[...], s3, wp3, relu=False)

    # Lane-dense NCHW store: (in_ch, 32*34).  Columns j >= 32 of every 34-wide
    # row are junk and are sliced off by the (tiny) XLA slice in the wrapper.
    o_ref[0] = out


# ----------------------------------------------------------------------------
# Parameter preprocessing (done once, outside the forward path).
# ----------------------------------------------------------------------------
def preprocess_params(params, *, base=8):
    wmats, biases = [], []
    for (w, b, _stride, _op, _relu) in params["conv"]:
        cin, cout = w.shape[0], w.shape[1]
        wf = w[:, :, ::-1, ::-1]                               # spatial flip
        wmat = jnp.transpose(wf, (1, 2, 3, 0)).reshape(cout, 9 * cin)
        wmats.append(wmat)
        biases.append(b.reshape(cout, 1))
    s2, s3 = 2 * base, 4 * base
    wp2, wp3 = s2 + 2, s3 + 2
    mask_mid = (np.arange(s2 * wp2) % wp2 < s2).astype(np.float32)[None, :]
    mask_big = (np.arange(s3 * wp3) % wp3 < s3).astype(np.float32)[None, :]
    return {
        "lin_w": params["lin_w"],
        "lin_b": params["lin_b"],
        "wmats": wmats,
        "biases": biases,
        "mask_mid": jnp.asarray(mask_mid),
        "mask_big": jnp.asarray(mask_big),
    }


# ----------------------------------------------------------------------------
# Full Decoder forward (Pallas path).  x: (B, latent) -> (B, in_ch, 32, 32)
# ----------------------------------------------------------------------------
def decoder_forward_pallas(x, prep, *, out_channels, in_channels, base=8):
    B = x.shape[0]
    oc = out_channels
    c0 = 4 * oc
    s2, s3 = 2 * base, 4 * base
    wp1, wp2, wp3 = base + 2, s2 + 2, s3 + 2

    # Initial Linear + ReLU in XLA (M = B is tiny).  The (B, feat) -> (B, C0, 64)
    # reshape is exactly the channel-major, spatial-flat layout the kernel wants.
    h = jnp.maximum(
        jnp.dot(x, prep["lin_w"], precision=lax.Precision.HIGHEST) + prep["lin_b"],
        0.0,
    ).reshape(B, c0, base * base)

    conv_in, conv_specs = [], []
    for w, b in zip(prep["wmats"], prep["biases"]):
        conv_in += [w, b]
        conv_specs += [pl.BlockSpec(w.shape, lambda bb: (0, 0)),
                       pl.BlockSpec(b.shape, lambda bb: (0, 0))]

    out_flat = pl.pallas_call(
        functools.partial(_decoder_kernel, oc=oc, base=base),
        out_shape=jax.ShapeDtypeStruct((B, in_channels, s3 * wp3), jnp.float32),
        grid_spec=pltpu.PrefetchScalarGridSpec(
            num_scalar_prefetch=0,
            grid=(B,),                                   # batch-parallel (2 TCs on v7x)
            in_specs=[
                pl.BlockSpec((1, c0, base * base), lambda bb: (bb, 0, 0)),
                pl.BlockSpec(prep["mask_mid"].shape, lambda bb: (0, 0)),
                pl.BlockSpec(prep["mask_big"].shape, lambda bb: (0, 0)),
            ] + conv_specs,
            out_specs=pl.BlockSpec((1, in_channels, s3 * wp3), lambda bb: (bb, 0, 0)),
            scratch_shapes=[
                pltpu.VMEM((c0, wp1 * wp1 + 2), jnp.float32),        # layer-1 padded input
                pltpu.VMEM((c0, wp2 * wp2 + 2), jnp.float32),        # layers 2/3 padded input
                pltpu.VMEM((2 * oc, wp3 * wp3 + 2), jnp.float32),    # layers 4/5/6 padded input
                pltpu.VMEM((c0, s2 * wp2), jnp.float32),             # staging before dilation
            ],
        ),
        compiler_params=pltpu.CompilerParams(dimension_semantics=("parallel",)),
    )(h, prep["mask_mid"], prep["mask_big"], *conv_in)

    # Drop the 2 junk columns per 34-wide row -> (B, in_ch, 32, 32), already NCHW.
    return out_flat.reshape(B, in_channels, s3, wp3)[:, :, :, :s3]


# ----------------------------------------------------------------------------
# Pure-JAX reference (lax conv with lhs dilation) for verification.
# ----------------------------------------------------------------------------
def conv_transpose_ref(x_nhwc, w_t, bias, *, stride, out_pad):
    k, p = 3, 1
    w_conv = jnp.transpose(w_t[:, :, ::-1, ::-1], (2, 3, 0, 1))  # HWIO
    y = lax.conv_general_dilated(
        x_nhwc, w_conv, window_strides=(1, 1),
        padding=[(k - 1 - p, k - 1 - p + out_pad)] * 2,
        lhs_dilation=(stride, stride),
        dimension_numbers=("NHWC", "HWIO", "NHWC"),
        precision=lax.Precision.HIGHEST)
    return y + bias


def decoder_forward_ref(x, params, out_channels):
    B = x.shape[0]
    h = jnp.maximum(
        jnp.dot(x, params["lin_w"], precision=lax.Precision.HIGHEST)
        + params["lin_b"], 0.0)
    h = h.reshape(B, 4 * out_channels, 8, 8)
    h = jnp.transpose(h, (0, 2, 3, 1))
    for (w, b, stride, op, relu) in params["conv"]:
        h = conv_transpose_ref(h, w, b, stride=stride, out_pad=op)
        if relu:
            h = jnp.maximum(h, 0.0)
    return jnp.transpose(h, (0, 3, 1, 2))


# ----------------------------------------------------------------------------
# Deterministic parameter init (PyTorch-like uniform(-1/sqrt(fan_in), ...)).
# ----------------------------------------------------------------------------
def init_params(key, in_channels, out_channels, latent_dim):
    oc = out_channels
    feat = 4 * oc * 8 * 8
    keys = jax.random.split(key, 16)
    ki = iter(keys)

    def uni(k, shape, fan_in):
        bound = 1.0 / np.sqrt(fan_in)
        return jax.random.uniform(k, shape, jnp.float32, -bound, bound)

    params = {
        "lin_w": uni(next(ki), (latent_dim, feat), latent_dim),
        "lin_b": uni(next(ki), (feat,), latent_dim),
    }
    # (Cin, Cout, stride, output_padding, relu_after)
    cfg = [
        (4 * oc, 4 * oc, 1, 0, True),
        (4 * oc, 2 * oc, 2, 1, True),
        (2 * oc, 2 * oc, 1, 0, True),
        (2 * oc, oc, 2, 1, True),
        (oc, oc, 1, 0, True),
        (oc, in_channels, 1, 0, False),
    ]
    conv = []
    for (cin, cout, stride, op, relu) in cfg:
        fan_in = cin * 3 * 3
        w = uni(next(ki), (cin, cout, 3, 3), fan_in)   # PyTorch ConvT layout
        b = uni(next(ki), (cout,), fan_in)
        conv.append((w, b, stride, op, relu))
    params["conv"] = conv
    return params


if __name__ == "__main__":
    IN_CH, OUT_CH, LATENT, BATCH = 3, 8, 32, 2  # small but shape-consistent

    key = jax.random.PRNGKey(0)
    kp, kx = jax.random.split(key)
    params = init_params(kp, IN_CH, OUT_CH, LATENT)
    prep = preprocess_params(params)
    x = jax.random.normal(kx, (BATCH, LATENT), jnp.float32)

    fwd = jax.jit(functools.partial(
        decoder_forward_pallas, out_channels=OUT_CH, in_channels=IN_CH))
    y = jax.block_until_ready(fwd(x, prep))

    y_ref = jax.block_until_ready(decoder_forward_ref(x, params, OUT_CH))

    assert y.shape == (BATCH, IN_CH, 32, 32), y.shape
    np.testing.assert_allclose(
        np.asarray(y), np.asarray(y_ref), rtol=1e-3, atol=1e-4
    )
    print("KERNEL_OK")
</pallas_src>

<mosaic_0001>
module attributes {stable_mosaic.version = 11 : i64} {
  func.func @_decoder_kernel(%arg0: i32, %arg1: memref<1x32x64xf32, #tpu.memory_space<vmem>>, %arg2: memref<1x288xf32, #tpu.memory_space<vmem>>, %arg3: memref<1x1088xf32, #tpu.memory_space<vmem>>, %arg4: memref<32x288xf32, #tpu.memory_space<vmem>>, %arg5: memref<32x1xf32, #tpu.memory_space<vmem>>, %arg6: memref<16x288xf32, #tpu.memory_space<vmem>>, %arg7: memref<16x1xf32, #tpu.memory_space<vmem>>, %arg8: memref<16x144xf32, #tpu.memory_space<vmem>>, %arg9: memref<16x1xf32, #tpu.memory_space<vmem>>, %arg10: memref<8x144xf32, #tpu.memory_space<vmem>>, %arg11: memref<8x1xf32, #tpu.memory_space<vmem>>, %arg12: memref<8x72xf32, #tpu.memory_space<vmem>>, %arg13: memref<8x1xf32, #tpu.memory_space<vmem>>, %arg14: memref<3x72xf32, #tpu.memory_space<vmem>>, %arg15: memref<3x1xf32, #tpu.memory_space<vmem>>, %arg16: memref<1x3x1088xf32, #tpu.memory_space<vmem>>, %arg17: memref<32x102xf32, #tpu.memory_space<vmem>>, %arg18: memref<32x326xf32, #tpu.memory_space<vmem>>, %arg19: memref<16x1158xf32, #tpu.memory_space<vmem>>, %arg20: memref<32x288xf32, #tpu.memory_space<vmem>>) attributes {dimension_semantics = [#tpu.dimension_semantics<parallel>], iteration_bounds = array<i64: 2>, scalar_prefetch = 0 : i64, scratch_operands = 4 : i64, tpu.core_type = #tpu.core_type<tc>, window_params = [{transform_indices = @transform_0, window_bounds = array<i64: 1, 32, 64>}, {pipeline_mode = #tpu.pipeline_mode<synchronous>, transform_indices = @transform_1, window_bounds = array<i64: 1, 288>}, {pipeline_mode = #tpu.pipeline_mode<synchronous>, transform_indices = @transform_2, window_bounds = array<i64: 1, 1088>}, {pipeline_mode = #tpu.pipeline_mode<synchronous>, transform_indices = @transform_3, window_bounds = array<i64: 32, 288>}, {pipeline_mode = #tpu.pipeline_mode<synchronous>, transform_indices = @transform_4, window_bounds = array<i64: 32, 1>}, {pipeline_mode = #tpu.pipeline_mode<synchronous>, transform_indices = @transform_5, window_bounds = array<i64: 16, 288>}, {pipeline_mode = #tpu.pipeline_mode<synchronous>, transform_indices = @transform_6, window_bounds = array<i64: 16, 1>}, {pipeline_mode = #tpu.pipeline_mode<synchronous>, transform_indices = @transform_7, window_bounds = array<i64: 16, 144>}, {pipeline_mode = #tpu.pipeline_mode<synchronous>, transform_indices = @transform_8, window_bounds = array<i64: 16, 1>}, {pipeline_mode = #tpu.pipeline_mode<synchronous>, transform_indices = @transform_9, window_bounds = array<i64: 8, 144>}, {pipeline_mode = #tpu.pipeline_mode<synchronous>, transform_indices = @transform_10, window_bounds = array<i64: 8, 1>}, {pipeline_mode = #tpu.pipeline_mode<synchronous>, transform_indices = @transform_11, window_bounds = array<i64: 8, 72>}, {pipeline_mode = #tpu.pipeline_mode<synchronous>, transform_indices = @transform_12, window_bounds = array<i64: 8, 1>}, {pipeline_mode = #tpu.pipeline_mode<synchronous>, transform_indices = @transform_13, window_bounds = array<i64: 3, 72>}, {pipeline_mode = #tpu.pipeline_mode<synchronous>, transform_indices = @transform_14, window_bounds = array<i64: 3, 1>}, {transform_indices = @transform_15, window_bounds = array<i64: 1, 3, 1088>}]} {
    %cst = arith.constant 0.000000e+00 : f32
    %0 = vector.broadcast %cst : f32 to vector<32x102xf32>
    %c0 = arith.constant 0 : index
    %c0_0 = arith.constant 0 : index
    %1 = vector.load %arg17[%c0, %c0_0] : memref<32x102xf32, #tpu.memory_space<vmem>>, vector<32x102xf32>
    tpu.vector_store %arg17[%c0, %c0_0], %0 {strides = array<i32>} : memref<32x102xf32, #tpu.memory_space<vmem>>, vector<32x102xf32>,
    %c0_1 = arith.constant 0 : index
    %c0_2 = arith.constant 0 : index
    %c0_3 = arith.constant 0 : index
    %2 = vector.load %arg1[%c0_1, %c0_2, %c0_3] : memref<1x32x64xf32, #tpu.memory_space<vmem>>, vector<1x32x8xf32>
    %3 = vector.shape_cast %2 : vector<1x32x8xf32> to vector<32x8xf32>
    %c0_4 = arith.constant 0 : index
    %c11 = arith.constant 11 : index
    %4 = vector.load %arg17[%c0_4, %c11] : memref<32x102xf32, #tpu.memory_space<vmem>>, vector<32x8xf32>
    tpu.vector_store %arg17[%c0_4, %c11], %3 {strides = array<i32>} : memref<32x102xf32, #tpu.memory_space<vmem>>, vector<32x8xf32>,
    %c0_5 = arith.constant 0 : index
    %c0_6 = arith.constant 0 : index
    %c8 = arith.constant 8 : index
    %5 = vector.load %arg1[%c0_5, %c0_6, %c8] : memref<1x32x64xf32, #tpu.memory_space<vmem>>, vector<1x32x8xf32>
    %6 = vector.shape_cast %5 : vector<1x32x8xf32> to vector<32x8xf32>
    %c0_7 = arith.constant 0 : index
    %c21 = arith.constant 21 : index
    %7 = vector.load %arg17[%c0_7, %c21] : memref<32x102xf32, #tpu.memory_space<vmem>>, vector<32x8xf32>
    tpu.vector_store %arg17[%c0_7, %c21], %6 {strides = array<i32>} : memref<32x102xf32, #tpu.memory_space<vmem>>, vector<32x8xf32>,
    %c0_8 = arith.constant 0 : index
    %c0_9 = arith.constant 0 : index
    %c16 = arith.constant 16 : index
    %8 = vector.load %arg1[%c0_8, %c0_9, %c16] : memref<1x32x64xf32, #tpu.memory_space<vmem>>, vector<1x32x8xf32>
    %9 = vector.shape_cast %8 : vector<1x32x8xf32> to vector<32x8xf32>
    %c0_10 = arith.constant 0 : index
    %c31 = arith.constant 31 : index
    %10 = vector.load %arg17[%c0_10, %c31] : memref<32x102xf32, #tpu.memory_space<vmem>>, vector<32x8xf32>
    tpu.vector_store %arg17[%c0_10, %c31], %9 {strides = array<i32>} : memref<32x102xf32, #tpu.memory_space<vmem>>, vector<32x8xf32>,
    %c0_11 = arith.constant 0 : index
    %c0_12 = arith.constant 0 : index
    %c24 = arith.constant 24 : index
    %11 = vector.load %arg1[%c0_11, %c0_12, %c24] : memref<1x32x64xf32, #tpu.memory_space<vmem>>, vector<1x32x8xf32>
    %12 = vector.shape_cast %11 : vector<1x32x8xf32> to vector<32x8xf32>
    %c0_13 = arith.constant 0 : index
    %c41 = arith.constant 41 : index
    %13 = vector.load %arg17[%c0_13, %c41] : memref<32x102xf32, #tpu.memory_space<vmem>>, vector<32x8xf32>
    tpu.vector_store %arg17[%c0_13, %c41], %12 {strides = array<i32>} : memref<32x102xf32, #tpu.memory_space<vmem>>, vector<32x8xf32>,
    %c0_14 = arith.constant 0 : index
    %c0_15 = arith.constant 0 : index
    %c32 = arith.constant 32 : index
    %14 = vector.load %arg1[%c0_14, %c0_15, %c32] : memref<1x32x64xf32, #tpu.memory_space<vmem>>, vector<1x32x8xf32>
    %15 = vector.shape_cast %14 : vector<1x32x8xf32> to vector<32x8xf32>
    %c0_16 = arith.constant 0 : index
    %c51 = arith.constant 51 : index
    %16 = vector.load %arg17[%c0_16, %c51] : memref<32x102xf32, #tpu.memory_space<vmem>>, vector<32x8xf32>
    tpu.vector_store %arg17[%c0_16, %c51], %15 {strides = array<i32>} : memref<32x102xf32, #tpu.memory_space<vmem>>, vector<32x8xf32>,
    %c0_17 = arith.constant 0 : index
    %c0_18 = arith.constant 0 : index
    %c40 = arith.constant 40 : index
    %17 = vector.load %arg1[%c0_17, %c0_18, %c40] : memref<1x32x64xf32, #tpu.memory_space<vmem>>, vector<1x32x8xf32>
    %18 = vector.shape_cast %17 : vector<1x32x8xf32> to vector<32x8xf32>
    %c0_19 = arith.constant 0 : index
    %c61 = arith.constant 61 : index
    %19 = vector.load %arg17[%c0_19, %c61] : memref<32x102xf32, #tpu.memory_space<vmem>>, vector<32x8xf32>
    tpu.vector_store %arg17[%c0_19, %c61], %18 {strides = array<i32>} : memref<32x102xf32, #tpu.memory_space<vmem>>, vector<32x8xf32>,
    %c0_20 = arith.constant 0 : index
    %c0_21 = arith.constant 0 : index
    %c48 = arith.constant 48 : index
    %20 = vector.load %arg1[%c0_20, %c0_21, %c48] : memref<1x32x64xf32, #tpu.memory_space<vmem>>, vector<1x32x8xf32>
    %21 = vector.shape_cast %20 : vector<1x32x8xf32> to vector<32x8xf32>
    %c0_22 = arith.constant 0 : index
    %c71 = arith.constant 71 : index
    %22 = vector.load %arg17[%c0_22, %c71] : memref<32x102xf32, #tpu.memory_space<vmem>>, vector<32x8xf32>
    tpu.vector_store %arg17[%c0_22, %c71], %21 {strides = array<i32>} : memref<32x102xf32, #tpu.memory_space<vmem>>, vector<32x8xf32>,
    %c0_23 = arith.constant 0 : index
    %c0_24 = arith.constant 0 : index
    %c56 = arith.constant 56 : index
    %23 = vector.load %arg1[%c0_23, %c0_24, %c56] : memref<1x32x64xf32, #tpu.memory_space<vmem>>, vector<1x32x8xf32>
    %24 = vector.shape_cast %23 : vector<1x32x8xf32> to vector<32x8xf32>
    %c0_25 = arith.constant 0 : index
    %c81 = arith.constant 81 : index
    %25 = vector.load %arg17[%c0_25, %c81] : memref<32x102xf32, #tpu.memory_space<vmem>>, vector<32x8xf32>
    tpu.vector_store %arg17[%c0_25, %c81], %24 {strides = array<i32>} : memref<32x102xf32, #tpu.memory_space<vmem>>, vector<32x8xf32>,
    %c0_26 = arith.constant 0 : index
    %c0_27 = arith.constant 0 : index
    %26 = vector.load %arg4[%c0_26, %c0_27] : memref<32x288xf32, #tpu.memory_space<vmem>>, vector<32x288xf32>
    %c0_28 = arith.constant 0 : index
    %c0_29 = arith.constant 0 : index
    %27 = vector.load %arg5[%c0_28, %c0_29] : memref<32x1xf32, #tpu.memory_space<vmem>>, vector<32x1xf32>
    %c0_30 = arith.constant 0 : index
    %c0_31 = arith.constant 0 : index
    %28 = vector.load %arg17[%c0_30, %c0_31] : memref<32x102xf32, #tpu.memory_space<vmem>>, vector<32x80xf32>
    %c0_32 = arith.constant 0 : index
    %c1 = arith.constant 1 : index
    %29 = vector.load %arg17[%c0_32, %c1] : memref<32x102xf32, #tpu.memory_space<vmem>>, vector<32x80xf32>
    %c0_33 = arith.constant 0 : index
    %c2 = arith.constant 2 : index
    %30 = vector.load %arg17[%c0_33, %c2] : memref<32x102xf32, #tpu.memory_space<vmem>>, vector<32x80xf32>
    %c0_34 = arith.constant 0 : index
    %c10 = arith.constant 10 : index
    %31 = vector.load %arg17[%c0_34, %c10] : memref<32x102xf32, #tpu.memory_space<vmem>>, vector<32x80xf32>
    %c0_35 = arith.constant 0 : index
    %c11_36 = arith.constant 11 : index
    %32 = vector.load %arg17[%c0_35, %c11_36] : memref<32x102xf32, #tpu.memory_space<vmem>>, vector<32x80xf32>
    %c0_37 = arith.constant 0 : index
    %c12 = arith.constant 12 : index
    %33 = vector.load %arg17[%c0_37, %c12] : memref<32x102xf32, #tpu.memory_space<vmem>>, vector<32x80xf32>
    %c0_38 = arith.constant 0 : index
    %c20 = arith.constant 20 : index
    %34 = vector.load %arg17[%c0_38, %c20] : memref<32x102xf32, #tpu.memory_space<vmem>>, vector<32x80xf32>
    %c0_39 = arith.constant 0 : index
    %c21_40 = arith.constant 21 : index
    %35 = vector.load %arg17[%c0_39, %c21_40] : memref<32x102xf32, #tpu.memory_space<vmem>>, vector<32x80xf32>
    %c0_41 = arith.constant 0 : index
    %c22 = arith.constant 22 : index
    %36 = vector.load %arg17[%c0_41, %c22] : memref<32x102xf32, #tpu.memory_space<vmem>>, vector<32x80xf32>
    %37 = tpu.concatenate %28, %29, %30, %31, %32, %33, %34, %35, %36 in 0 : vector<32x80xf32>, vector<32x80xf32>, vector<32x80xf32>, vector<32x80xf32>, vector<32x80xf32>, vector<32x80xf32>, vector<32x80xf32>, vector<32x80xf32>, vector<32x80xf32> -> vector<288x80xf32>
    %cst_42 = arith.constant dense<0.000000e+00> : vector<32x80xf32>
    %38 = tpu.matmul %26, %37, %cst_42 {dimension_numbers = #tpu.dot_dimension_numbers<[1], [0], [0], [1], [0, 0, 1, 1], [], []>} : vector<32x288xf32>, vector<288x80xf32>, vector<32x80xf32> -> vector<32x80xf32>
    %39 = vector.broadcast %27 : vector<32x1xf32> to vector<32x80xf32>
    %40 = arith.addf %38, %39 : vector<32x80xf32>
    %cst_43 = arith.constant 0.000000e+00 : f32
    %41 = vector.broadcast %cst_43 : f32 to vector<32x80xf32>
    %42 = arith.maximumf %40, %41 : vector<32x80xf32>
    %c0_44 = arith.constant 0 : index
    %c0_45 = arith.constant 0 : index
    %43 = vector.load %arg20[%c0_44, %c0_45] : memref<32x288xf32, #tpu.memory_space<vmem>>, vector<32x80xf32>
    tpu.vector_store %arg20[%c0_44, %c0_45], %42 {strides = array<i32>} : memref<32x288xf32, #tpu.memory_space<vmem>>, vector<32x80xf32>,
    %cst_46 = arith.constant 0.000000e+00 : f32
    %44 = vector.broadcast %cst_46 : f32 to vector<32x326xf32>
    %c0_47 = arith.constant 0 : index
    %c0_48 = arith.constant 0 : index
    %45 = vector.load %arg18[%c0_47, %c0_48] : memref<32x326xf32, #tpu.memory_space<vmem>>, vector<32x326xf32>
    tpu.vector_store %arg18[%c0_47, %c0_48], %44 {strides = array<i32>} : memref<32x326xf32, #tpu.memory_space<vmem>>, vector<32x326xf32>,
    %46 = tpu.iota {dimensions = array<i32: 0>} : vector<8x16xi32>
    %47 = tpu.iota {dimensions = array<i32: 1>} : vector<8x16xi32>
    %c2_i32 = arith.constant 2 : i32
    %48 = vector.broadcast %c2_i32 : i32 to vector<8x16xi32>
    %49 = arith.muli %48, %46 : vector<8x16xi32>
    %50 = arith.cmpi eq, %47, %49 : vector<8x16xi32>
    %51 = arith.extui %50 : vector<8x16xi1> to vector<8x16xi32>
    %52 = arith.sitofp %51 : vector<8x16xi32> to vector<8x16xf32>
    %c0_49 = arith.constant 0 : index
    %c0_50 = arith.constant 0 : index
    %53 = vector.load %arg20[%c0_49, %c0_50] : memref<32x288xf32, #tpu.memory_space<vmem>>, vector<32x8xf32>
    %cst_51 = arith.constant dense<0.000000e+00> : vector<32x16xf32>
    %54 = tpu.matmul %53, %52, %cst_51 {dimension_numbers = #tpu.dot_dimension_numbers<[1], [0], [0], [1], [0, 0, 1, 1], [], []>} : vector<32x8xf32>, vector<8x16xf32>, vector<32x16xf32> -> vector<32x16xf32>
    %c0_52 = arith.constant 0 : index
    %c19 = arith.constant 19 : index
    %55 = vector.load %arg18[%c0_52, %c19] : memref<32x326xf32, #tpu.memory_space<vmem>>, vector<32x16xf32>
    tpu.vector_store %arg18[%c0_52, %c19], %54 {strides = array<i32>} : memref<32x326xf32, #tpu.memory_space<vmem>>, vector<32x16xf32>,
    %c0_53 = arith.constant 0 : index
    %c10_54 = arith.constant 10 : index
    %56 = vector.load %arg20[%c0_53, %c10_54] : memref<32x288xf32, #tpu.memory_space<vmem>>, vector<32x8xf32>
    %cst_55 = arith.constant dense<0.000000e+00> : vector<32x16xf32>
    %57 = tpu.matmul %56, %52, %cst_55 {dimension_numbers = #tpu.dot_dimension_numbers<[1], [0], [0], [1], [0, 0, 1, 1], [], []>} : vector<32x8xf32>, vector<8x16xf32>, vector<32x16xf32> -> vector<32x16xf32>
    %c0_56 = arith.constant 0 : index
    %c55 = arith.constant 55 : index
    %58 = vector.load %arg18[%c0_56, %c55] : memref<32x326xf32, #tpu.memory_space<vmem>>, vector<32x16xf32>
    tpu.vector_store %arg18[%c0_56, %c55], %57 {strides = array<i32>} : memref<32x326xf32, #tpu.memory_space<vmem>>, vector<32x16xf32>,
    %c0_57 = arith.constant 0 : index
    %c20_58 = arith.constant 20 : index
    %59 = vector.load %arg20[%c0_57, %c20_58] : memref<32x288xf32, #tpu.memory_space<vmem>>, vector<32x8xf32>
    %cst_59 = arith.constant dense<0.000000e+00> : vector<32x16xf32>
    %60 = tpu.matmul %59, %52, %cst_59 {dimension_numbers = #tpu.dot_dimension_numbers<[1], [0], [0], [1], [0, 0, 1, 1], [], []>} : vector<32x8xf32>, vector<8x16xf32>, vector<32x16xf32> -> vector<32x16xf32>
    %c0_60 = arith.constant 0 : index
    %c91 = arith.constant 91 : index
    %61 = vector.load %arg18[%c0_60, %c91] : memref<32x326xf32, #tpu.memory_space<vmem>>, vector<32x16xf32>
    tpu.vector_store %arg18[%c0_60, %c91], %60 {strides = array<i32>} : memref<32x326xf32, #tpu.memory_space<vmem>>, vector<32x16xf32>,
    %c0_61 = arith.constant 0 : index
    %c30 = arith.constant 30 : index
    %62 = vector.load %arg20[%c0_61, %c30] : memref<32x288xf32, #tpu.memory_space<vmem>>, vector<32x8xf32>
    %cst_62 = arith.constant dense<0.000000e+00> : vector<32x16xf32>
    %63 = tpu.matmul %62, %52, %cst_62 {dimension_numbers = #tpu.dot_dimension_numbers<[1], [0], [0], [1], [0, 0, 1, 1], [], []>} : vector<32x8xf32>, vector<8x16xf32>, vector<32x16xf32> -> vector<32x16xf32>
    %c0_63 = arith.constant 0 : index
    %c127 = arith.constant 127 : index
    %64 = vector.load %arg18[%c0_63, %c127] : memref<32x326xf32, #tpu.memory_space<vmem>>, vector<32x16xf32>
    tpu.vector_store %arg18[%c0_63, %c127], %63 {strides = array<i32>} : memref<32x326xf32, #tpu.memory_space<vmem>>, vector<32x16xf32>,
    %c0_64 = arith.constant 0 : index
    %c40_65 = arith.constant 40 : index
    %65 = vector.load %arg20[%c0_64, %c40_65] : memref<32x288xf32, #tpu.memory_space<vmem>>, vector<32x8xf32>
    %cst_66 = arith.constant dense<0.000000e+00> : vector<32x16xf32>
    %66 = tpu.matmul %65, %52, %cst_66 {dimension_numbers = #tpu.dot_dimension_numbers<[1], [0], [0], [1], [0, 0, 1, 1], [], []>} : vector<32x8xf32>, vector<8x16xf32>, vector<32x16xf32> -> vector<32x16xf32>
    %c0_67 = arith.constant 0 : index
    %c163 = arith.constant 163 : index
    %67 = vector.load %arg18[%c0_67, %c163] : memref<32x326xf32, #tpu.memory_space<vmem>>, vector<32x16xf32>
    tpu.vector_store %arg18[%c0_67, %c163], %66 {strides = array<i32>} : memref<32x326xf32, #tpu.memory_space<vmem>>, vector<32x16xf32>,
    %c0_68 = arith.constant 0 : index
    %c50 = arith.constant 50 : index
    %68 = vector.load %arg20[%c0_68, %c50] : memref<32x288xf32, #tpu.memory_space<vmem>>, vector<32x8xf32>
    %cst_69 = arith.constant dense<0.000000e+00> : vector<32x16xf32>
    %69 = tpu.matmul %68, %52, %cst_69 {dimension_numbers = #tpu.dot_dimension_numbers<[1], [0], [0], [1], [0, 0, 1, 1], [], []>} : vector<32x8xf32>, vector<8x16xf32>, vector<32x16xf32> -> vector<32x16xf32>
    %c0_70 = arith.constant 0 : index
    %c199 = arith.constant 199 : index
    %70 = vector.load %arg18[%c0_70, %c199] : memref<32x326xf32, #tpu.memory_space<vmem>>, vector<32x16xf32>
    tpu.vector_store %arg18[%c0_70, %c199], %69 {strides = array<i32>} : memref<32x326xf32, #tpu.memory_space<vmem>>, vector<32x16xf32>,
    %c0_71 = arith.constant 0 : index
    %c60 = arith.constant 60 : index
    %71 = vector.load %arg20[%c0_71, %c60] : memref<32x288xf32, #tpu.memory_space<vmem>>, vector<32x8xf32>
    %cst_72 = arith.constant dense<0.000000e+00> : vector<32x16xf32>
    %72 = tpu.matmul %71, %52, %cst_72 {dimension_numbers = #tpu.dot_dimension_numbers<[1], [0], [0], [1], [0, 0, 1, 1], [], []>} : vector<32x8xf32>, vector<8x16xf32>, vector<32x16xf32> -> vector<32x16xf32>
    %c0_73 = arith.constant 0 : index
    %c235 = arith.constant 235 : index
    %73 = vector.load %arg18[%c0_73, %c235] : memref<32x326xf32, #tpu.memory_space<vmem>>, vector<32x16xf32>
    tpu.vector_store %arg18[%c0_73, %c235], %72 {strides = array<i32>} : memref<32x326xf32, #tpu.memory_space<vmem>>, vector<32x16xf32>,
    %c0_74 = arith.constant 0 : index
    %c70 = arith.constant 70 : index
    %74 = vector.load %arg20[%c0_74, %c70] : memref<32x288xf32, #tpu.memory_space<vmem>>, vector<32x8xf32>
    %cst_75 = arith.constant dense<0.000000e+00> : vector<32x16xf32>
    %75 = tpu.matmul %74, %52, %cst_75 {dimension_numbers = #tpu.dot_dimension_numbers<[1], [0], [0], [1], [0, 0, 1, 1], [], []>} : vector<32x8xf32>, vector<8x16xf32>, vector<32x16xf32> -> vector<32x16xf32>
    %c0_76 = arith.constant 0 : index
    %c271 = arith.constant 271 : index
    %76 = vector.load %arg18[%c0_76, %c271] : memref<32x326xf32, #tpu.memory_space<vmem>>, vector<32x16xf32>
    tpu.vector_store %arg18[%c0_76, %c271], %75 {strides = array<i32>} : memref<32x326xf32, #tpu.memory_space<vmem>>, vector<32x16xf32>,
    %c0_77 = arith.constant 0 : index
    %c0_78 = arith.constant 0 : index
    %77 = vector.load %arg6[%c0_77, %c0_78] : memref<16x288xf32, #tpu.memory_space<vmem>>, vector<16x288xf32>
    %c0_79 = arith.constant 0 : index
    %c0_80 = arith.constant 0 : index
    %78 = vector.load %arg7[%c0_79, %c0_80] : memref<16x1xf32, #tpu.memory_space<vmem>>, vector<16x1xf32>
    %c0_81 = arith.constant 0 : index
    %c0_82 = arith.constant 0 : index
    %79 = vector.load %arg18[%c0_81, %c0_82] : memref<32x326xf32, #tpu.memory_space<vmem>>, vector<32x288xf32>
    %c0_83 = arith.constant 0 : index
    %c1_84 = arith.constant 1 : index
    %80 = vector.load %arg18[%c0_83, %c1_84] : memref<32x326xf32, #tpu.memory_space<vmem>>, vector<32x288xf32>
    %c0_85 = arith.constant 0 : index
    %c2_86 = arith.constant 2 : index
    %81 = vector.load %arg18[%c0_85, %c2_86] : memref<32x326xf32, #tpu.memory_space<vmem>>, vector<32x288xf32>
    %c0_87 = arith.constant 0 : index
    %c18 = arith.constant 18 : index
    %82 = vector.load %arg18[%c0_87, %c18] : memref<32x326xf32, #tpu.memory_space<vmem>>, vector<32x288xf32>
    %c0_88 = arith.constant 0 : index
    %c19_89 = arith.constant 19 : index
    %83 = vector.load %arg18[%c0_88, %c19_89] : memref<32x326xf32, #tpu.memory_space<vmem>>, vector<32x288xf32>
    %c0_90 = arith.constant 0 : index
    %c20_91 = arith.constant 20 : index
    %84 = vector.load %arg18[%c0_90, %c20_91] : memref<32x326xf32, #tpu.memory_space<vmem>>, vector<32x288xf32>
    %c0_92 = arith.constant 0 : index
    %c36 = arith.constant 36 : index
    %85 = vector.load %arg18[%c0_92, %c36] : memref<32x326xf32, #tpu.memory_space<vmem>>, vector<32x288xf32>
    %c0_93 = arith.constant 0 : index
    %c37 = arith.constant 37 : index
    %86 = vector.load %arg18[%c0_93, %c37] : memref<32x326xf32, #tpu.memory_space<vmem>>, vector<32x288xf32>
    %c0_94 = arith.constant 0 : index
    %c38 = arith.constant 38 : index
    %87 = vector.load %arg18[%c0_94, %c38] : memref<32x326xf32, #tpu.memory_space<vmem>>, vector<32x288xf32>
    %88 = tpu.concatenate %79, %80, %81, %82, %83, %84, %85, %86, %87 in 0 : vector<32x288xf32>, vector<32x288xf32>, vector<32x288xf32>, vector<32x288xf32>, vector<32x288xf32>, vector<32x288xf32>, vector<32x288xf32>, vector<32x288xf32>, vector<32x288xf32> -> vector<288x288xf32>
    %cst_95 = arith.constant dense<0.000000e+00> : vector<16x288xf32>
    %89 = tpu.matmul %77, %88, %cst_95 {dimension_numbers = #tpu.dot_dimension_numbers<[1], [0], [0], [1], [0, 0, 1, 1], [], []>} : vector<16x288xf32>, vector<288x288xf32>, vector<16x288xf32> -> vector<16x288xf32>
    %90 = vector.broadcast %78 : vector<16x1xf32> to vector<16x288xf32>
    %91 = arith.addf %89, %90 : vector<16x288xf32>
    %cst_96 = arith.constant 0.000000e+00 : f32
    %92 = vector.broadcast %cst_96 : f32 to vector<16x288xf32>
    %93 = arith.maximumf %91, %92 : vector<16x288xf32>
    %c0_97 = arith.constant 0 : index
    %c0_98 = arith.constant 0 : index
    %94 = vector.load %arg2[%c0_97, %c0_98] : memref<1x288xf32, #tpu.memory_space<vmem>>, vector<1x288xf32>
    %cst_99 = arith.constant 0.000000e+00 : f32
    %95 = vector.broadcast %cst_99 : f32 to vector<32x326xf32>
    %c0_100 = arith.constant 0 : index
    %c0_101 = arith.constant 0 : index
    %96 = vector.load %arg18[%c0_100, %c0_101] : memref<32x326xf32, #tpu.memory_space<vmem>>, vector<32x326xf32>
    tpu.vector_store %arg18[%c0_100, %c0_101], %95 {strides = array<i32>} : memref<32x326xf32, #tpu.memory_space<vmem>>, vector<32x326xf32>,
    %97 = vector.broadcast %94 : vector<1x288xf32> to vector<16x288xf32>
    %98 = arith.mulf %93, %97 : vector<16x288xf32>
    %c0_102 = arith.constant 0 : index
    %c19_103 = arith.constant 19 : index
    %99 = vector.load %arg18[%c0_102, %c19_103] : memref<32x326xf32, #tpu.memory_space<vmem>>, vector<16x288xf32>
    tpu.vector_store %arg18[%c0_102, %c19_103], %98 {strides = array<i32>} : memref<32x326xf32, #tpu.memory_space<vmem>>, vector<16x288xf32>,
    %c0_104 = arith.constant 0 : index
    %c0_105 = arith.constant 0 : index
    %100 = vector.load %arg8[%c0_104, %c0_105] : memref<16x144xf32, #tpu.memory_space<vmem>>, vector<16x144xf32>
    %c0_106 = arith.constant 0 : index
    %c0_107 = arith.constant 0 : index
    %101 = vector.load %arg9[%c0_106, %c0_107] : memref<16x1xf32, #tpu.memory_space<vmem>>, vector<16x1xf32>
    %c0_108 = arith.constant 0 : index
    %c0_109 = arith.constant 0 : index
    %102 = vector.load %arg18[%c0_108, %c0_109] : memref<32x326xf32, #tpu.memory_space<vmem>>, vector<16x288xf32>
    %c0_110 = arith.constant 0 : index
    %c1_111 = arith.constant 1 : index
    %103 = vector.load %arg18[%c0_110, %c1_111] : memref<32x326xf32, #tpu.memory_space<vmem>>, vector<16x288xf32>
    %c0_112 = arith.constant 0 : index
    %c2_113 = arith.constant 2 : index
    %104 = vector.load %arg18[%c0_112, %c2_113] : memref<32x326xf32, #tpu.memory_space<vmem>>, vector<16x288xf32>
    %c0_114 = arith.constant 0 : index
    %c18_115 = arith.constant 18 : index
    %105 = vector.load %arg18[%c0_114, %c18_115] : memref<32x326xf32, #tpu.memory_space<vmem>>, vector<16x288xf32>
    %c0_116 = arith.constant 0 : index
    %c19_117 = arith.constant 19 : index
    %106 = vector.load %arg18[%c0_116, %c19_117] : memref<32x326xf32, #tpu.memory_space<vmem>>, vector<16x288xf32>
    %c0_118 = arith.constant 0 : index
    %c20_119 = arith.constant 20 : index
    %107 = vector.load %arg18[%c0_118, %c20_119] : memref<32x326xf32, #tpu.memory_space<vmem>>, vector<16x288xf32>
    %c0_120 = arith.constant 0 : index
    %c36_121 = arith.constant 36 : index
    %108 = vector.load %arg18[%c0_120, %c36_121] : memref<32x326xf32, #tpu.memory_space<vmem>>, vector<16x288xf32>
    %c0_122 = arith.constant 0 : index
    %c37_123 = arith.constant 37 : index
    %109 = vector.load %arg18[%c0_122, %c37_123] : memref<32x326xf32, #tpu.memory_space<vmem>>, vector<16x288xf32>
    %c0_124 = arith.constant 0 : index
    %c38_125 = arith.constant 38 : index
    %110 = vector.load %arg18[%c0_124, %c38_125] : memref<32x326xf32, #tpu.memory_space<vmem>>, vector<16x288xf32>
    %111 = tpu.concatenate %102, %103, %104, %105, %106, %107, %108, %109, %110 in 0 : vector<16x288xf32>, vector<16x288xf32>, vector<16x288xf32>, vector<16x288xf32>, vector<16x288xf32>, vector<16x288xf32>, vector<16x288xf32>, vector<16x288xf32>, vector<16x288xf32> -> vector<144x288xf32>
    %cst_126 = arith.constant dense<0.000000e+00> : vector<16x288xf32>
    %112 = tpu.matmul %100, %111, %cst_126 {dimension_numbers = #tpu.dot_dimension_numbers<[1], [0], [0], [1], [0, 0, 1, 1], [], []>} : vector<16x144xf32>, vector<144x288xf32>, vector<16x288xf32> -> vector<16x288xf32>
    %113 = vector.broadcast %101 : vector<16x1xf32> to vector<16x288xf32>
    %114 = arith.addf %112, %113 : vector<16x288xf32>
    %cst_127 = arith.constant 0.000000e+00 : f32
    %115 = vector.broadcast %cst_127 : f32 to vector<16x288xf32>
    %116 = arith.maximumf %114, %115 : vector<16x288xf32>
    %c0_128 = arith.constant 0 : index
    %c0_129 = arith.constant 0 : index
    %117 = vector.load %arg20[%c0_128, %c0_129] : memref<32x288xf32, #tpu.memory_space<vmem>>, vector<16x288xf32>
    tpu.vector_store %arg20[%c0_128, %c0_129], %116 {strides = array<i32>} : memref<32x288xf32, #tpu.memory_space<vmem>>, vector<16x288xf32>,
    %cst_130 = arith.constant 0.000000e+00 : f32
    %118 = vector.broadcast %cst_130 : f32 to vector<16x1158xf32>
    %c0_131 = arith.constant 0 : index
    %c0_132 = arith.constant 0 : index
    %119 = vector.load %arg19[%c0_131, %c0_132] : memref<16x1158xf32, #tpu.memory_space<vmem>>, vector<16x1158xf32>
    tpu.vector_store %arg19[%c0_131, %c0_132], %118 {strides = array<i32>} : memref<16x1158xf32, #tpu.memory_space<vmem>>, vector<16x1158xf32>,
    %120 = tpu.iota {dimensions = array<i32: 0>} : vector<16x32xi32>
    %121 = tpu.iota {dimensions = array<i32: 1>} : vector<16x32xi32>
    %c2_i32_133 = arith.constant 2 : i32
    %122 = vector.broadcast %c2_i32_133 : i32 to vector<16x32xi32>
    %123 = arith.muli %122, %120 : vector<16x32xi32>
    %124 = arith.cmpi eq, %121, %123 : vector<16x32xi32>
    %125 = arith.extui %124 : vector<16x32xi1> to vector<16x32xi32>
    %126 = arith.sitofp %125 : vector<16x32xi32> to vector<16x32xf32>
    %c0_134 = arith.constant 0 : index
    %c0_135 = arith.constant 0 : index
    %127 = vector.load %arg20[%c0_134, %c0_135] : memref<32x288xf32, #tpu.memory_space<vmem>>, vector<16x16xf32>
    %cst_136 = arith.constant dense<0.000000e+00> : vector<16x32xf32>
    %128 = tpu.matmul %127, %126, %cst_136 {dimension_numbers = #tpu.dot_dimension_numbers<[1], [0], [0], [1], [0, 0, 1, 1], [], []>} : vector<16x16xf32>, vector<16x32xf32>, vector<16x32xf32> -> vector<16x32xf32>
    %c0_137 = arith.constant 0 : index
    %c35 = arith.constant 35 : index
    %129 = vector.load %arg19[%c0_137, %c35] : memref<16x1158xf32, #tpu.memory_space<vmem>>, vector<16x32xf32>
    tpu.vector_store %arg19[%c0_137, %c35], %128 {strides = array<i32>} : memref<16x1158xf32, #tpu.memory_space<vmem>>, vector<16x32xf32>,
    %c0_138 = arith.constant 0 : index
    %c18_139 = arith.constant 18 : index
    %130 = vector.load %arg20[%c0_138, %c18_139] : memref<32x288xf32, #tpu.memory_space<vmem>>, vector<16x16xf32>
    %cst_140 = arith.constant dense<0.000000e+00> : vector<16x32xf32>
    %131 = tpu.matmul %130, %126, %cst_140 {dimension_numbers = #tpu.dot_dimension_numbers<[1], [0], [0], [1], [0, 0, 1, 1], [], []>} : vector<16x16xf32>, vector<16x32xf32>, vector<16x32xf32> -> vector<16x32xf32>
    %c0_141 = arith.constant 0 : index
    %c103 = arith.constant 103 : index
    %132 = vector.load %arg19[%c0_141, %c103] : memref<16x1158xf32, #tpu.memory_space<vmem>>, vector<16x32xf32>
    tpu.vector_store %arg19[%c0_141, %c103], %131 {strides = array<i32>} : memref<16x1158xf32, #tpu.memory_space<vmem>>, vector<16x32xf32>,
    %c0_142 = arith.constant 0 : index
    %c36_143 = arith.constant 36 : index
    %133 = vector.load %arg20[%c0_142, %c36_143] : memref<32x288xf32, #tpu.memory_space<vmem>>, vector<16x16xf32>
    %cst_144 = arith.constant dense<0.000000e+00> : vector<16x32xf32>
    %134 = tpu.matmul %133, %126, %cst_144 {dimension_numbers = #tpu.dot_dimension_numbers<[1], [0], [0], [1], [0, 0, 1, 1], [], []>} : vector<16x16xf32>, vector<16x32xf32>, vector<16x32xf32> -> vector<16x32xf32>
    %c0_145 = arith.constant 0 : index
    %c171 = arith.constant 171 : index
    %135 = vector.load %arg19[%c0_145, %c171] : memref<16x1158xf32, #tpu.memory_space<vmem>>, vector<16x32xf32>
    tpu.vector_store %arg19[%c0_145, %c171], %134 {strides = array<i32>} : memref<16x1158xf32, #tpu.memory_space<vmem>>, vector<16x32xf32>,
    %c0_146 = arith.constant 0 : index
    %c54 = arith.constant 54 : index
    %136 = vector.load %arg20[%c0_146, %c54] : memref<32x288xf32, #tpu.memory_space<vmem>>, vector<16x16xf32>
    %cst_147 = arith.constant dense<0.000000e+00> : vector<16x32xf32>
    %137 = tpu.matmul %136, %126, %cst_147 {dimension_numbers = #tpu.dot_dimension_numbers<[1], [0], [0], [1], [0, 0, 1, 1], [], []>} : vector<16x16xf32>, vector<16x32xf32>, vector<16x32xf32> -> vector<16x32xf32>
    %c0_148 = arith.constant 0 : index
    %c239 = arith.constant 239 : index
    %138 = vector.load %arg19[%c0_148, %c239] : memref<16x1158xf32, #tpu.memory_space<vmem>>, vector<16x32xf32>
    tpu.vector_store %arg19[%c0_148, %c239], %137 {strides = array<i32>} : memref<16x1158xf32, #tpu.memory_space<vmem>>, vector<16x32xf32>,
    %c0_149 = arith.constant 0 : index
    %c72 = arith.constant 72 : index
    %139 = vector.load %arg20[%c0_149, %c72] : memref<32x288xf32, #tpu.memory_space<vmem>>, vector<16x16xf32>
    %cst_150 = arith.constant dense<0.000000e+00> : vector<16x32xf32>
    %140 = tpu.matmul %139, %126, %cst_150 {dimension_numbers = #tpu.dot_dimension_numbers<[1], [0], [0], [1], [0, 0, 1, 1], [], []>} : vector<16x16xf32>, vector<16x32xf32>, vector<16x32xf32> -> vector<16x32xf32>
    %c0_151 = arith.constant 0 : index
    %c307 = arith.constant 307 : index
    %141 = vector.load %arg19[%c0_151, %c307] : memref<16x1158xf32, #tpu.memory_space<vmem>>, vector<16x32xf32>
    tpu.vector_store %arg19[%c0_151, %c307], %140 {strides = array<i32>} : memref<16x1158xf32, #tpu.memory_space<vmem>>, vector<16x32xf32>,
    %c0_152 = arith.constant 0 : index
    %c90 = arith.constant 90 : index
    %142 = vector.load %arg20[%c0_152, %c90] : memref<32x288xf32, #tpu.memory_space<vmem>>, vector<16x16xf32>
    %cst_153 = arith.constant dense<0.000000e+00> : vector<16x32xf32>
    %143 = tpu.matmul %142, %126, %cst_153 {dimension_numbers = #tpu.dot_dimension_numbers<[1], [0], [0], [1], [0, 0, 1, 1], [], []>} : vector<16x16xf32>, vector<16x32xf32>, vector<16x32xf32> -> vector<16x32xf32>
    %c0_154 = arith.constant 0 : index
    %c375 = arith.constant 375 : index
    %144 = vector.load %arg19[%c0_154, %c375] : memref<16x1158xf32, #tpu.memory_space<vmem>>, vector<16x32xf32>
    tpu.vector_store %arg19[%c0_154, %c375], %143 {strides = array<i32>} : memref<16x1158xf32, #tpu.memory_space<vmem>>, vector<16x32xf32>,
    %c0_155 = arith.constant 0 : index
    %c108 = arith.constant 108 : index
    %145 = vector.load %arg20[%c0_155, %c108] : memref<32x288xf32, #tpu.memory_space<vmem>>, vector<16x16xf32>
    %cst_156 = arith.constant dense<0.000000e+00> : vector<16x32xf32>
    %146 = tpu.matmul %145, %126, %cst_156 {dimension_numbers = #tpu.dot_dimension_numbers<[1], [0], [0], [1], [0, 0, 1, 1], [], []>} : vector<16x16xf32>, vector<16x32xf32>, vector<16x32xf32> -> vector<16x32xf32>
    %c0_157 = arith.constant 0 : index
    %c443 = arith.constant 443 : index
    %147 = vector.load %arg19[%c0_157, %c443] : memref<16x1158xf32, #tpu.memory_space<vmem>>, vector<16x32xf32>
    tpu.vector_store %arg19[%c0_157, %c443], %146 {strides = array<i32>} : memref<16x1158xf32, #tpu.memory_space<vmem>>, vector<16x32xf32>,
    %c0_158 = arith.constant 0 : index
    %c126 = arith.constant 126 : index
    %148 = vector.load %arg20[%c0_158, %c126] : memref<32x288xf32, #tpu.memory_space<vmem>>, vector<16x16xf32>
    %cst_159 = arith.constant dense<0.000000e+00> : vector<16x32xf32>
    %149 = tpu.matmul %148, %126, %cst_159 {dimension_numbers = #tpu.dot_dimension_numbers<[1], [0], [0], [1], [0, 0, 1, 1], [], []>} : vector<16x16xf32>, vector<16x32xf32>, vector<16x32xf32> -> vector<16x32xf32>
    %c0_160 = arith.constant 0 : index
    %c511 = arith.constant 511 : index
    %150 = vector.load %arg19[%c0_160, %c511] : memref<16x1158xf32, #tpu.memory_space<vmem>>, vector<16x32xf32>
    tpu.vector_store %arg19[%c0_160, %c511], %149 {strides = array<i32>} : memref<16x1158xf32, #tpu.memory_space<vmem>>, vector<16x32xf32>,
    %c0_161 = arith.constant 0 : index
    %c144 = arith.constant 144 : index
    %151 = vector.load %arg20[%c0_161, %c144] : memref<32x288xf32, #tpu.memory_space<vmem>>, vector<16x16xf32>
    %cst_162 = arith.constant dense<0.000000e+00> : vector<16x32xf32>
    %152 = tpu.matmul %151, %126, %cst_162 {dimension_numbers = #tpu.dot_dimension_numbers<[1], [0], [0], [1], [0, 0, 1, 1], [], []>} : vector<16x16xf32>, vector<16x32xf32>, vector<16x32xf32> -> vector<16x32xf32>
    %c0_163 = arith.constant 0 : index
    %c579 = arith.constant 579 : index
    %153 = vector.load %arg19[%c0_163, %c579] : memref<16x1158xf32, #tpu.memory_space<vmem>>, vector<16x32xf32>
    tpu.vector_store %arg19[%c0_163, %c579], %152 {strides = array<i32>} : memref<16x1158xf32, #tpu.memory_space<vmem>>, vector<16x32xf32>,
    %c0_164 = arith.constant 0 : index
    %c162 = arith.constant 162 : index
    %154 = vector.load %arg20[%c0_164, %c162] : memref<32x288xf32, #tpu.memory_space<vmem>>, vector<16x16xf32>
    %cst_165 = arith.constant dense<0.000000e+00> : vector<16x32xf32>
    %155 = tpu.matmul %154, %126, %cst_165 {dimension_numbers = #tpu.dot_dimension_numbers<[1], [0], [0], [1], [0, 0, 1, 1], [], []>} : vector<16x16xf32>, vector<16x32xf32>, vector<16x32xf32> -> vector<16x32xf32>
    %c0_166 = arith.constant 0 : index
    %c647 = arith.constant 647 : index
    %156 = vector.load %arg19[%c0_166, %c647] : memref<16x1158xf32, #tpu.memory_space<vmem>>, vector<16x32xf32>
    tpu.vector_store %arg19[%c0_166, %c647], %155 {strides = array<i32>} : memref<16x1158xf32, #tpu.memory_space<vmem>>, vector<16x32xf32>,
    %c0_167 = arith.constant 0 : index
    %c180 = arith.constant 180 : index
    %157 = vector.load %arg20[%c0_167, %c180] : memref<32x288xf32, #tpu.memory_space<vmem>>, vector<16x16xf32>
    %cst_168 = arith.constant dense<0.000000e+00> : vector<16x32xf32>
    %158 = tpu.matmul %157, %126, %cst_168 {dimension_numbers = #tpu.dot_dimension_numbers<[1], [0], [0], [1], [0, 0, 1, 1], [], []>} : vector<16x16xf32>, vector<16x32xf32>, vector<16x32xf32> -> vector<16x32xf32>
    %c0_169 = arith.constant 0 : index
    %c715 = arith.constant 715 : index
    %159 = vector.load %arg19[%c0_169, %c715] : memref<16x1158xf32, #tpu.memory_space<vmem>>, vector<16x32xf32>
    tpu.vector_store %arg19[%c0_169, %c715], %158 {strides = array<i32>} : memref<16x1158xf32, #tpu.memory_space<vmem>>, vector<16x32xf32>,
    %c0_170 = arith.constant 0 : index
    %c198 = arith.constant 198 : index
    %160 = vector.load %arg20[%c0_170, %c198] : memref<32x288xf32, #tpu.memory_space<vmem>>, vector<16x16xf32>
    %cst_171 = arith.constant dense<0.000000e+00> : vector<16x32xf32>
    %161 = tpu.matmul %160, %126, %cst_171 {dimension_numbers = #tpu.dot_dimension_numbers<[1], [0], [0], [1], [0, 0, 1, 1], [], []>} : vector<16x16xf32>, vector<16x32xf32>, vector<16x32xf32> -> vector<16x32xf32>
    %c0_172 = arith.constant 0 : index
    %c783 = arith.constant 783 : index
    %162 = vector.load %arg19[%c0_172, %c783] : memref<16x1158xf32, #tpu.memory_space<vmem>>, vector<16x32xf32>
    tpu.vector_store %arg19[%c0_172, %c783], %161 {strides = array<i32>} : memref<16x1158xf32, #tpu.memory_space<vmem>>, vector<16x32xf32>,
    %c0_173 = arith.constant 0 : index
    %c216 = arith.constant 216 : index
    %163 = vector.load %arg20[%c0_173, %c216] : memref<32x288xf32, #tpu.memory_space<vmem>>, vector<16x16xf32>
    %cst_174 = arith.constant dense<0.000000e+00> : vector<16x32xf32>
    %164 = tpu.matmul %163, %126, %cst_174 {dimension_numbers = #tpu.dot_dimension_numbers<[1], [0], [0], [1], [0, 0, 1, 1], [], []>} : vector<16x16xf32>, vector<16x32xf32>, vector<16x32xf32> -> vector<16x32xf32>
    %c0_175 = arith.constant 0 : index
    %c851 = arith.constant 851 : index
    %165 = vector.load %arg19[%c0_175, %c851] : memref<16x1158xf32, #tpu.memory_space<vmem>>, vector<16x32xf32>
    tpu.vector_store %arg19[%c0_175, %c851], %164 {strides = array<i32>} : memref<16x1158xf32, #tpu.memory_space<vmem>>, vector<16x32xf32>,
    %c0_176 = arith.constant 0 : index
    %c234 = arith.constant 234 : index
    %166 = vector.load %arg20[%c0_176, %c234] : memref<32x288xf32, #tpu.memory_space<vmem>>, vector<16x16xf32>
    %cst_177 = arith.constant dense<0.000000e+00> : vector<16x32xf32>
    %167 = tpu.matmul %166, %126, %cst_177 {dimension_numbers = #tpu.dot_dimension_numbers<[1], [0], [0], [1], [0, 0, 1, 1], [], []>} : vector<16x16xf32>, vector<16x32xf32>, vector<16x32xf32> -> vector<16x32xf32>
    %c0_178 = arith.constant 0 : index
    %c919 = arith.constant 919 : index
    %168 = vector.load %arg19[%c0_178, %c919] : memref<16x1158xf32, #tpu.memory_space<vmem>>, vector<16x32xf32>
    tpu.vector_store %arg19[%c0_178, %c919], %167 {strides = array<i32>} : memref<16x1158xf32, #tpu.memory_space<vmem>>, vector<16x32xf32>,
    %c0_179 = arith.constant 0 : index
    %c252 = arith.constant 252 : index
    %169 = vector.load %arg20[%c0_179, %c252] : memref<32x288xf32, #tpu.memory_space<vmem>>, vector<16x16xf32>
    %cst_180 = arith.constant dense<0.000000e+00> : vector<16x32xf32>
    %170 = tpu.matmul %169, %126, %cst_180 {dimension_numbers = #tpu.dot_dimension_numbers<[1], [0], [0], [1], [0, 0, 1, 1], [], []>} : vector<16x16xf32>, vector<16x32xf32>, vector<16x32xf32> -> vector<16x32xf32>
    %c0_181 = arith.constant 0 : index
    %c987 = arith.constant 987 : index
    %171 = vector.load %arg19[%c0_181, %c987] : memref<16x1158xf32, #tpu.memory_space<vmem>>, vector<16x32xf32>
    tpu.vector_store %arg19[%c0_181, %c987], %170 {strides = array<i32>} : memref<16x1158xf32, #tpu.memory_space<vmem>>, vector<16x32xf32>,
    %c0_182 = arith.constant 0 : index
    %c270 = arith.constant 270 : index
    %172 = vector.load %arg20[%c0_182, %c270] : memref<32x288xf32, #tpu.memory_space<vmem>>, vector<16x16xf32>
    %cst_183 = arith.constant dense<0.000000e+00> : vector<16x32xf32>
    %173 = tpu.matmul %172, %126, %cst_183 {dimension_numbers = #tpu.dot_dimension_numbers<[1], [0], [0], [1], [0, 0, 1, 1], [], []>} : vector<16x16xf32>, vector<16x32xf32>, vector<16x32xf32> -> vector<16x32xf32>
    %c0_184 = arith.constant 0 : index
    %c1055 = arith.constant 1055 : index
    %174 = vector.load %arg19[%c0_184, %c1055] : memref<16x1158xf32, #tpu.memory_space<vmem>>, vector<16x32xf32>
    tpu.vector_store %arg19[%c0_184, %c1055], %173 {strides = array<i32>} : memref<16x1158xf32, #tpu.memory_space<vmem>>, vector<16x32xf32>,
    %c0_185 = arith.constant 0 : index
    %c0_186 = arith.constant 0 : index
    %175 = vector.load %arg10[%c0_185, %c0_186] : memref<8x144xf32, #tpu.memory_space<vmem>>, vector<8x144xf32>
    %c0_187 = arith.constant 0 : index
    %c0_188 = arith.constant 0 : index
    %176 = vector.load %arg11[%c0_187, %c0_188] : memref<8x1xf32, #tpu.memory_space<vmem>>, vector<8x1xf32>
    %c0_189 = arith.constant 0 : index
    %c0_190 = arith.constant 0 : index
    %177 = vector.load %arg19[%c0_189, %c0_190] : memref<16x1158xf32, #tpu.memory_space<vmem>>, vector<16x1088xf32>
    %c0_191 = arith.constant 0 : index
    %c1_192 = arith.constant 1 : index
    %178 = vector.load %arg19[%c0_191, %c1_192] : memref<16x1158xf32, #tpu.memory_space<vmem>>, vector<16x1088xf32>
    %c0_193 = arith.constant 0 : index
    %c2_194 = arith.constant 2 : index
    %179 = vector.load %arg19[%c0_193, %c2_194] : memref<16x1158xf32, #tpu.memory_space<vmem>>, vector<16x1088xf32>
    %c0_195 = arith.constant 0 : index
    %c34 = arith.constant 34 : index
    %180 = vector.load %arg19[%c0_195, %c34] : memref<16x1158xf32, #tpu.memory_space<vmem>>, vector<16x1088xf32>
    %c0_196 = arith.constant 0 : index
    %c35_197 = arith.constant 35 : index
    %181 = vector.load %arg19[%c0_196, %c35_197] : memref<16x1158xf32, #tpu.memory_space<vmem>>, vector<16x1088xf32>
    %c0_198 = arith.constant 0 : index
    %c36_199 = arith.constant 36 : index
    %182 = vector.load %arg19[%c0_198, %c36_199] : memref<16x1158xf32, #tpu.memory_space<vmem>>, vector<16x1088xf32>
    %c0_200 = arith.constant 0 : index
    %c68 = arith.constant 68 : index
    %183 = vector.load %arg19[%c0_200, %c68] : memref<16x1158xf32, #tpu.memory_space<vmem>>, vector<16x1088xf32>
    %c0_201 = arith.constant 0 : index
    %c69 = arith.constant 69 : index
    %184 = vector.load %arg19[%c0_201, %c69] : memref<16x1158xf32, #tpu.memory_space<vmem>>, vector<16x1088xf32>
    %c0_202 = arith.constant 0 : index
    %c70_203 = arith.constant 70 : index
    %185 = vector.load %arg19[%c0_202, %c70_203] : memref<16x1158xf32, #tpu.memory_space<vmem>>, vector<16x1088xf32>
    %186 = tpu.concatenate %177, %178, %179, %180, %181, %182, %183, %184, %185 in 0 : vector<16x1088xf32>, vector<16x1088xf32>, vector<16x1088xf32>, vector<16x1088xf32>, vector<16x1088xf32>, vector<16x1088xf32>, vector<16x1088xf32>, vector<16x1088xf32>, vector<16x1088xf32> -> vector<144x1088xf32>
    %cst_204 = arith.constant dense<0.000000e+00> : vector<8x1088xf32>
    %187 = tpu.matmul %175, %186, %cst_204 {dimension_numbers = #tpu.dot_dimension_numbers<[1], [0], [0], [1], [0, 0, 1, 1], [], []>} : vector<8x144xf32>, vector<144x1088xf32>, vector<8x1088xf32> -> vector<8x1088xf32>
    %188 = vector.broadcast %176 : vector<8x1xf32> to vector<8x1088xf32>
    %189 = arith.addf %187, %188 : vector<8x1088xf32>
    %cst_205 = arith.constant 0.000000e+00 : f32
    %190 = vector.broadcast %cst_205 : f32 to vector<8x1088xf32>
    %191 = arith.maximumf %189, %190 : vector<8x1088xf32>
    %c0_206 = arith.constant 0 : index
    %c0_207 = arith.constant 0 : index
    %192 = vector.load %arg3[%c0_206, %c0_207] : memref<1x1088xf32, #tpu.memory_space<vmem>>, vector<1x1088xf32>
    %cst_208 = arith.constant 0.000000e+00 : f32
    %193 = vector.broadcast %cst_208 : f32 to vector<16x1158xf32>
    %c0_209 = arith.constant 0 : index
    %c0_210 = arith.constant 0 : index
    %194 = vector.load %arg19[%c0_209, %c0_210] : memref<16x1158xf32, #tpu.memory_space<vmem>>, vector<16x1158xf32>
    tpu.vector_store %arg19[%c0_209, %c0_210], %193 {strides = array<i32>} : memref<16x1158xf32, #tpu.memory_space<vmem>>, vector<16x1158xf32>,
    %195 = vector.broadcast %192 : vector<1x1088xf32> to vector<8x1088xf32>
    %196 = arith.mulf %191, %195 : vector<8x1088xf32>
    %c0_211 = arith.constant 0 : index
    %c35_212 = arith.constant 35 : index
    %197 = vector.load %arg19[%c0_211, %c35_212] : memref<16x1158xf32, #tpu.memory_space<vmem>>, vector<8x1088xf32>
    tpu.vector_store %arg19[%c0_211, %c35_212], %196 {strides = array<i32>} : memref<16x1158xf32, #tpu.memory_space<vmem>>, vector<8x1088xf32>,
    %c0_213 = arith.constant 0 : index
    %c0_214 = arith.constant 0 : index
    %198 = vector.load %arg12[%c0_213, %c0_214] : memref<8x72xf32, #tpu.memory_space<vmem>>, vector<8x72xf32>
    %c0_215 = arith.constant 0 : index
    %c0_216 = arith.constant 0 : index
    %199 = vector.load %arg13[%c0_215, %c0_216] : memref<8x1xf32, #tpu.memory_space<vmem>>, vector<8x1xf32>
    %c0_217 = arith.constant 0 : index
    %c0_218 = arith.constant 0 : index
    %200 = vector.load %arg19[%c0_217, %c0_218] : memref<16x1158xf32, #tpu.memory_space<vmem>>, vector<8x1088xf32>
    %c0_219 = arith.constant 0 : index
    %c1_220 = arith.constant 1 : index
    %201 = vector.load %arg19[%c0_219, %c1_220] : memref<16x1158xf32, #tpu.memory_space<vmem>>, vector<8x1088xf32>
    %c0_221 = arith.constant 0 : index
    %c2_222 = arith.constant 2 : index
    %202 = vector.load %arg19[%c0_221, %c2_222] : memref<16x1158xf32, #tpu.memory_space<vmem>>, vector<8x1088xf32>
    %c0_223 = arith.constant 0 : index
    %c34_224 = arith.constant 34 : index
    %203 = vector.load %arg19[%c0_223, %c34_224] : memref<16x1158xf32, #tpu.memory_space<vmem>>, vector<8x1088xf32>
    %c0_225 = arith.constant 0 : index
    %c35_226 = arith.constant 35 : index
    %204 = vector.load %arg19[%c0_225, %c35_226] : memref<16x1158xf32, #tpu.memory_space<vmem>>, vector<8x1088xf32>
    %c0_227 = arith.constant 0 : index
    %c36_228 = arith.constant 36 : index
    %205 = vector.load %arg19[%c0_227, %c36_228] : memref<16x1158xf32, #tpu.memory_space<vmem>>, vector<8x1088xf32>
    %c0_229 = arith.constant 0 : index
    %c68_230 = arith.constant 68 : index
    %206 = vector.load %arg19[%c0_229, %c68_230] : memref<16x1158xf32, #tpu.memory_space<vmem>>, vector<8x1088xf32>
    %c0_231 = arith.constant 0 : index
    %c69_232 = arith.constant 69 : index
    %207 = vector.load %arg19[%c0_231, %c69_232] : memref<16x1158xf32, #tpu.memory_space<vmem>>, vector<8x1088xf32>
    %c0_233 = arith.constant 0 : index
    %c70_234 = arith.constant 70 : index
    %208 = vector.load %arg19[%c0_233, %c70_234] : memref<16x1158xf32, #tpu.memory_space<vmem>>, vector<8x1088xf32>
    %209 = tpu.concatenate %200, %201, %202, %203, %204, %205, %206, %207, %208 in 0 : vector<8x1088xf32>, vector<8x1088xf32>, vector<8x1088xf32>, vector<8x1088xf32>, vector<8x1088xf32>, vector<8x1088xf32>, vector<8x1088xf32>, vector<8x1088xf32>, vector<8x1088xf32> -> vector<72x1088xf32>
    %cst_235 = arith.constant dense<0.000000e+00> : vector<8x1088xf32>
    %210 = tpu.matmul %198, %209, %cst_235 {dimension_numbers = #tpu.dot_dimension_numbers<[1], [0], [0], [1], [0, 0, 1, 1], [], []>} : vector<8x72xf32>, vector<72x1088xf32>, vector<8x1088xf32> -> vector<8x1088xf32>
    %211 = vector.broadcast %199 : vector<8x1xf32> to vector<8x1088xf32>
    %212 = arith.addf %210, %211 : vector<8x1088xf32>
    %cst_236 = arith.constant 0.000000e+00 : f32
    %213 = vector.broadcast %cst_236 : f32 to vector<8x1088xf32>
    %214 = arith.maximumf %212, %213 : vector<8x1088xf32>
    %c0_237 = arith.constant 0 : index
    %c0_238 = arith.constant 0 : index
    %215 = vector.load %arg3[%c0_237, %c0_238] : memref<1x1088xf32, #tpu.memory_space<vmem>>, vector<1x1088xf32>
    %cst_239 = arith.constant 0.000000e+00 : f32
    %216 = vector.broadcast %cst_239 : f32 to vector<16x1158xf32>
    %c0_240 = arith.constant 0 : index
    %c0_241 = arith.constant 0 : index
    %217 = vector.load %arg19[%c0_240, %c0_241] : memref<16x1158xf32, #tpu.memory_space<vmem>>, vector<16x1158xf32>
    tpu.vector_store %arg19[%c0_240, %c0_241], %216 {strides = array<i32>} : memref<16x1158xf32, #tpu.memory_space<vmem>>, vector<16x1158xf32>,
    %218 = vector.broadcast %215 : vector<1x1088xf32> to vector<8x1088xf32>
    %219 = arith.mulf %214, %218 : vector<8x1088xf32>
    %c0_242 = arith.constant 0 : index
    %c35_243 = arith.constant 35 : index
    %220 = vector.load %arg19[%c0_242, %c35_243] : memref<16x1158xf32, #tpu.memory_space<vmem>>, vector<8x1088xf32>
    tpu.vector_store %arg19[%c0_242, %c35_243], %219 {strides = array<i32>} : memref<16x1158xf32, #tpu.memory_space<vmem>>, vector<8x1088xf32>,
    %c0_244 = arith.constant 0 : index
    %c0_245 = arith.constant 0 : index
    %221 = vector.load %arg14[%c0_244, %c0_245] : memref<3x72xf32, #tpu.memory_space<vmem>>, vector<3x72xf32>
    %c0_246 = arith.constant 0 : index
    %c0_247 = arith.constant 0 : index
    %222 = vector.load %arg15[%c0_246, %c0_247] : memref<3x1xf32, #tpu.memory_space<vmem>>, vector<3x1xf32>
    %c0_248 = arith.constant 0 : index
    %c0_249 = arith.constant 0 : index
    %223 = vector.load %arg19[%c0_248, %c0_249] : memref<16x1158xf32, #tpu.memory_space<vmem>>, vector<8x1088xf32>
    %c0_250 = arith.constant 0 : index
    %c1_251 = arith.constant 1 : index
    %224 = vector.load %arg19[%c0_250, %c1_251] : memref<16x1158xf32, #tpu.memory_space<vmem>>, vector<8x1088xf32>
    %c0_252 = arith.constant 0 : index
    %c2_253 = arith.constant 2 : index
    %225 = vector.load %arg19[%c0_252, %c2_253] : memref<16x1158xf32, #tpu.memory_space<vmem>>, vector<8x1088xf32>
    %c0_254 = arith.constant 0 : index
    %c34_255 = arith.constant 34 : index
    %226 = vector.load %arg19[%c0_254, %c34_255] : memref<16x1158xf32, #tpu.memory_space<vmem>>, vector<8x1088xf32>
    %c0_256 = arith.constant 0 : index
    %c35_257 = arith.constant 35 : index
    %227 = vector.load %arg19[%c0_256, %c35_257] : memref<16x1158xf32, #tpu.memory_space<vmem>>, vector<8x1088xf32>
    %c0_258 = arith.constant 0 : index
    %c36_259 = arith.constant 36 : index
    %228 = vector.load %arg19[%c0_258, %c36_259] : memref<16x1158xf32, #tpu.memory_space<vmem>>, vector<8x1088xf32>
    %c0_260 = arith.constant 0 : index
    %c68_261 = arith.constant 68 : index
    %229 = vector.load %arg19[%c0_260, %c68_261] : memref<16x1158xf32, #tpu.memory_space<vmem>>, vector<8x1088xf32>
    %c0_262 = arith.constant 0 : index
    %c69_263 = arith.constant 69 : index
    %230 = vector.load %arg19[%c0_262, %c69_263] : memref<16x1158xf32, #tpu.memory_space<vmem>>, vector<8x1088xf32>
    %c0_264 = arith.constant 0 : index
    %c70_265 = arith.constant 70 : index
    %231 = vector.load %arg19[%c0_264, %c70_265] : memref<16x1158xf32, #tpu.memory_space<vmem>>, vector<8x1088xf32>
    %232 = tpu.concatenate %223, %224, %225, %226, %227, %228, %229, %230, %231 in 0 : vector<8x1088xf32>, vector<8x1088xf32>, vector<8x1088xf32>, vector<8x1088xf32>, vector<8x1088xf32>, vector<8x1088xf32>, vector<8x1088xf32>, vector<8x1088xf32>, vector<8x1088xf32> -> vector<72x1088xf32>
    %cst_266 = arith.constant dense<0.000000e+00> : vector<3x1088xf32>
    %233 = tpu.matmul %221, %232, %cst_266 {dimension_numbers = #tpu.dot_dimension_numbers<[1], [0], [0], [1], [0, 0, 1, 1], [], []>} : vector<3x72xf32>, vector<72x1088xf32>, vector<3x1088xf32> -> vector<3x1088xf32>
    %234 = vector.broadcast %222 : vector<3x1xf32> to vector<3x1088xf32>
    %235 = arith.addf %233, %234 : vector<3x1088xf32>
    %c0_267 = arith.constant 0 : index
    %c0_268 = arith.constant 0 : index
    %c0_269 = arith.constant 0 : index
    %236 = vector.load %arg16[%c0_267, %c0_268, %c0_269] : memref<1x3x1088xf32, #tpu.memory_space<vmem>>, vector<1x3x1088xf32>
    %237 = vector.shape_cast %236 : vector<1x3x1088xf32> to vector<3x1088xf32>
    %238 = vector.shape_cast %235 : vector<3x1088xf32> to vector<1x3x1088xf32>
    tpu.vector_store %arg16[%c0_267, %c0_268, %c0_269], %238 {strides = array<i32>} : memref<1x3x1088xf32, #tpu.memory_space<vmem>>, vector<1x3x1088xf32>,
    return
  }
  func.func @transform_0(%arg0: i32) -> (i32, i32, i32) {
    %c0_i32 = arith.constant 0 : i32
    %c0_i32_0 = arith.constant 0 : i32
    %c0_i32_1 = arith.constant 0 : i32
    return %arg0, %c0_i32, %c0_i32_0 : i32, i32, i32
  }
  func.func @transform_1(%arg0: i32) -> (i32, i32) {
    %c0_i32 = arith.constant 0 : i32
    %c0_i32_0 = arith.constant 0 : i32
    %c0_i32_1 = arith.constant 0 : i32
    return %c0_i32, %c0_i32_0 : i32, i32
  }
  func.func @transform_2(%arg0: i32) -> (i32, i32) {
    %c0_i32 = arith.constant 0 : i32
    %c0_i32_0 = arith.constant 0 : i32
    %c0_i32_1 = arith.constant 0 : i32
    return %c0_i32, %c0_i32_0 : i32, i32
  }
  func.func @transform_3(%arg0: i32) -> (i32, i32) {
    %c0_i32 = arith.constant 0 : i32
    %c0_i32_0 = arith.constant 0 : i32
    %c0_i32_1 = arith.constant 0 : i32
    return %c0_i32, %c0_i32_0 : i32, i32
  }
  func.func @transform_4(%arg0: i32) -> (i32, i32) {
    %c0_i32 = arith.constant 0 : i32
    %c0_i32_0 = arith.constant 0 : i32
    %c0_i32_1 = arith.constant 0 : i32
    return %c0_i32, %c0_i32_0 : i32, i32
  }
  func.func @transform_5(%arg0: i32) -> (i32, i32) {
    %c0_i32 = arith.constant 0 : i32
    %c0_i32_0 = arith.constant 0 : i32
    %c0_i32_1 = arith.constant 0 : i32
    return %c0_i32, %c0_i32_0 : i32, i32
  }
  func.func @transform_6(%arg0: i32) -> (i32, i32) {
    %c0_i32 = arith.constant 0 : i32
    %c0_i32_0 = arith.constant 0 : i32
    %c0_i32_1 = arith.constant 0 : i32
    return %c0_i32, %c0_i32_0 : i32, i32
  }
  func.func @transform_7(%arg0: i32) -> (i32, i32) {
    %c0_i32 = arith.constant 0 : i32
    %c0_i32_0 = arith.constant 0 : i32
    %c0_i32_1 = arith.constant 0 : i32
    return %c0_i32, %c0_i32_0 : i32, i32
  }
  func.func @transform_8(%arg0: i32) -> (i32, i32) {
    %c0_i32 = arith.constant 0 : i32
    %c0_i32_0 = arith.constant 0 : i32
    %c0_i32_1 = arith.constant 0 : i32
    return %c0_i32, %c0_i32_0 : i32, i32
  }
  func.func @transform_9(%arg0: i32) -> (i32, i32) {
    %c0_i32 = arith.constant 0 : i32
    %c0_i32_0 = arith.constant 0 : i32
    %c0_i32_1 = arith.constant 0 : i32
    return %c0_i32, %c0_i32_0 : i32, i32
  }
  func.func @transform_10(%arg0: i32) -> (i32, i32) {
    %c0_i32 = arith.constant 0 : i32
    %c0_i32_0 = arith.constant 0 : i32
    %c0_i32_1 = arith.constant 0 : i32
    return %c0_i32, %c0_i32_0 : i32, i32
  }
  func.func @transform_11(%arg0: i32) -> (i32, i32) {
    %c0_i32 = arith.constant 0 : i32
    %c0_i32_0 = arith.constant 0 : i32
    %c0_i32_1 = arith.constant 0 : i32
    return %c0_i32, %c0_i32_0 : i32, i32
  }
  func.func @transform_12(%arg0: i32) -> (i32, i32) {
    %c0_i32 = arith.constant 0 : i32
    %c0_i32_0 = arith.constant 0 : i32
    %c0_i32_1 = arith.constant 0 : i32
    return %c0_i32, %c0_i32_0 : i32, i32
  }
  func.func @transform_13(%arg0: i32) -> (i32, i32) {
    %c0_i32 = arith.constant 0 : i32
    %c0_i32_0 = arith.constant 0 : i32
    %c0_i32_1 = arith.constant 0 : i32
    return %c0_i32, %c0_i32_0 : i32, i32
  }
  func.func @transform_14(%arg0: i32) -> (i32, i32) {
    %c0_i32 = arith.constant 0 : i32
    %c0_i32_0 = arith.constant 0 : i32
    %c0_i32_1 = arith.constant 0 : i32
    return %c0_i32, %c0_i32_0 : i32, i32
  }
  func.func @transform_15(%arg0: i32) -> (i32, i32, i32) {
    %c0_i32 = arith.constant 0 : i32
    %c0_i32_0 = arith.constant 0 : i32
    %c0_i32_1 = arith.constant 0 : i32
    return %arg0, %c0_i32, %c0_i32_0 : i32, i32, i32
  }
}

</mosaic_0001>

<bundles_post_ra>
// kernel: decoder_forward_pallas.1
= control target key start
LH: loop header
LB: loop body
LE: loop exit
PB: predicated region body
PF: predicated region fallthrough
CT: control target
= control target key end

     0   :  { %s10111_s18 = smov 0   ;;  %s12711_s0 = inlined_call_operand.vmem [shape: f32[2,32,64], index: 0, kind: input, shape index: {}]   ;;  %s12712_s1 = inlined_call_operand.vmem [shape: f32[1,288], index: 1, kind: input, shape index: {}]   ;;  %s12713_s2 = inlined_call_operand.vmem [shape: f32[1,1088], index: 2, kind: input, shape index: {}]   ;;  %s12714_s3 = inlined_call_operand.vmem [shape: f32[32,288], index: 3, kind: input, shape index: {}]   ;;  %s12715_s4 = inlined_call_operand.vmem [shape: f32[32,1], index: 4, kind: input, shape index: {}]   ;;  %s12716_s5 = inlined_call_operand.vmem [shape: f32[16,288], index: 5, kind: input, shape index: {}]   ;;  %s12717_s6 = inlined_call_operand.vmem [shape: f32[16,1], index: 6, kind: input, shape index: {}]   ;;  %s12718_s7 = inlined_call_operand.vmem [shape: f32[16,144], index: 7, kind: input, shape index: {}]   ;;  %s12719_s8 = inlined_call_operand.vmem [shape: f32[16,1], index: 8, kind: input, shape index: {}]   ;;  %s12720_s9 = inlined_call_operand.vmem [shape: f32[8,144], index: 9, kind: input, shape index: {}]   ;;  %s12721_s10 = inlined_call_operand.vmem [shape: f32[8,1], index: 10, kind: input, shape index: {}]   ;;  %s12722_s11 = inlined_call_operand.vmem [shape: f32[8,72], index: 11, kind: input, shape index: {}]   ;;  %s12723_s12 = inlined_call_operand.vmem [shape: f32[8,1], index: 12, kind: input, shape index: {}]   ;;  %s12724_s13 = inlined_call_operand.vmem [shape: f32[3,72], index: 13, kind: input, shape index: {}]   ;;  %s12725_s14 = inlined_call_operand.vmem [shape: f32[3,1], index: 14, kind: input, shape index: {}]   ;;  %s12726_s15 = inlined_call_operand.vmem [shape: f32[2,3,1088], index: 15, kind: output, shape index: {}]  }
   0x1 LB: > { %s7573_s19 = sadd.s32 4294967295, %s9969_s18   ;;  %p7577_p0 = scmp.ge.s32.totalorder %s9969_s18, 1  ;;  %s9969_s18 = sphi %s10111_s18, %s25_s18  }
   0x2   : > { %p437_p1 = scmp.lt.s32.totalorder %s9969_s18, 3 }
   0x4   : > { %p438_p2 = pnand %p7577_p0, %p437_p1 }
   0x5   : > { %p10121_p3 = scmp.lt.s32.totalorder (!%p438_p2), %s7573_s19, 1  ;;  %vm495_vm0 = vcmask (!%p438_p2), 834560   ;;  %v9971_v0 = vmov (!%p438_p2), 0.0   ;;  %s9972_s25 = smov (!%p438_p2), 13   ;;  %vm520_vm1 = vcmask (!%p438_p2), 154712   ;;  %vm545_vm2 = vcmask (!%p438_p2), 236712  }
   0x6   : > { %441 = sbr.rel (%p438_p2) target bundleno = 4031 (0xfbf), region = 80  ;;  %496 = vst.msk [vmem:[#allocation2] sm:$0xff] (!%p438_p2), %vm495_vm0, %v9971_v0  ;;  %497 = vst.msk [vmem:[#allocation2 + $0x8] sm:$0xff] (!%p438_p2), %vm495_vm0, %v9971_v0  ;;  %s9973_s26 = smov (!%p438_p2), 11   ;;  %vm570_vm3 = vcmask (!%p438_p2), 318712   ;;  %vm595_vm4 = vcmask (!%p438_p2), 400712  }
   0x7   : > { %498 = vst.msk [vmem:[#allocation2 + $0x10] sm:$0xff] (!%p438_p2), %vm495_vm0, %v9971_v0  ;;  %499 = vst.msk [vmem:[#allocation2 + $0x18] sm:$0xff] (!%p438_p2), %vm495_vm0, %v9971_v0  ;;  %s12731_s27 = smov (!%p438_p2), 15   ;;  %s9975_s28 = smov (!%p438_p2), 17   ;;  %vm620_vm5 = vcmask (!%p438_p2), 482712   ;;  %vm645_vm6 = vcmask (!%p438_p2), 564712  }
   0x8   : > { %1032 = vst [vmem:[#allocation3] sm:$0xff] (!%p438_p2), %v9971_v0  ;;  %1033 = vst [vmem:[#allocation3 + $0x8] sm:$0xff] (!%p438_p2), %v9971_v0  ;;  %s9976_s29 = smov (!%p438_p2), 19   ;;  %s9977_s30 = smov (!%p438_p2), 21   ;;  %vm670_vm7 = vcmask (!%p438_p2), 646712   ;;  %vm695_vm8 = vcmask (!%p438_p2), 728712  }
   0x9   : > { %1036 = vst [vmem:[#allocation3 + $0x18] sm:$0xff] (!%p438_p2), %v9971_v0  ;;  %1037 = vst [vmem:[#allocation3 + $0x20] sm:$0xff] (!%p438_p2), %v9971_v0  ;;  %s12727_s16 = smov (!%p438_p2), 23   ;;  %s9979_s17 = smov (!%p438_p2), 25   ;;  %v701_v45 = vld [vmem:[%s12714_s3 + $0x8] sm:$0xff] (!%p438_p2)  ;;  %v702_v46 = vld [vmem:[%s12714_s3 + $0x10] sm:$0xff] (!%p438_p2) }
   0xa   : > { %1039 = vst [vmem:[#allocation3 + $0x30] sm:$0xff] (!%p438_p2), %v9971_v0  ;;  %1040 = vst [vmem:[#allocation3 + $0x38] sm:$0xff] (!%p438_p2), %v9971_v0  ;;  %s9980_s20 = smov (!%p438_p2), 117   ;;  %s9982_s22 = smov (!%p438_p2), 108   ;;  %917 = vmatprep.mubr.f32.mxu0 (!%p438_p2), %v701_v45  ;;  %vm840_vm9 = vcmask (!%p438_p2), 261120   ;;  %v712_v47 = vld [vmem:[%s12715_s4] sm:$0xff] (!%p438_p2) }
   0xb   : > { %1042 = vst [vmem:[#allocation3 + $0x48] sm:$0xff] (!%p438_p2), %v9971_v0  ;;  %1043 = vst [vmem:[#allocation3 + $0x50] sm:$0xff] (!%p438_p2), %v9971_v0  ;;  %s12733_s23 = smov (!%p438_p2), 127   ;;  %7947 = vmatprep.mubr.msk.f32.mxu1 (!%p438_p2), %vm840_vm9, %v702_v46  ;;  %v9988_v48 = vmov (!%p438_p2), 0   ;;  %v713_v49 = vld [vmem:[%s12715_s4 + $0x8] sm:$0xff] (!%p438_p2)  ;;  %v715_v50 = vld [vmem:[%s12715_s4 + $0x18] sm:$0xff] (!%p438_p2) }
   0xc   : > { %3256 = vst [vmem:[#allocation4] sm:$0xff] (!%p438_p2), %v9971_v0  ;;  %3257 = vst [vmem:[#allocation4 + $0x8] sm:$0xff] (!%p438_p2), %v9971_v0  ;;  %8941 = vset.pattern.permute.xlu0 (!%p438_p2), %v9988_v48  ;;  %8942 = vset.pattern.permute.xlu1 (!%p438_p2), %v9988_v48  ;;  %v714_v51 = vld [vmem:[%s12715_s4 + $0x10] sm:$0xff] (!%p438_p2)  ;;  %vm1027_vm11 = vcmask (!%p438_p2), 654336   ;;  %vm1057_vm12 = vcmask (!%p438_p2), 64512   ;;  %vm1171_vm13 = vcmask (!%p438_p2), 285848  }
   0xd   : > { %3258 = vst [vmem:[#allocation4 + $0x10] sm:$0xff] %v9971_v0  ;;  %3259 = vst [vmem:[#allocation4 + $0x18] sm:$0xff] %v9971_v0  ;;  %s12791_s19 = smov (!%p10121_p3, %s7573_s19), 1  ;;  %vm1034_vm14 = vcmask 572416   ;;  %vm1301_vm15 = vcmask 581048   ;;  %vm1431_vm0 = vcmask 876248  }
   0xe   : > { %3260 = vst [vmem:[#allocation4 + $0x20] sm:$0xff] %v9971_v0  ;;  %3261 = vst [vmem:[#allocation4 + $0x28] sm:$0xff] %v9971_v0  ;;  %s7718_s21 = sshll.u32 %s12791_s19, 5 }
   0xf   : > { %3262 = vst [vmem:[#allocation4 + $0x30] sm:$0xff] %v9971_v0  ;;  %3263 = vst [vmem:[#allocation4 + $0x38] sm:$0xff] %v9971_v0  ;;  %s489_s24 = scalar_lea.vmem %s12711_s0, %s7718_s21  ;;  %s9981_s21 = smov 116  }
  0x10   : > { %3264 = vst [vmem:[#allocation4 + $0x40] sm:$0xff] %v9971_v0  ;;  %3267 = vst [vmem:[#allocation4 + $0x50] sm:$0xff] %v9971_v0  ;;  %v525_v1 = vld [vmem:[%s489_s24] sm:$0xff]  ;;  %v526_v2 = vld [vmem:[%s489_s24 + $0x8] sm:$0xff] }
  0x11   : > { %3268 = vst [vmem:[#allocation4 + $0x58] sm:$0xff] %v9971_v0  ;;  %3269 = vst [vmem:[#allocation4 + $0x60] sm:$0xff] %v9971_v0  ;;  %533 = vrot.lane.b32.xlu1 %v525_v1, %s9972_s25  ;;  %508 = vrot.lane.b32.xlu0 %v525_v1, %s9973_s26  ;;  %v503_v3 = vld [vmem:[%s489_s24 + $0x18] sm:$0xff]  ;;  %v502_v4 = vld [vmem:[%s489_s24 + $0x10] sm:$0xff]  ;;  %s12735_s24 = smov 107  }
  0x12   : > { %3270 = vst [vmem:[#allocation4 + $0x68] sm:$0xff] %v9971_v0  ;;  %3271 = vst [vmem:[#allocation4 + $0x70] sm:$0xff] %v9971_v0 }
  0x13   : > { %3272 = vst [vmem:[#allocation4 + $0x78] sm:$0xff] %v9971_v0  ;;  %3273 = vst [vmem:[#allocation4 + $0x80] sm:$0xff] %v9971_v0 }
  0x14   : > { %3274 = vst [vmem:[#allocation4 + $0x88] sm:$0xff] %v9971_v0  ;;  %3275 = vst [vmem:[#allocation4 + $0x90] sm:$0xff] %v9971_v0 }
  0x15   : > { %535 = vrot.lane.b32.xlu1 %v526_v2, %s9972_s25  ;;  %510 = vrot.lane.b32.xlu0 %v526_v2, %s9973_s26 }
  0x19   : > { %560 = vrot.lane.b32.xlu1 %v526_v2, %s12731_s27  ;;  %558 = vrot.lane.b32.xlu0 %v525_v1, %s12731_s27 }
  0x1d   : > { %585 = vrot.lane.b32.xlu1 %v526_v2, %s9975_s28  ;;  %583 = vrot.lane.b32.xlu0 %v525_v1, %s9975_s28 }
  0x21   : > { %514 = vrot.lane.b32.xlu1 %v503_v3, %s9973_s26  ;;  %512 = vrot.lane.b32.xlu0 %v502_v4, %s9973_s26  ;;  %s9996_s26 = smov 55  }
  0x25   : > { %610 = vrot.lane.b32.xlu1 %v526_v2, %s9976_s29  ;;  %608 = vrot.lane.b32.xlu0 %v525_v1, %s9976_s29 }
  0x29   : > { %539 = vrot.lane.b32.xlu1 %v503_v3, %s9972_s25  ;;  %537 = vrot.lane.b32.xlu0 %v502_v4, %s9972_s25  ;;  %s12729_s25 = smov 126  }
  0x2d   : > { %635 = vrot.lane.b32.xlu1 %v526_v2, %s9977_s30  ;;  %633 = vrot.lane.b32.xlu0 %v525_v1, %s9977_s30 }
  0x31   : > { %564 = vrot.lane.b32.xlu1 %v503_v3, %s12731_s27  ;;  %562 = vrot.lane.b32.xlu0 %v502_v4, %s12731_s27  ;;  %s9990_s27 = smov 78  }
  0x35   : > { %660 = vrot.lane.b32.xlu1 %v526_v2, %s12727_s16  ;;  %658 = vrot.lane.b32.xlu0 %v525_v1, %s12727_s16 }
  0x39   : > { %589 = vrot.lane.b32.xlu1 %v503_v3, %s9975_s28  ;;  %587 = vrot.lane.b32.xlu0 %v502_v4, %s9975_s28  ;;  %s9997_s28 = smov 91  }
  0x3d   : > { %685 = vrot.lane.b32.xlu1 %v526_v2, %s9979_s17  ;;  %683 = vrot.lane.b32.xlu0 %v525_v1, %s9979_s17 }
  0x41   : > { %614 = vrot.lane.b32.xlu1 %v503_v3, %s9976_s29  ;;  %612 = vrot.lane.b32.xlu0 %v502_v4, %s9976_s29 }
  0x45   : > { %639 = vrot.lane.b32.xlu1 %v503_v3, %s9977_s30  ;;  %637 = vrot.lane.b32.xlu0 %v502_v4, %s9977_s30  ;;  %s9986_s30 = smov 106  }
  0x49   : > { %664 = vrot.lane.b32.xlu1 %v503_v3, %s12727_s16  ;;  %662 = vrot.lane.b32.xlu0 %v502_v4, %s12727_s16  ;;  %s9991_s16 = smov 98  }
  0x4d   : > { %689 = vrot.lane.b32.xlu1 %v503_v3, %s9979_s17  ;;  %687 = vrot.lane.b32.xlu0 %v502_v4, %s9979_s17  ;;  %s9987_s17 = smov 118  }
  0x83   : > { %v534_v5 = vpop.permute.xlu1 %533  ;;  %v509_v6 = vpop.permute.xlu0 %508 }
  0x84   : > { %521 = vst.msk [vmem:[#allocation2] sm:$0xff] %vm520_vm1, %v509_v6 }
  0x85   : > { %546 = vst.msk [vmem:[#allocation2] sm:$0xff] %vm545_vm2, %v534_v5 }
  0x87   : > { %v536_v7 = vpop.permute.xlu1 %535  ;;  %v511_v8 = vpop.permute.xlu0 %510 }
  0x88   : > { %522 = vst.msk [vmem:[#allocation2 + $0x8] sm:$0xff] %vm520_vm1, %v511_v8 }
  0x89   : > { %547 = vst.msk [vmem:[#allocation2 + $0x8] sm:$0xff] %vm545_vm2, %v536_v7 }
  0x8b   : > { %v561_v9 = vpop.permute.xlu1 %560  ;;  %v559_v10 = vpop.permute.xlu0 %558 }
  0x8c   : > { %572 = vst.msk [vmem:[#allocation2 + $0x8] sm:$0xff] %vm570_vm3, %v561_v9  ;;  %571 = vst.msk [vmem:[#allocation2] sm:$0xff] %vm570_vm3, %v559_v10 }
  0x8f   : > { %v586_v11 = vpop.permute.xlu1 %585  ;;  %v584_v12 = vpop.permute.xlu0 %583 }
  0x90   : > { %597 = vst.msk [vmem:[#allocation2 + $0x8] sm:$0xff] %vm595_vm4, %v586_v11  ;;  %596 = vst.msk [vmem:[#allocation2] sm:$0xff] %vm595_vm4, %v584_v12 }
  0x93   : > { %v515_v13 = vpop.permute.xlu1 %514  ;;  %v513_v14 = vpop.permute.xlu0 %512 }
  0x94   : > { %524 = vst.msk [vmem:[#allocation2 + $0x18] sm:$0xff] %vm520_vm1, %v515_v13  ;;  %523 = vst.msk [vmem:[#allocation2 + $0x10] sm:$0xff] %vm520_vm1, %v513_v14  ;;  %vm1561_vm1 = vcmask 1048568  }
  0x97   : > { %v611_v15 = vpop.permute.xlu1 %610  ;;  %v609_v16 = vpop.permute.xlu0 %608 }
  0x98   : > { %622 = vst.msk [vmem:[#allocation2 + $0x8] sm:$0xff] %vm620_vm5, %v611_v15  ;;  %621 = vst.msk [vmem:[#allocation2] sm:$0xff] %vm620_vm5, %v609_v16 }
  0x9b   : > { %v540_v17 = vpop.permute.xlu1 %539  ;;  %v538_v18 = vpop.permute.xlu0 %537 }
  0x9c   : > { %549 = vst.msk [vmem:[#allocation2 + $0x18] sm:$0xff] %vm545_vm2, %v540_v17  ;;  %548 = vst.msk [vmem:[#allocation2 + $0x10] sm:$0xff] %vm545_vm2, %v538_v18  ;;  %vm1563_vm2 = vcmask 121856  }
  0x9f   : > { %v636_v19 = vpop.permute.xlu1 %635  ;;  %v634_v20 = vpop.permute.xlu0 %633 }
  0xa0   : > { %647 = vst.msk [vmem:[#allocation2 + $0x8] sm:$0xff] %vm645_vm6, %v636_v19  ;;  %646 = vst.msk [vmem:[#allocation2] sm:$0xff] %vm645_vm6, %v634_v20 }
  0xa3   : > { %v565_v21 = vpop.permute.xlu1 %564  ;;  %v563_v22 = vpop.permute.xlu0 %562 }
  0xa4   : > { %574 = vst.msk [vmem:[#allocation2 + $0x18] sm:$0xff] %vm570_vm3, %v565_v21  ;;  %573 = vst.msk [vmem:[#allocation2 + $0x10] sm:$0xff] %vm570_vm3, %v563_v22  ;;  %vm1696_vm3 = vcmask 417048  }
  0xa7   : > { %v661_v23 = vpop.permute.xlu1 %660  ;;  %v659_v24 = vpop.permute.xlu0 %658 }
  0xa8   : > { %672 = vst.msk [vmem:[#allocation2 + $0x8] sm:$0xff] %vm670_vm7, %v661_v23  ;;  %671 = vst.msk [vmem:[#allocation2] sm:$0xff] %vm670_vm7, %v659_v24 }
  0xab   : > { %v590_v25 = vpop.permute.xlu1 %589  ;;  %v588_v26 = vpop.permute.xlu0 %587 }
  0xac   : > { %599 = vst.msk [vmem:[#allocation2 + $0x18] sm:$0xff] %vm595_vm4, %v590_v25  ;;  %598 = vst.msk [vmem:[#allocation2 + $0x10] sm:$0xff] %vm595_vm4, %v588_v26  ;;  %vm1826_vm4 = vcmask 712248  }
  0xaf   : > { %v686_v27 = vpop.permute.xlu1 %685  ;;  %v684_v28 = vpop.permute.xlu0 %683 }
  0xb0   : > { %697 = vst.msk [vmem:[#allocation2 + $0x8] sm:$0xff] %vm695_vm8, %v686_v27  ;;  %696 = vst.msk [vmem:[#allocation2] sm:$0xff] %vm695_vm8, %v684_v28 }
  0xb3   : > { %v615_v29 = vpop.permute.xlu1 %614  ;;  %v613_v30 = vpop.permute.xlu0 %612 }
  0xb4   : > { %624 = vst.msk [vmem:[#allocation2 + $0x18] sm:$0xff] %vm620_vm5, %v615_v29  ;;  %623 = vst.msk [vmem:[#allocation2 + $0x10] sm:$0xff] %vm620_vm5, %v613_v30  ;;  %vm1956_vm5 = vcmask 1007448  }
  0xb7   : > { %v640_v31 = vpop.permute.xlu1 %639  ;;  %v638_v32 = vpop.permute.xlu0 %637  ;;  %v10173_v33 = vld [vmem:[#allocation2] sm:$0xff]  ;;  %v717_v34 = vld [vmem:[#allocation2 + $0x8] sm:$0xff] }
  0xb8   : > { %649 = vst.msk [vmem:[#allocation2 + $0x18] sm:$0xff] %vm645_vm6, %v640_v31  ;;  %648 = vst.msk [vmem:[#allocation2 + $0x10] sm:$0xff] %vm645_vm6, %v638_v32  ;;  %v8861_v35 = vpack.i.bf16 %v717_v34, %v10173_v33  ;;  %v8184_v36 = vpack.c.bf16 %v717_v34, %v10173_v33  ;;  %vm2086_vm6 = vcmask 253048  }
  0xba   : > { %8862 = vrot.lane.b32.xlu0 %v8861_v35, %s9980_s20 }
  0xbb   : > { %v665_v37 = vpop.permute.xlu1 %664  ;;  %v663_v38 = vpop.permute.xlu0 %662 }
  0xbc   : > { %674 = vst.msk [vmem:[#allocation2 + $0x18] sm:$0xff] %vm670_vm7, %v665_v37  ;;  %673 = vst.msk [vmem:[#allocation2 + $0x10] sm:$0xff] %vm670_vm7, %v663_v38  ;;  %vm2147_vm7 = vcmask 1039360  }
  0xbe   : > { %8872 = vrot.lane.b32.xlu0 %v8861_v35, %s9981_s21 }
  0xbf   : > { %v690_v39 = vpop.permute.xlu1 %689  ;;  %v688_v40 = vpop.permute.xlu0 %687 }
  0xc0   : > { %699 = vst.msk [vmem:[#allocation2 + $0x18] sm:$0xff] %vm695_vm8, %v690_v39  ;;  %698 = vst.msk [vmem:[#allocation2 + $0x10] sm:$0xff] %vm695_vm8, %v688_v40  ;;  %vm2192_vm8 = vcmask 1031168  }
  0xc7   : > { %v718_v41 = vld [vmem:[#allocation2 + $0x10] sm:$0xff]  ;;  %v719_v42 = vld [vmem:[#allocation2 + $0x18] sm:$0xff] }
  0xc8   : > { %v8881_v43 = vpack.i.bf16 %v719_v42, %v718_v41  ;;  %v8188_v44 = vpack.c.bf16 %v719_v42, %v718_v41 }
  0xca   : > { %8882 = vrot.lane.b32.xlu0 %v8881_v43, %s9981_s21  ;;  %8867 = vrot.lane.b32.xlu1 %v8881_v43, %s9980_s20  ;;  %s12763_s20 = smov 107   ;;  %s9998_s21 = smov 71  }
  0xce   : > { %8892 = vrot.lane.b32.xlu0 %v8861_v35, %s9982_s22  ;;  %8877 = vrot.lane.b32.xlu1 %v8861_v35, %s12733_s23 }
  0xd2   : > { %8902 = vrot.lane.b32.xlu0 %v8881_v43, %s9982_s22  ;;  %8887 = vrot.lane.b32.xlu1 %v8881_v43, %s12733_s23  ;;  %s9992_s23 = smov 88  }
  0xd6   : > { %8912 = vrot.lane.b32.xlu0 %v8861_v35, %s12735_s24  ;;  %8897 = vrot.lane.b32.xlu1 %v8861_v35, %s12729_s25 }
  0xda   : > { %8922 = vrot.lane.b32.xlu0 %v8881_v43, %s12735_s24  ;;  %8907 = vrot.lane.b32.xlu1 %v8881_v43, %s12729_s25  ;;  %s12739_s25 = smov 58   ;;  %s12764_s24 = smov 127  }
  0xde   : > { %8932 = vrot.lane.b32.xlu0 %v8861_v35, %s9986_s30  ;;  %8917 = vrot.lane.b32.xlu1 %v8861_v35, %s9987_s17 }
  0xe2   : > { %8927 = vrot.lane.b32.xlu1 %v8881_v43, %s9987_s17  ;;  %822 = vperm.xlu0 %8941, %v712_v47  }
  0xe6   : > { %8937 = vrot.lane.b32.xlu1 %v8881_v43, %s9986_s30  ;;  %837 = vperm.xlu0 %8941, %v715_v50   ;;  %s9994_s30 = smov 68  }
  0xea   : > { %827 = vperm.xlu1 %8942, %v713_v49  }
  0xee   : > { %832 = vperm.xlu1 %8942, %v714_v51   ;;  %v700_v51 = vld [vmem:[%s12714_s3] sm:$0xff] }
 0x12c   : > { %v8863_v52 = vpop.permute.xlu0 %8862 }
 0x12d   : > { %v8865_v53 = vunpack.i.h.bf16 %v8863_v52  ;;  %v8864_v54 = vunpack.i.l.bf16 %v8863_v52 }
 0x12f   : > { %v8182_v55 = vpack.c.bf16 %v8865_v53, %v8864_v54  ;;  %v704_v53 = vld [vmem:[%s12714_s3 + $0x20] sm:$0xff]  ;;  %v703_v54 = vld [vmem:[%s12714_s3 + $0x18] sm:$0xff] }
 0x130   : > { %v8873_v56 = vpop.permute.xlu0 %8872 }
 0x131   : > { %8183 = vmatprep.subr.bf16.mxu0 %v8182_v55  ;;  %v8875_v57 = vunpack.i.h.bf16 %v8873_v56  ;;  %v8874_v58 = vunpack.i.l.bf16 %v8873_v56  ;;  %v705_v55 = vld [vmem:[%s12714_s3 + $0x28] sm:$0xff]  ;;  %v707_v56 = vld [vmem:[%s12714_s3 + $0x38] sm:$0xff] }
 0x132   : > { %8185 = vmatpush3.bf16.msra.mxu0 %v8184_v36 }
 0x133   : > { %v8190_v2 = vpack.c.bf16 %v8875_v57, %v8874_v58  ;;  %v708_v57 = vld [vmem:[%s12714_s3 + $0x40] sm:$0xff]  ;;  %v706_v58 = vld [vmem:[%s12714_s3 + $0x30] sm:$0xff] }
 0x13c   : > { %v8868_v59 = vpop.permute.xlu1 %8867  ;;  %v8883_v60 = vpop.permute.xlu0 %8882 }
 0x13d   : > { %v8870_v61 = vunpack.i.h.bf16 %v8868_v59  ;;  %v8869_v62 = vunpack.i.l.bf16 %v8868_v59  ;;  %v8885_v3 = vunpack.i.h.bf16 %v8883_v60  ;;  %v8884_v4 = vunpack.i.l.bf16 %v8883_v60  ;;  %v711_v59 = vld [vmem:[%s12714_s3 + $0x58] sm:$0xff]  ;;  %v710_v60 = vld [vmem:[%s12714_s3 + $0x50] sm:$0xff] }
 0x13f   : > { %v8186_v63 = vpack.c.bf16 %v8870_v61, %v8869_v62  ;;  %v8194_v14 = vpack.c.bf16 %v8885_v3, %v8884_v4  ;;  %v709_v61 = vld [vmem:[%s12714_s3 + $0x48] sm:$0xff]  ;;  %v1045_v62 = vlaneseq  ;;  %v9989_v3 = vmov 1.0  }
 0x140   : > { %v8878_v0 = vpop.permute.xlu1 %8877  ;;  %v8893_v1 = vpop.permute.xlu0 %8892 }
 0x141   : > { %v8880_v5 = vunpack.i.h.bf16 %v8878_v0  ;;  %v8879_v6 = vunpack.i.l.bf16 %v8878_v0  ;;  %8187 = vmatprep.subr.bf16.mxu0 %v8186_v63  ;;  %v8895_v8 = vunpack.i.h.bf16 %v8893_v1  ;;  %v8894_v9 = vunpack.i.l.bf16 %v8893_v1 }
 0x142   : > { %8189 = vmatpush3.bf16.msra.mxu0 %v8188_v44  ;;  %v10245_v63 = vshrl.u32 %v1045_v62, 7  ;;  %v10247_v0 = vand.u32 127, %v1045_v62 }
 0x143   : > { %8191 = vmatprep.subr.bf16.mxu0 %v8190_v2  ;;  %v8192_v7 = vpack.c.bf16 %v8880_v5, %v8879_v6  ;;  %v8198_v18 = vpack.c.bf16 %v8895_v8, %v8894_v9 }
 0x144   : > { %v8888_v10 = vpop.permute.xlu1 %8887  ;;  %v8903_v11 = vpop.permute.xlu0 %8902  ;;  %v1049_v1 = vmul.u32 2, %v10245_v63 }
 0x145   : > { %v8890_v12 = vunpack.i.h.bf16 %v8888_v10  ;;  %v8889_v13 = vunpack.i.l.bf16 %v8888_v10  ;;  %v8905_v19 = vunpack.i.h.bf16 %v8903_v11  ;;  %v8904_v20 = vunpack.i.l.bf16 %v8903_v11 }
 0x146   : > { %8193 = vmatpush3.bf16.msra.mxu0 %v8192_v7  ;;  %vm10251_vm10 = vcmp.eq.s32.totalorder %v10247_v0, %v1049_v1 }
 0x147   : > { %8195 = vmatprep.subr.bf16.mxu0 %v8194_v14  ;;  %v8196_v15 = vpack.c.bf16 %v8890_v12, %v8889_v13  ;;  %v8202_v30 = vpack.c.bf16 %v8905_v19, %v8904_v20 }
 0x148   : > { %v8898_v16 = vpop.permute.xlu1 %8897  ;;  %v8913_v17 = vpop.permute.xlu0 %8912 }
 0x149   : > { %v8900_v21 = vunpack.i.h.bf16 %v8898_v16  ;;  %v8899_v22 = vunpack.i.l.bf16 %v8898_v16  ;;  %v8915_v24 = vunpack.i.h.bf16 %v8913_v17  ;;  %v8914_v25 = vunpack.i.l.bf16 %v8913_v17 }
 0x14a   : > { %8197 = vmatpush3.bf16.msra.mxu0 %v8196_v15 }
 0x14b   : > { %8199 = vmatprep.subr.bf16.mxu0 %v8198_v18  ;;  %v8200_v23 = vpack.c.bf16 %v8900_v21, %v8899_v22  ;;  %v8206_v36 = vpack.c.bf16 %v8915_v24, %v8914_v25 }
 0x14c   : > { %v8908_v26 = vpop.permute.xlu1 %8907  ;;  %v8923_v27 = vpop.permute.xlu0 %8922 }
 0x14d   : > { %v8910_v28 = vunpack.i.h.bf16 %v8908_v26  ;;  %v8909_v29 = vunpack.i.l.bf16 %v8908_v26  ;;  %v8925_v32 = vunpack.i.h.bf16 %v8923_v27  ;;  %v8924_v33 = vunpack.i.l.bf16 %v8923_v27 }
 0x14e   : > { %8201 = vmatpush3.bf16.msra.mxu0 %v8200_v23 }
 0x14f   : > { %8203 = vmatprep.subr.bf16.mxu0 %v8202_v30  ;;  %v8204_v31 = vpack.c.bf16 %v8910_v28, %v8909_v29  ;;  %v8210_v46 = vpack.c.bf16 %v8925_v32, %v8924_v33 }
 0x150   : > { %v8918_v34 = vpop.permute.xlu1 %8917  ;;  %v8933_v35 = vpop.permute.xlu0 %8932 }
 0x151   : > { %v8920_v37 = vunpack.i.h.bf16 %v8918_v34  ;;  %v8919_v38 = vunpack.i.l.bf16 %v8918_v34  ;;  %v8935_v39 = vunpack.i.h.bf16 %v8933_v35  ;;  %v8934_v40 = vunpack.i.l.bf16 %v8933_v35 }
 0x152   : > { %8205 = vmatpush3.bf16.msra.mxu0 %v8204_v31 }
 0x153   : > { %8207 = vmatprep.subr.bf16.mxu0 %v8206_v36  ;;  %v8214_v41 = vpack.c.bf16 %v8935_v39, %v8934_v40  ;;  %v8208_v42 = vpack.c.bf16 %v8920_v37, %v8919_v38 }
 0x154   : > { %v8928_v43 = vpop.permute.xlu1 %8927 }
 0x155   : > { %v8930_v44 = vunpack.i.h.bf16 %v8928_v43  ;;  %v8929_v45 = vunpack.i.l.bf16 %v8928_v43  ;;  %8215 = vmatprep.subr.bf16.mxu1 %v8214_v41 }
 0x156   : > { %8209 = vmatpush3.bf16.msra.mxu0 %v8208_v42  ;;  %8217 = vmatpush3.bf16.msra.mxu1 %v8214_v41 }
 0x157   : > { %8211 = vmatprep.subr.bf16.mxu0 %v8210_v46  ;;  %v8212_v47 = vpack.c.bf16 %v8930_v44, %v8929_v45 }
 0x158   : > { %v8938_v48 = vpop.permute.xlu1 %8937 }
 0x159   : > { %v8940_v49 = vunpack.i.h.bf16 %v8938_v48  ;;  %v8939_v50 = vunpack.i.l.bf16 %v8938_v48 }
 0x15a   : > { %8213 = vmatpush3.bf16.msra.mxu0 %v8212_v47 }
 0x15b   : > { %v8218_v52 = vpack.c.bf16 %v8940_v49, %v8939_v50  ;;  %7985 = vmatprep.subr.msk.mxu0 %vm10251_vm10, %v9989_v3 }
 0x15d   : > { %918 = vmatmul.mubr.f32.vlgmr.msra.gmra.mrb[0].mxu0 %v700_v51  ;;  %8219 = vmatprep.subr.bf16.mxu1 %v8218_v52 }
 0x15e   : > { %8221 = vmatpush3.bf16.msra.mxu1 %v8218_v52  ;;  %922 = vmatprep.mubr.f32.mxu0 %v704_v53 }
 0x15f   : > { %7953 = vmatprep.subr.msk.mxu1 %vm10251_vm10, %v9989_v3  ;;  %7986 = vmatpush3.msk.msra.mxu0 %vm10251_vm10, %v9989_v3 }
 0x160   : > { %8001 = vmatprep.subr.msk.mxu0 %vm10251_vm10, %v9989_v3 }
 0x161   : > { %923 = vmatmul.mubr.f32.gmra.mrb[2].mxu0 %v703_v54  ;;  %7948 = vmatmul.mubr.msk.f32.vlgmr.msra.gmra.mrb[0].mxu1 %vm840_vm9, %v705_v55  ;;  %v823_v7 = vpop.permute.xlu0 %822 }
 0x162   : > { %927 = vmatprep.mubr.f32.mxu0 %v707_v56  ;;  %7950 = vmatprep.mubr.msk.f32.mxu1 %vm840_vm9, %v708_v57 }
 0x163   : > { %7954 = vmatpush3.msk.msra.mxu1 %vm10251_vm10, %v9989_v3 }
 0x164   : > { %7961 = vmatprep.subr.msk.mxu1 %vm10251_vm10, %v9989_v3 }
 0x165   : > { %928 = vmatmul.mubr.f32.gmra.mrb[4].mxu0 %v706_v58  ;;  %7951 = vmatmul.mubr.msk.f32.gmra.mrb[2].mxu1 %vm840_vm9, %v711_v59  ;;  %v838_v31 = vpop.permute.xlu0 %837 }
 0x166   : > { %932 = vmatprep.mubr.f32.mxu0 %v710_v60 }
 0x169   : > { %933 = vmatmul.mubr.f32.gmra.mrb[6].mxu0 %v709_v61  ;;  %v828_v8 = vpop.permute.xlu1 %827 }
 0x16d   : > { %v833_v16 = vpop.permute.xlu1 %832 }
 0x230   : > { %v7751_v4 = vpop.f32.mrb[0].mxu0 }
 0x231   : > { %v7752_v5 = vpop.f32.mrb[1].mxu0 }
 0x232   : > { %v7753_v6 = vadd.f32 %v7752_v5, %v7751_v4 }
 0x234   : > { %v7754_v9 = vpop.f32.mrb[2].mxu0  ;;  %v7949_v10 = vpop.f32.mrb[0].mxu1  ;;  %v920_v11 = vadd.f32 %v7753_v6, %v823_v7 }
 0x235   : > { %v7755_v12 = vpop.f32.mrb[3].mxu0  ;;  %v1004_v13 = vpop.f32.mrb[1].mxu1 }
 0x236   : > { %v7756_v14 = vadd.f32 %v7755_v12, %v7754_v9  ;;  %v1005_v15 = vadd.f32 %v1004_v13, %v920_v11 }
 0x238   : > { %v1023_v17 = vmax.f32 %v1005_v15, 0.0  ;;  %v925_v18 = vadd.f32 %v7756_v14, %v828_v8  ;;  %v7757_v19 = vpop.f32.mrb[4].mxu0  ;;  %v7952_v20 = vpop.f32.mrb[2].mxu1 }
 0x239   : > { %v7758_v21 = vpop.f32.mrb[5].mxu0  ;;  %v1014_v22 = vpop.f32.mrb[3].mxu1 }
 0x23a   : > { %1028 = vst.msk [vmem:[#allocation5] sm:$0xff] %vm1027_vm11, %v1023_v17  ;;  %v1010_v23 = vadd.f32 %v7949_v10, %v925_v18  ;;  %v7759_v24 = vadd.f32 %v7758_v21, %v7757_v19 }
 0x23c   : > { %v1024_v25 = vmax.f32 %v1010_v23, 0.0  ;;  %v7760_v26 = vpop.f32.mrb[6].mxu0  ;;  %v930_v27 = vadd.f32 %v7759_v24, %v833_v16 }
 0x23d   : > { %v7761_v28 = vpop.f32.mrb[7].mxu0 }
 0x23e   : > { %1029 = vst.msk [vmem:[#allocation5 + $0x18] sm:$0xff] %vm1027_vm11, %v1024_v25  ;;  %v7762_v29 = vadd.f32 %v7761_v28, %v7760_v26  ;;  %v1015_v30 = vadd.f32 %v1014_v22, %v930_v27 }
 0x240   : > { %v935_v32 = vadd.f32 %v7762_v29, %v838_v31  ;;  %v1025_v33 = vmax.f32 %v1015_v30, 0.0 }
 0x241   : > { %v1701_v34 = vld [vmem:[#allocation5] sm:$0xff] }
 0x242   : > { %v1020_v35 = vadd.f32 %v7952_v20, %v935_v32  ;;  %1030 = vst.msk [vmem:[#allocation5 + $0x30] sm:$0xff] %vm1027_vm11, %v1025_v33  ;;  %1709 = vrot.lane.b32.xlu0 %v1701_v34, %s9990_s27  ;;  %1184 = vrot.lane.b32.xlu1 %v1701_v34, %s9987_s17 }
 0x243   : > { %7955 = vmatprep.mubr.msk.f32.mxu1 %vm1057_vm12, %v1701_v34 }
 0x244   : > { %v1026_v36 = vmax.f32 %v1020_v35, 0.0 }
 0x245   : > { %v1177_v37 = vld [vmem:[#allocation5 + $0x18] sm:$0xff] }
 0x246   : > { %1031 = vst.msk [vmem:[#allocation5 + $0x48] sm:$0xff] %vm1027_vm11, %v1026_v36  ;;  %1186 = vrot.lane.b32.xlu0 %v1177_v37, %s9987_s17  ;;  %1314 = vrot.lane.b32.xlu1 %v1701_v34, %s9982_s22  ;;  %vm2237_vm11 = vcmask 900096  }
 0x247   : > { %7956 = vmatmul.mubr.msk.f32.vlgmr.msra.gmra.mrb[4].mxu1 %vm1057_vm12, %v1177_v37 }
 0x248   : > { %7962 = vmatpush3.msk.msra.mxu1 %vm10251_vm10, %v9989_v3 }
 0x249   : > { %v1055_v38 = vld [vmem:[#allocation5 + $0x30] sm:$0xff]  ;;  %7969 = vmatprep.subr.msk.mxu1 %vm10251_vm10, %v9989_v3 }
 0x24a   : > { %1316 = vrot.lane.b32.xlu0 %v1177_v37, %s9982_s22  ;;  %1444 = vrot.lane.b32.xlu1 %v1701_v34, %s9991_s16 }
 0x24b   : > { %7958 = vmatprep.mubr.msk.f32.mxu1 %vm1057_vm12, %v1055_v38 }
 0x24d   : > { %v1056_v39 = vld [vmem:[#allocation5 + $0x48] sm:$0xff] }
 0x24e   : > { %1446 = vrot.lane.b32.xlu0 %v1177_v37, %s9991_s16  ;;  %1579 = vrot.lane.b32.xlu1 %v1701_v34, %s9992_s23 }
 0x24f   : > { %7959 = vmatmul.mubr.msk.f32.gmra.mrb[6].mxu1 %vm1057_vm12, %v1056_v39 }
 0x252   : > { %1711 = vrot.lane.b32.xlu0 %v1177_v37, %s9990_s27  ;;  %1188 = vrot.lane.b32.xlu1 %v1055_v38, %s9987_s17 }
 0x256   : > { %1190 = vrot.lane.b32.xlu0 %v1056_v39, %s9987_s17  ;;  %1581 = vrot.lane.b32.xlu1 %v1177_v37, %s9992_s23  ;;  %s12737_s17 = smov 35  }
 0x25a   : > { %1713 = vrot.lane.b32.xlu0 %v1055_v38, %s9990_s27  ;;  %1318 = vrot.lane.b32.xlu1 %v1055_v38, %s9982_s22 }
 0x25e   : > { %1320 = vrot.lane.b32.xlu0 %v1056_v39, %s9982_s22  ;;  %1448 = vrot.lane.b32.xlu1 %v1055_v38, %s9991_s16 }
 0x262   : > { %1969 = vrot.lane.b32.xlu0 %v1701_v34, %s12739_s25  ;;  %1583 = vrot.lane.b32.xlu1 %v1055_v38, %s9992_s23 }
 0x266   : > { %1450 = vrot.lane.b32.xlu0 %v1056_v39, %s9991_s16  ;;  %1839 = vrot.lane.b32.xlu1 %v1701_v34, %s9994_s30  ;;  %s12766_s16 = smov 126  }
 0x26a   : > { %1971 = vrot.lane.b32.xlu0 %v1177_v37, %s12739_s25  ;;  %1841 = vrot.lane.b32.xlu1 %v1177_v37, %s9994_s30 }
 0x26e   : > { %1715 = vrot.lane.b32.xlu0 %v1056_v39, %s9990_s27  ;;  %1585 = vrot.lane.b32.xlu1 %v1056_v39, %s9992_s23  ;;  %s12765_s27 = smov 15   ;;  %s9999_s23 = smov 110  }
 0x272   : > { %1973 = vrot.lane.b32.xlu0 %v1055_v38, %s12739_s25  ;;  %1843 = vrot.lane.b32.xlu1 %v1055_v38, %s9994_s30 }
 0x276   : > { %1975 = vrot.lane.b32.xlu0 %v1056_v39, %s12739_s25  ;;  %1845 = vrot.lane.b32.xlu1 %v1056_v39, %s9994_s30  ;;  %s10000_s30 = smov 109   ;;  %s10008_s25 = smov 20  }
 0x2b4   : > { %v1710_v40 = vpop.permute.xlu0 %1709  ;;  %v1185_v41 = vpop.permute.xlu1 %1184 }
 0x2b5   : > { %7963 = vmatprep.mubr.msk.f32.mxu1 %vm1057_vm12, %v1185_v41 }
 0x2b8   : > { %v1187_v42 = vpop.permute.xlu0 %1186  ;;  %v1315_v43 = vpop.permute.xlu1 %1314 }
 0x2b9   : > { %7964 = vmatmul.mubr.msk.f32.vlgmr.msra.gmra.mrb[8].mxu1 %vm1057_vm12, %v1187_v42 }
 0x2ba   : > { %7970 = vmatpush3.msk.msra.mxu1 %vm10251_vm10, %v9989_v3 }
 0x2bb   : > { %7977 = vmatprep.subr.msk.mxu1 %vm10251_vm10, %v9989_v3 }
 0x2bc   : > { %v1317_v44 = vpop.permute.xlu0 %1316  ;;  %v1445_v45 = vpop.permute.xlu1 %1444 }
 0x2c0   : > { %v1447_v46 = vpop.permute.xlu0 %1446  ;;  %v1580_v47 = vpop.permute.xlu1 %1579 }
 0x2c1   : > { %7987 = vmatprep.mubr.msk.f32.mxu0 %vm1057_vm12, %v1580_v47 }
 0x2c4   : > { %v1712_v48 = vpop.permute.xlu0 %1711  ;;  %v1189_v49 = vpop.permute.xlu1 %1188 }
 0x2c5   : > { %7966 = vmatprep.mubr.msk.f32.mxu1 %vm1057_vm12, %v1189_v49 }
 0x2c8   : > { %v1191_v50 = vpop.permute.xlu0 %1190  ;;  %v1582_v51 = vpop.permute.xlu1 %1581 }
 0x2c9   : > { %7967 = vmatmul.mubr.msk.f32.gmra.mrb[10].mxu1 %vm1057_vm12, %v1191_v50  ;;  %7988 = vmatmul.mubr.msk.f32.vlgmr.msra.gmra.mrb[8].mxu0 %vm1057_vm12, %v1582_v51 }
 0x2ca   : > { %7971 = vmatprep.mubr.msk.f32.mxu1 %vm1057_vm12, %v1315_v43  ;;  %8002 = vmatpush3.msk.msra.mxu0 %vm10251_vm10, %v9989_v3  ;;  %v10374_v43 = vld [vmem:[#allocation3 + $0x8] sm:$0xff] }
 0x2cb   : > { %1038 = vst.msk [vmem:[#allocation3 + $0x28] sm:$0xff] %vm1034_vm14, %v10374_v43  ;;  %1035 = vst.msk [vmem:[#allocation3 + $0x10] sm:$0xff] %vm1034_vm14, %v10374_v43 }
 0x2cc   : > { %v1714_v52 = vpop.permute.xlu0 %1713  ;;  %v1319_v53 = vpop.permute.xlu1 %1318  ;;  %1041 = vst.msk [vmem:[#allocation3 + $0x40] sm:$0xff] %vm1034_vm14, %v10374_v43  ;;  %1044 = vst.msk [vmem:[#allocation3 + $0x58] sm:$0xff] %vm1034_vm14, %v10374_v43 }
 0x2cd   : > { %7972 = vmatmul.mubr.msk.f32.vlgmr.msra.gmra.mrb[12].mxu1 %vm1057_vm12, %v1317_v44 }
 0x2ce   : > { %7974 = vmatprep.mubr.msk.f32.mxu1 %vm1057_vm12, %v1319_v53  ;;  %7978 = vmatpush3.msk.msra.mxu1 %vm10251_vm10, %v9989_v3 }
 0x2cf   : > { %7993 = vmatprep.subr.msk.mxu1 %vm10251_vm10, %v9989_v3 }
 0x2d0   : > { %v1321_v54 = vpop.permute.xlu0 %1320  ;;  %v1449_v55 = vpop.permute.xlu1 %1448 }
 0x2d1   : > { %7975 = vmatmul.mubr.msk.f32.gmra.mrb[14].mxu1 %vm1057_vm12, %v1321_v54 }
 0x2d2   : > { %7979 = vmatprep.mubr.msk.f32.mxu1 %vm1057_vm12, %v1445_v45 }
 0x2d4   : > { %v1970_v56 = vpop.permute.xlu0 %1969  ;;  %v1584_v57 = vpop.permute.xlu1 %1583 }
 0x2d5   : > { %7980 = vmatmul.mubr.msk.f32.vlgmr.msra.gmra.mrb[16].mxu1 %vm1057_vm12, %v1447_v46  ;;  %7990 = vmatprep.mubr.msk.f32.mxu0 %vm1057_vm12, %v1584_v57 }
 0x2d6   : > { %7982 = vmatprep.mubr.msk.f32.mxu1 %vm1057_vm12, %v1449_v55  ;;  %7994 = vmatpush3.msk.msra.mxu1 %vm10251_vm10, %v9989_v3 }
 0x2d7   : > { %8009 = vmatprep.subr.msk.mxu1 %vm10251_vm10, %v9989_v3 }
 0x2d8   : > { %v1451_v58 = vpop.permute.xlu0 %1450  ;;  %v1840_v59 = vpop.permute.xlu1 %1839 }
 0x2d9   : > { %7983 = vmatmul.mubr.msk.f32.gmra.mrb[18].mxu1 %vm1057_vm12, %v1451_v58 }
 0x2da   : > { %7995 = vmatprep.mubr.msk.f32.mxu1 %vm1057_vm12, %v1710_v40 }
 0x2dc   : > { %v1972_v60 = vpop.permute.xlu0 %1971  ;;  %v1842_v61 = vpop.permute.xlu1 %1841 }
 0x2dd   : > { %7996 = vmatmul.mubr.msk.f32.vlgmr.msra.gmra.mrb[20].mxu1 %vm1057_vm12, %v1712_v48 }
 0x2de   : > { %7998 = vmatprep.mubr.msk.f32.mxu1 %vm1057_vm12, %v1714_v52  ;;  %8010 = vmatpush3.msk.msra.mxu1 %vm10251_vm10, %v9989_v3 }
 0x2e0   : > { %v1716_v62 = vpop.permute.xlu0 %1715  ;;  %v1586_v1 = vpop.permute.xlu1 %1585 }
 0x2e1   : > { %7991 = vmatmul.mubr.msk.f32.gmra.mrb[10].mxu0 %vm1057_vm12, %v1586_v1  ;;  %7999 = vmatmul.mubr.msk.f32.gmra.mrb[22].mxu1 %vm1057_vm12, %v1716_v62 }
 0x2e2   : > { %8003 = vmatprep.mubr.msk.f32.mxu0 %vm1057_vm12, %v1840_v59  ;;  %8011 = vmatprep.mubr.msk.f32.mxu1 %vm1057_vm12, %v1970_v56 }
 0x2e4   : > { %v1974_v4 = vpop.permute.xlu0 %1973  ;;  %v1844_v5 = vpop.permute.xlu1 %1843 }
 0x2e5   : > { %8004 = vmatmul.mubr.msk.f32.vlgmr.msra.gmra.mrb[12].mxu0 %vm1057_vm12, %v1842_v61  ;;  %8012 = vmatmul.mubr.msk.f32.vlgmr.msra.gmra.mrb[24].mxu1 %vm1057_vm12, %v1972_v60 }
 0x2e6   : > { %8006 = vmatprep.mubr.msk.f32.mxu0 %vm1057_vm12, %v1844_v5  ;;  %8014 = vmatprep.mubr.msk.f32.mxu1 %vm1057_vm12, %v1974_v4 }
 0x2e8   : > { %v1976_v3 = vpop.permute.xlu0 %1975  ;;  %v1846_v6 = vpop.permute.xlu1 %1845 }
 0x2e9   : > { %8007 = vmatmul.mubr.msk.f32.gmra.mrb[14].mxu0 %vm1057_vm12, %v1846_v6  ;;  %8015 = vmatmul.mubr.msk.f32.gmra.mrb[26].mxu1 %vm1057_vm12, %v1976_v3  ;;  %vm2282_vm12 = vcmask 891904  }
 0x31a   : > { %v7957_v7 = vpop.f32.mrb[4].mxu1 }
 0x31b   : > { %1161 = vrot.lane.b32.xlu0 %v7957_v7, %s9976_s29  ;;  %v1136_v8 = vpop.f32.mrb[5].mxu1 }
 0x31c   : > { %1159 = vrot.lane.b32.xlu1 %v1136_v8, %s9976_s29 }
 0x322   : > { %v7960_v9 = vpop.f32.mrb[6].mxu1 }
 0x323   : > { %1165 = vrot.lane.b32.xlu0 %v7960_v9, %s9976_s29  ;;  %v1146_v10 = vpop.f32.mrb[7].mxu1 }
 0x324   : > { %1163 = vrot.lane.b32.xlu1 %v1146_v10, %s9976_s29 }
 0x38c   : > { %v7965_v11 = vpop.f32.mrb[8].mxu1 }
 0x38d   : > { %v1162_v12 = vpop.permute.xlu0 %1161  ;;  %v1266_v13 = vpop.f32.mrb[9].mxu1 }
 0x38e   : > { %1173 = vst.msk [vmem:[#allocation3 + $0x18] sm:$0xff] %vm1171_vm13, %v1162_v12  ;;  %v1160_v14 = vpop.permute.xlu1 %1159 }
 0x38f   : > { %1172 = vst.msk [vmem:[#allocation3] sm:$0xff] %vm1171_vm13, %v1160_v14 }
 0x395   : > { %v1166_v15 = vpop.permute.xlu0 %1165 }
 0x396   : > { %1175 = vst.msk [vmem:[#allocation3 + $0x48] sm:$0xff] %vm1171_vm13, %v1166_v15  ;;  %v1164_v16 = vpop.permute.xlu1 %1163 }
 0x397   : > { %1174 = vst.msk [vmem:[#allocation3 + $0x30] sm:$0xff] %vm1171_vm13, %v1164_v16  ;;  %vm2327_vm13 = vcmask 883712  }
 0x39c   : > { %v7968_v17 = vpop.f32.mrb[10].mxu1  ;;  %v7989_v18 = vpop.f32.mrb[8].mxu0 }
 0x39d   : > { %v1661_v19 = vpop.f32.mrb[9].mxu0  ;;  %1686 = vrot.lane.b32.xlu0 %v7989_v18, %s12737_s17  ;;  %v1276_v20 = vpop.f32.mrb[11].mxu1 }
 0x39e   : > { %1684 = vrot.lane.b32.xlu1 %v1661_v19, %s12737_s17 }
 0x3a0   : > { %v7973_v21 = vpop.f32.mrb[12].mxu1 }
 0x3a1   : > { %1291 = vrot.lane.b32.xlu0 %v7965_v11, %s9996_s26  ;;  %v1396_v22 = vpop.f32.mrb[13].mxu1 }
 0x3a2   : > { %1289 = vrot.lane.b32.xlu1 %v1266_v13, %s9996_s26 }
 0x3a4   : > { %v7976_v23 = vpop.f32.mrb[14].mxu1 }
 0x3a5   : > { %v1406_v24 = vpop.f32.mrb[15].mxu1 }
 0x3a8   : > { %v7981_v25 = vpop.f32.mrb[16].mxu1 }
 0x3a9   : > { %v1526_v26 = vpop.f32.mrb[17].mxu1 }
 0x3ac   : > { %v7984_v27 = vpop.f32.mrb[18].mxu1 }
 0x3ad   : > { %v1536_v28 = vpop.f32.mrb[19].mxu1 }
 0x3b0   : > { %v7997_v29 = vpop.f32.mrb[20].mxu1 }
 0x3b1   : > { %v1791_v30 = vpop.f32.mrb[21].mxu1 }
 0x3b4   : > { %v7992_v31 = vpop.f32.mrb[10].mxu0  ;;  %v8000_v32 = vpop.f32.mrb[22].mxu1 }
 0x3b5   : > { %v1671_v33 = vpop.f32.mrb[11].mxu0  ;;  %1690 = vrot.lane.b32.xlu0 %v7992_v31, %s12737_s17  ;;  %v1801_v34 = vpop.f32.mrb[23].mxu1 }
 0x3b6   : > { %1688 = vrot.lane.b32.xlu1 %v1671_v33, %s12737_s17  ;;  %s10002_s17 = smov 90  }
 0x3b8   : > { %v8005_v35 = vpop.f32.mrb[12].mxu0  ;;  %v8013_v36 = vpop.f32.mrb[24].mxu1 }
 0x3b9   : > { %v1921_v37 = vpop.f32.mrb[13].mxu0  ;;  %1295 = vrot.lane.b32.xlu0 %v7968_v17, %s9996_s26  ;;  %v2051_v38 = vpop.f32.mrb[25].mxu1 }
 0x3ba   : > { %1293 = vrot.lane.b32.xlu1 %v1276_v20, %s9996_s26  ;;  %s12741_s26 = smov 92  }
 0x3bc   : > { %v8008_v39 = vpop.f32.mrb[14].mxu0  ;;  %v8016_v40 = vpop.f32.mrb[26].mxu1 }
 0x3bd   : > { %v1931_v41 = vpop.f32.mrb[15].mxu0  ;;  %1421 = vrot.lane.b32.xlu0 %v7973_v21, %s9997_s28  ;;  %v2061_v42 = vpop.f32.mrb[27].mxu1 }
 0x3be   : > { %1419 = vrot.lane.b32.xlu1 %v1396_v22, %s9997_s28 }
 0x3c1   : > { %1946 = vrot.lane.b32.xlu0 %v8005_v35, %s12763_s20  ;;  %v2092_v35 = vld [vmem:[%s12716_s5 + $0x8] sm:$0xff] }
 0x3c2   : > { %1944 = vrot.lane.b32.xlu1 %v1921_v37, %s12763_s20  ;;  %2717 = vmatprep.mubr.f32.mxu1 %v2092_v35  ;;  %v2098_v37 = vld [vmem:[%s12717_s6 + $0x8] sm:$0xff] }
 0x3c3   : > { %2563 = vmatprep.mubr.f32.mxu0 %v2092_v35 }
 0x3c5   : > { %1425 = vrot.lane.b32.xlu0 %v7976_v23, %s9997_s28 }
 0x3c6   : > { %1423 = vrot.lane.b32.xlu1 %v1406_v24, %s9997_s28 }
 0x3c9   : > { %1950 = vrot.lane.b32.xlu0 %v8008_v39, %s12763_s20 }
 0x3ca   : > { %1948 = vrot.lane.b32.xlu1 %v1931_v41, %s12763_s20  ;;  %s10012_s20 = smov 76  }
 0x3cd   : > { %1551 = vrot.lane.b32.xlu0 %v7981_v25, %s12764_s24 }
 0x3ce   : > { %1549 = vrot.lane.b32.xlu1 %v1526_v26, %s12764_s24 }
 0x3d1   : > { %1555 = vrot.lane.b32.xlu0 %v7984_v27, %s12764_s24 }
 0x3d2   : > { %1553 = vrot.lane.b32.xlu1 %v1536_v28, %s12764_s24 }
 0x3d5   : > { %1816 = vrot.lane.b32.xlu0 %v7997_v29, %s9998_s21 }
 0x3d6   : > { %1814 = vrot.lane.b32.xlu1 %v1791_v30, %s9998_s21 }
 0x3d9   : > { %1820 = vrot.lane.b32.xlu0 %v8000_v32, %s9998_s21 }
 0x3da   : > { %1818 = vrot.lane.b32.xlu1 %v1801_v34, %s9998_s21  ;;  %s10005_s21 = smov 74  }
 0x3dd   : > { %2076 = vrot.lane.b32.xlu0 %v8013_v36, %s12765_s27  ;;  %v2097_v36 = vld [vmem:[%s12717_s6] sm:$0xff] }
 0x3de   : > { %2074 = vrot.lane.b32.xlu1 %v2051_v38, %s12765_s27 }
 0x3e1   : > { %2080 = vrot.lane.b32.xlu0 %v8016_v40, %s12765_s27 }
 0x3e2   : > { %2078 = vrot.lane.b32.xlu1 %v2061_v42, %s12765_s27 }
 0x40f   : > { %v1687_v44 = vpop.permute.xlu0 %1686 }
 0x410   : > { %v1685_v45 = vpop.permute.xlu1 %1684 }
 0x413   : > { %v1292_v46 = vpop.permute.xlu0 %1291 }
 0x414   : > { %1303 = vst.msk [vmem:[#allocation3 + $0x18] sm:$0xff] %vm1301_vm15, %v1292_v46  ;;  %v1290_v47 = vpop.permute.xlu1 %1289 }
 0x415   : > { %1302 = vst.msk [vmem:[#allocation3] sm:$0xff] %vm1301_vm15, %v1290_v47 }
 0x427   : > { %v1691_v48 = vpop.permute.xlu0 %1690 }
 0x428   : > { %v1689_v49 = vpop.permute.xlu1 %1688 }
 0x42b   : > { %v1296_v50 = vpop.permute.xlu0 %1295 }
 0x42c   : > { %1305 = vst.msk [vmem:[#allocation3 + $0x48] sm:$0xff] %vm1301_vm15, %v1296_v50  ;;  %v1294_v51 = vpop.permute.xlu1 %1293 }
 0x42d   : > { %1304 = vst.msk [vmem:[#allocation3 + $0x30] sm:$0xff] %vm1301_vm15, %v1294_v51  ;;  %vm2417_vm15 = vcmask 744448  }
 0x42f   : > { %v1422_v52 = vpop.permute.xlu0 %1421 }
 0x430   : > { %1433 = vst.msk [vmem:[#allocation3 + $0x18] sm:$0xff] %vm1431_vm0, %v1422_v52  ;;  %v1420_v53 = vpop.permute.xlu1 %1419 }
 0x431   : > { %1432 = vst.msk [vmem:[#allocation3] sm:$0xff] %vm1431_vm0, %v1420_v53 }
 0x433   : > { %v1947_v54 = vpop.permute.xlu0 %1946 }
 0x434   : > { %v1945_v55 = vpop.permute.xlu1 %1944 }
 0x437   : > { %v1426_v56 = vpop.permute.xlu0 %1425 }
 0x438   : > { %1435 = vst.msk [vmem:[#allocation3 + $0x48] sm:$0xff] %vm1431_vm0, %v1426_v56  ;;  %v1424_v57 = vpop.permute.xlu1 %1423 }
 0x439   : > { %1434 = vst.msk [vmem:[#allocation3 + $0x30] sm:$0xff] %vm1431_vm0, %v1424_v57  ;;  %vm2462_vm0 = vcmask 736256  }
 0x43b   : > { %v1951_v58 = vpop.permute.xlu0 %1950 }
 0x43c   : > { %v1949_v59 = vpop.permute.xlu1 %1948 }
 0x43f   : > { %v1552_v60 = vpop.permute.xlu0 %1551 }
 0x440   : > { %1565 = vst.msk [vmem:[#allocation3 + $0x18] sm:$0xff] %vm1561_vm1, %v1552_v60  ;;  %v1550_v61 = vpop.permute.xlu1 %1549 }
 0x441   : > { %1566 = vst.msk [vmem:[#allocation3 + $0x20] sm:$0xff] %vm1563_vm2, %v1552_v60  ;;  %1564 = vst.msk [vmem:[#allocation3 + $0x8] sm:$0xff] %vm1563_vm2, %v1550_v61 }
 0x442   : > { %1562 = vst.msk [vmem:[#allocation3] sm:$0xff] %vm1561_vm1, %v1550_v61 }
 0x443   : > { %1698 = vst.msk [vmem:[#allocation3 + $0x20] sm:$0xff] %vm1696_vm3, %v1687_v44  ;;  %1697 = vst.msk [vmem:[#allocation3 + $0x8] sm:$0xff] %vm1696_vm3, %v1685_v45  ;;  %v1556_v62 = vpop.permute.xlu0 %1555 }
 0x444   : > { %1569 = vst.msk [vmem:[#allocation3 + $0x48] sm:$0xff] %vm1561_vm1, %v1556_v62  ;;  %v1554_v1 = vpop.permute.xlu1 %1553 }
 0x445   : > { %1570 = vst.msk [vmem:[#allocation3 + $0x50] sm:$0xff] %vm1563_vm2, %v1556_v62  ;;  %1568 = vst.msk [vmem:[#allocation3 + $0x38] sm:$0xff] %vm1563_vm2, %v1554_v1 }
 0x446   : > { %1567 = vst.msk [vmem:[#allocation3 + $0x30] sm:$0xff] %vm1561_vm1, %v1554_v1 }
 0x447   : > { %1700 = vst.msk [vmem:[#allocation3 + $0x50] sm:$0xff] %vm1696_vm3, %v1691_v48  ;;  %1699 = vst.msk [vmem:[#allocation3 + $0x38] sm:$0xff] %vm1696_vm3, %v1689_v49  ;;  %v1817_v4 = vpop.permute.xlu0 %1816  ;;  %v2102_v5 = vld [vmem:[#allocation3 + $0x18] sm:$0xff]  ;;  %vm2862_vm3 = vcmask 154624  }
 0x448   : > { %1828 = vst.msk [vmem:[#allocation3 + $0x20] sm:$0xff] %vm1826_vm4, %v1817_v4  ;;  %v1815_v3 = vpop.permute.xlu1 %1814  ;;  %2813 = vst [vmem:[#allocation3 + $0x18] sm:$0xff] %v10374_v43 }
 0x449   : > { %v2099_v6 = vld [vmem:[#allocation3] sm:$0xff]  ;;  %1958 = vst.msk [vmem:[#allocation3 + $0x20] sm:$0xff] %vm1956_vm5, %v1947_v54 }
 0x44a   : > { %1827 = vst.msk [vmem:[#allocation3 + $0x8] sm:$0xff] %vm1826_vm4, %v1815_v3  ;;  %v10405_v7 = vpack.i.bf16 %v2102_v5, %v2099_v6  ;;  %2810 = vst [vmem:[#allocation3] sm:$0xff] %v10374_v43  ;;  %v8224_v19 = vpack.c.bf16 %v2102_v5, %v2099_v6 }
 0x44b   : > { %1957 = vst.msk [vmem:[#allocation3 + $0x8] sm:$0xff] %vm1956_vm5, %v1945_v55  ;;  %v2108_v8 = vld [vmem:[#allocation3 + $0x48] sm:$0xff]  ;;  %v1821_v9 = vpop.permute.xlu0 %1820 }
 0x44c   : > { %8944 = vrot.lane.b32.xlu1 %v10405_v7, %s12764_s24  ;;  %2819 = vst [vmem:[#allocation3 + $0x48] sm:$0xff] %v10374_v43  ;;  %1830 = vst.msk [vmem:[#allocation3 + $0x50] sm:$0xff] %vm1826_vm4, %v1821_v9  ;;  %v1819_v11 = vpop.permute.xlu1 %1818 }
 0x44d   : > { %v2105_v10 = vld [vmem:[#allocation3 + $0x30] sm:$0xff]  ;;  %1960 = vst.msk [vmem:[#allocation3 + $0x50] sm:$0xff] %vm1956_vm5, %v1951_v58 }
 0x44e   : > { %2816 = vst [vmem:[#allocation3 + $0x30] sm:$0xff] %v10374_v43  ;;  %1829 = vst.msk [vmem:[#allocation3 + $0x38] sm:$0xff] %vm1826_vm4, %v1819_v11  ;;  %v10416_v12 = vpack.i.bf16 %v2108_v8, %v2105_v10  ;;  %v8228_v25 = vpack.c.bf16 %v2108_v8, %v2105_v10  ;;  %vm2876_vm4 = vcmask 416768  }
 0x44f   : > { %1959 = vst.msk [vmem:[#allocation3 + $0x38] sm:$0xff] %vm1956_vm5, %v1949_v59  ;;  %v2077_v13 = vpop.permute.xlu0 %2076  ;;  %vm2873_vm5 = vcmask 1047704  }
 0x450   : > { %8964 = vrot.lane.b32.xlu0 %v10416_v12, %s12764_s24  ;;  %8949 = vrot.lane.b32.xlu1 %v10405_v7, %s12766_s16  ;;  %2088 = vst.msk [vmem:[#allocation3 + $0x28] sm:$0xff] %vm2086_vm6, %v2077_v13  ;;  %v2075_v14 = vpop.permute.xlu1 %2074  ;;  %v2103_v15 = vld [vmem:[#allocation3 + $0x20] sm:$0xff] }
 0x451   : > { %2087 = vst.msk [vmem:[#allocation3 + $0x10] sm:$0xff] %vm2086_vm6, %v2075_v14 }
 0x452   : > { %v2100_v16 = vld [vmem:[#allocation3 + $0x8] sm:$0xff] }
 0x453   : > { %v8222_v17 = vpack.c.bf16 %v2103_v15, %v2100_v16  ;;  %v2081_v18 = vpop.permute.xlu0 %2080 }
 0x454   : > { %8969 = vrot.lane.b32.xlu0 %v10416_v12, %s12766_s16  ;;  %8954 = vrot.lane.b32.xlu1 %v10405_v7, %s9999_s23  ;;  %v2109_v20 = vld [vmem:[#allocation3 + $0x50] sm:$0xff]  ;;  %2090 = vst.msk [vmem:[#allocation3 + $0x58] sm:$0xff] %vm2086_vm6, %v2081_v18  ;;  %v2079_v21 = vpop.permute.xlu1 %2078 }
 0x455   : > { %8223 = vmatprep.subr.bf16.mxu0 %v8222_v17  ;;  %2820 = vst [vmem:[#allocation3 + $0x50] sm:$0xff] %v10374_v43  ;;  %2089 = vst.msk [vmem:[#allocation3 + $0x40] sm:$0xff] %vm2086_vm6, %v2079_v21  ;;  %vm3085_vm6 = vcmask 130048  }
 0x456   : > { %v2106_v22 = vld [vmem:[#allocation3 + $0x38] sm:$0xff]  ;;  %8225 = vmatpush1.bf16.msra.mxu0 %v8224_v19 }
 0x457   : > { %2817 = vst [vmem:[#allocation3 + $0x38] sm:$0xff] %v10374_v43  ;;  %v8226_v23 = vpack.c.bf16 %v2109_v20, %v2106_v22  ;;  %v10433_v24 = vld [vmem:[#allocation3 + $0x28] sm:$0xff] }
 0x458   : > { %8974 = vrot.lane.b32.xlu0 %v10416_v12, %s9999_s23  ;;  %8959 = vrot.lane.b32.xlu1 %v10405_v7, %s10000_s30  ;;  %2815 = vst.msk [vmem:[#allocation3 + $0x28] sm:$0xff] %vm1034_vm14, %v10374_v43  ;;  %v10441_v26 = vld [vmem:[#allocation3 + $0x10] sm:$0xff]  ;;  %v8983_v30 = vpack.i.bf16 %v10433_v24, %v2103_v15 }
 0x459   : > { %8227 = vmatprep.subr.bf16.mxu0 %v8226_v23  ;;  %2812 = vst.msk [vmem:[#allocation3 + $0x10] sm:$0xff] %vm1034_vm14, %v10374_v43  ;;  %v9003_v27 = vpack.i.bf16 %v10441_v26, %v2100_v16  ;;  %v8296_v33 = vpack.c.bf16 %v10433_v24, %v10441_v26 }
 0x45a   : > { %8229 = vmatpush1.bf16.msra.mxu0 %v8228_v25 }
 0x45b   : > { %v10446_v28 = vld [vmem:[#allocation3 + $0x58] sm:$0xff] }
 0x45c   : > { %8979 = vrot.lane.b32.xlu0 %v10416_v12, %s10000_s30  ;;  %9004 = vrot.lane.b32.xlu1 %v9003_v27, %s12764_s24  ;;  %2821 = vst.msk [vmem:[#allocation3 + $0x58] sm:$0xff] %vm1034_vm14, %v10374_v43  ;;  %v10453_v29 = vld [vmem:[#allocation3 + $0x40] sm:$0xff]  ;;  %v9168_v32 = vpack.i.bf16 %v10446_v28, %v2109_v20 }
 0x45d   : > { %2818 = vst.msk [vmem:[#allocation3 + $0x40] sm:$0xff] %vm1034_vm14, %v10374_v43  ;;  %v9153_v31 = vpack.i.bf16 %v10453_v29, %v2106_v22  ;;  %v8300_v34 = vpack.c.bf16 %v10446_v28, %v10453_v29  ;;  %vm2372_vm14 = vcmask 752640  }
 0x460   : > { %8984 = vrot.lane.b32.xlu0 %v8983_v30, %s12764_s24  ;;  %9009 = vrot.lane.b32.xlu1 %v9003_v27, %s12766_s16 }
 0x464   : > { %8989 = vrot.lane.b32.xlu0 %v8983_v30, %s12766_s16  ;;  %9014 = vrot.lane.b32.xlu1 %v9003_v27, %s9999_s23 }
 0x468   : > { %8994 = vrot.lane.b32.xlu0 %v8983_v30, %s9999_s23  ;;  %9019 = vrot.lane.b32.xlu1 %v9003_v27, %s10000_s30 }
 0x46c   : > { %8999 = vrot.lane.b32.xlu0 %v8983_v30, %s10000_s30  ;;  %9024 = vrot.lane.b32.xlu1 %v9003_v27, %s9982_s22 }
 0x470   : > { %9029 = vrot.lane.b32.xlu1 %v9168_v32, %s12764_s24  ;;  %9049 = vrot.lane.b32.xlu0 %v9153_v31, %s12764_s24 }
 0x474   : > { %9034 = vrot.lane.b32.xlu1 %v9168_v32, %s12766_s16  ;;  %9054 = vrot.lane.b32.xlu0 %v8983_v30, %s9982_s22 }
 0x478   : > { %9039 = vrot.lane.b32.xlu1 %v9168_v32, %s9999_s23  ;;  %9069 = vrot.lane.b32.xlu0 %v9153_v31, %s12766_s16 }
 0x47c   : > { %9044 = vrot.lane.b32.xlu1 %v9168_v32, %s10000_s30  ;;  %9074 = vrot.lane.b32.xlu0 %v10416_v12, %s9982_s22 }
 0x480   : > { %9059 = vrot.lane.b32.xlu1 %v10405_v7, %s9982_s22  ;;  %9084 = vrot.lane.b32.xlu0 %v9153_v31, %s9999_s23 }
 0x484   : > { %9064 = vrot.lane.b32.xlu1 %v9168_v32, %s9982_s22  ;;  %9089 = vrot.lane.b32.xlu0 %v8983_v30, %s12741_s26 }
 0x488   : > { %9079 = vrot.lane.b32.xlu1 %v9003_v27, %s12741_s26  ;;  %9104 = vrot.lane.b32.xlu0 %v9153_v31, %s10000_s30 }
 0x48c   : > { %9094 = vrot.lane.b32.xlu1 %v10405_v7, %s12741_s26  ;;  %9109 = vrot.lane.b32.xlu0 %v10416_v12, %s12741_s26 }
 0x490   : > { %9099 = vrot.lane.b32.xlu1 %v9168_v32, %s12741_s26  ;;  %9119 = vrot.lane.b32.xlu0 %v9153_v31, %s9982_s22 }
 0x494   : > { %9114 = vrot.lane.b32.xlu1 %v9003_v27, %s9997_s28  ;;  %9124 = vrot.lane.b32.xlu0 %v8983_v30, %s9997_s28 }
 0x498   : > { %9129 = vrot.lane.b32.xlu1 %v10405_v7, %s9997_s28  ;;  %9139 = vrot.lane.b32.xlu0 %v9153_v31, %s12741_s26  ;;  %s10009_s26 = smov 2  }
 0x49c   : > { %9134 = vrot.lane.b32.xlu1 %v9168_v32, %s9997_s28  ;;  %9144 = vrot.lane.b32.xlu0 %v10416_v12, %s9997_s28 }
 0x4a0   : > { %9149 = vrot.lane.b32.xlu1 %v9003_v27, %s10002_s17  ;;  %9154 = vrot.lane.b32.xlu0 %v9153_v31, %s9997_s28 }
 0x4a4   : > { %9164 = vrot.lane.b32.xlu1 %v10405_v7, %s10002_s17  ;;  %9159 = vrot.lane.b32.xlu0 %v8983_v30, %s10002_s17 }
 0x4a8   : > { %9169 = vrot.lane.b32.xlu1 %v9168_v32, %s10002_s17  ;;  %9174 = vrot.lane.b32.xlu0 %v9153_v31, %s10002_s17 }
 0x4ac   : > { %2485 = vperm.xlu1 %8942, %v2097_v36   ;;  %9179 = vrot.lane.b32.xlu0 %v10416_v12, %s10002_s17 }
 0x4b0   : > { %2490 = vperm.xlu0 %8941, %v2098_v37  }
 0x4be   : > { %v8945_v38 = vpop.permute.xlu1 %8944 }
 0x4bf   : > { %v8947_v51 = vunpack.i.h.bf16 %v8945_v38  ;;  %v8946_v52 = vunpack.i.l.bf16 %v8945_v38 }
 0x4c2   : > { %v8965_v39 = vpop.permute.xlu0 %8964  ;;  %v10520_v40 = vpop.permute.xlu1 %8949 }
 0x4c3   : > { %v8967_v9 = vunpack.i.h.bf16 %v8965_v39  ;;  %v8966_v10 = vunpack.i.l.bf16 %v8965_v39  ;;  %v8952_v31 = vunpack.i.h.bf16 %v10520_v40  ;;  %v8951_v37 = vunpack.i.l.bf16 %v10520_v40 }
 0x4c6   : > { %v10522_v41 = vpop.permute.xlu0 %8969  ;;  %v10524_v42 = vpop.permute.xlu1 %8954 }
 0x4c7   : > { %v8971_v38 = vunpack.i.l.bf16 %v10522_v41  ;;  %v8972_v40 = vunpack.i.h.bf16 %v10522_v41 }
 0x4ca   : > { %v10526_v43 = vpop.permute.xlu0 %8974  ;;  %v10528_v44 = vpop.permute.xlu1 %8959 }
 0x4ce   : > { %v10530_v45 = vpop.permute.xlu0 %8979  ;;  %v10532_v46 = vpop.permute.xlu1 %9004 }
 0x4cf   : > { %v9007_v47 = vunpack.i.h.bf16 %v10532_v46  ;;  %v9006_v48 = vunpack.i.l.bf16 %v10532_v46 }
 0x4d1   : > { %v2148_v55 = vsel %vm2147_vm7, %v8946_v52, %v9006_v48  ;;  %v2149_v57 = vsel %vm2147_vm7, %v9006_v48, %v9007_v47 }
 0x4d2   : > { %v10536_v49 = vpop.permute.xlu0 %8984  ;;  %v10538_v50 = vpop.permute.xlu1 %9009 }
 0x4d3   : > { %v8987_v53 = vunpack.i.h.bf16 %v10536_v49  ;;  %v8986_v54 = vunpack.i.l.bf16 %v10536_v49  ;;  %v9012_v19 = vunpack.i.h.bf16 %v10538_v50  ;;  %v9011_v20 = vunpack.i.l.bf16 %v10538_v50 }
 0x4d5   : > { %v2150_v56 = vsel %vm2147_vm7, %v8947_v51, %v8986_v54  ;;  %v2151_v58 = vsel %vm2147_vm7, %v8986_v54, %v8987_v53  ;;  %v2194_v36 = vsel %vm2192_vm8, %v9011_v20, %v9012_v19 }
 0x4d6   : > { %v10550_v59 = vpop.permute.xlu0 %8989  ;;  %v10552_v60 = vpop.permute.xlu1 %9014  ;;  %v8230_v61 = vpack.c.bf16 %v2151_v58, %v2149_v57  ;;  %v8232_v62 = vpack.c.bf16 %v2150_v56, %v2148_v55  ;;  %v2193_v58 = vsel %vm2192_vm8, %v8951_v37, %v9011_v20 }
 0x4d7   : > { %v8992_v11 = vunpack.i.h.bf16 %v10550_v59  ;;  %v8991_v12 = vunpack.i.l.bf16 %v10550_v59 }
 0x4d8   : > { %8231 = vmatprep.subr.bf16.mxu0 %v8230_v61  ;;  %v9017_v61 = vunpack.i.h.bf16 %v10552_v60 }
 0x4d9   : > { %8233 = vmatpush1.bf16.msra.mxu0 %v8232_v62  ;;  %v2196_v30 = vsel %vm2192_vm8, %v8991_v12, %v8992_v11  ;;  %v2195_v39 = vsel %vm2192_vm8, %v8952_v31, %v8991_v12  ;;  %v9016_v62 = vunpack.i.l.bf16 %v10552_v60 }
 0x4da   : > { %v10554_v1 = vpop.permute.xlu0 %8994  ;;  %v10556_v4 = vpop.permute.xlu1 %9019  ;;  %v8238_v52 = vpack.c.bf16 %v2196_v30, %v2194_v36  ;;  %v8976_v30 = vunpack.i.l.bf16 %v10526_v43 }
 0x4db   : > { %v9022_v6 = vunpack.i.h.bf16 %v10556_v4  ;;  %v8997_v54 = vunpack.i.h.bf16 %v10554_v1  ;;  %v8996_v55 = vunpack.i.l.bf16 %v10554_v1 }
 0x4de   : > { %v10558_v5 = vpop.permute.xlu0 %8999  ;;  %v10560_v3 = vpop.permute.xlu1 %9024 }
 0x4df   : > { %v9002_v7 = vunpack.i.h.bf16 %v10558_v5 }
 0x4e1   : > { %v8294_v8 = vpack.c.bf16 %v9002_v7, %v9022_v6 }
 0x4e2   : > { %v10570_v13 = vpop.permute.xlu0 %9049  ;;  %v10572_v14 = vpop.permute.xlu1 %9029 }
 0x4e3   : > { %v9052_v15 = vunpack.i.h.bf16 %v10570_v13  ;;  %v9051_v16 = vunpack.i.l.bf16 %v10570_v13  ;;  %v9032_v17 = vunpack.i.h.bf16 %v10572_v14  ;;  %v9031_v18 = vunpack.i.l.bf16 %v10572_v14  ;;  %8295 = vmatprep.subr.bf16.mxu1 %v8294_v8 }
 0x4e4   : > { %8297 = vmatpush3.bf16.msra.mxu1 %v8296_v33 }
 0x4e5   : > { %v2152_v21 = vsel %vm2147_vm7, %v8966_v10, %v9051_v16  ;;  %v2154_v22 = vsel %vm2147_vm7, %v8967_v9, %v9031_v18  ;;  %v2153_v23 = vsel %vm2147_vm7, %v9051_v16, %v9052_v15  ;;  %v2155_v24 = vsel %vm2147_vm7, %v9031_v18, %v9032_v17 }
 0x4e6   : > { %v10588_v25 = vpop.permute.xlu0 %9054  ;;  %v10590_v27 = vpop.permute.xlu1 %9034  ;;  %v8236_v26 = vpack.c.bf16 %v2154_v22, %v2152_v21  ;;  %v8234_v32 = vpack.c.bf16 %v2155_v24, %v2153_v23  ;;  %v8240_v9 = vpack.c.bf16 %v2195_v39, %v2193_v58  ;;  %v2241_v22 = vsel %vm2237_vm11, %v8996_v55, %v8997_v54 }
 0x4e7   : > { %v9037_v33 = vunpack.i.h.bf16 %v10590_v27  ;;  %v9036_v35 = vunpack.i.l.bf16 %v10590_v27  ;;  %v8957_v23 = vunpack.i.h.bf16 %v10524_v42  ;;  %v8956_v24 = vunpack.i.l.bf16 %v10524_v42 }
 0x4e8   : > { %8235 = vmatprep.subr.bf16.mxu0 %v8234_v32 }
 0x4e9   : > { %8237 = vmatpush1.bf16.msra.mxu0 %v8236_v26  ;;  %v2200_v12 = vsel %vm2192_vm8, %v9036_v35, %v9037_v33  ;;  %v2199_v41 = vsel %vm2192_vm8, %v8972_v40, %v9036_v35  ;;  %v2239_v26 = vsel %vm2237_vm11, %v9016_v62, %v9017_v61  ;;  %v2240_v31 = vsel %vm2237_vm11, %v8957_v23, %v8996_v55 }
 0x4ea   : > { %v10607_v48 = vpop.permute.xlu0 %9069  ;;  %v10609_v51 = vpop.permute.xlu1 %9039  ;;  %8239 = vmatprep.subr.bf16.mxu0 %v8238_v52  ;;  %v8246_v37 = vpack.c.bf16 %v2241_v22, %v2239_v26  ;;  %v2238_v55 = vsel %vm2237_vm11, %v8956_v24, %v9016_v62  ;;  %v9021_v40 = vunpack.i.l.bf16 %v10556_v4  ;;  %v8961_v22 = vunpack.i.l.bf16 %v10528_v44 }
 0x4eb   : > { %v9072_v56 = vunpack.i.h.bf16 %v10607_v48  ;;  %v9071_v57 = vunpack.i.l.bf16 %v10607_v48  ;;  %v9041_v32 = vunpack.i.l.bf16 %v10609_v51  ;;  %v9042_v39 = vunpack.i.h.bf16 %v10609_v51 }
 0x4ec   : > { %v8982_v23 = vunpack.i.h.bf16 %v10530_v45 }
 0x4ed   : > { %v2197_v8 = vsel %vm2192_vm8, %v8971_v38, %v9071_v57  ;;  %v2198_v10 = vsel %vm2192_vm8, %v9071_v57, %v9072_v56  ;;  %8241 = vmatpush1.bf16.msra.mxu0 %v8240_v9  ;;  %v9001_v38 = vunpack.i.l.bf16 %v10558_v5  ;;  %v8977_v57 = vunpack.i.h.bf16 %v10526_v43 }
 0x4ee   : > { %v10627_v16 = vpop.permute.xlu0 %9074  ;;  %v10629_v18 = vpop.permute.xlu1 %9044  ;;  %v8242_v20 = vpack.c.bf16 %v2200_v12, %v2198_v10  ;;  %v8244_v21 = vpack.c.bf16 %v2199_v41, %v2197_v8  ;;  %v8248_v8 = vpack.c.bf16 %v2240_v31, %v2238_v55  ;;  %v8962_v43 = vunpack.i.h.bf16 %v10528_v44 }
 0x4ef   : > { %v2244_v9 = vsel %vm2237_vm11, %v8977_v57, %v9041_v32  ;;  %v2245_v62 = vsel %vm2237_vm11, %v9041_v32, %v9042_v39  ;;  %v9046_v31 = vunpack.i.l.bf16 %v10629_v18  ;;  %v2284_v32 = vsel %vm2282_vm12, %v9021_v40, %v9022_v6 }
 0x4f0   : > { %8243 = vmatprep.subr.bf16.mxu0 %v8242_v20  ;;  %v2285_v26 = vsel %vm2282_vm12, %v8962_v43, %v9001_v38  ;;  %v2283_v5 = vsel %vm2282_vm12, %v8961_v22, %v9021_v40  ;;  %v9056_v55 = vunpack.i.l.bf16 %v10588_v25  ;;  %v9026_v6 = vunpack.i.l.bf16 %v10560_v3 }
 0x4f1   : > { %8245 = vmatpush1.bf16.msra.mxu0 %v8244_v21  ;;  %v2286_v21 = vsel %vm2282_vm12, %v9001_v38, %v9002_v7  ;;  %v9027_v7 = vunpack.i.h.bf16 %v10560_v3  ;;  %v9057_v38 = vunpack.i.h.bf16 %v10588_v25  ;;  %v2289_v25 = vsel %vm2282_vm12, %v8982_v23, %v9046_v31 }
 0x4f2   : > { %v10642_v35 = vpop.permute.xlu0 %9084  ;;  %v10644_v36 = vpop.permute.xlu1 %9059  ;;  %8247 = vmatprep.subr.bf16.mxu0 %v8246_v37  ;;  %v8981_v37 = vunpack.i.l.bf16 %v10530_v45  ;;  %v8254_v57 = vpack.c.bf16 %v2286_v21, %v2284_v32  ;;  %v8304_v23 = vpack.c.bf16 %v8987_v53, %v9007_v47  ;;  %v9076_v29 = vunpack.i.l.bf16 %v10627_v16 }
 0x4f3   : > { %v9087_v42 = vunpack.i.h.bf16 %v10642_v35  ;;  %v9086_v52 = vunpack.i.l.bf16 %v10642_v35  ;;  %v9062_v45 = vunpack.i.h.bf16 %v10644_v36  ;;  %v9061_v40 = vunpack.i.l.bf16 %v10644_v36 }
 0x4f4   : > { %v8302_v36 = vpack.c.bf16 %v9057_v38, %v9027_v7  ;;  %v2331_v22 = vsel %vm2327_vm13, %v9056_v55, %v9057_v38 }
 0x4f5   : > { %v2242_v58 = vsel %vm2237_vm11, %v8976_v30, %v9086_v52  ;;  %v2243_v41 = vsel %vm2237_vm11, %v9086_v52, %v9087_v42  ;;  %8249 = vmatpush1.bf16.msra.mxu0 %v8248_v8  ;;  %v9047_v30 = vunpack.i.h.bf16 %v10629_v18 }
 0x4f6   : > { %v10655_v10 = vpop.permute.xlu0 %9089  ;;  %v10657_v12 = vpop.permute.xlu1 %9064  ;;  %v8252_v20 = vpack.c.bf16 %v2244_v9, %v2242_v58  ;;  %v8250_v24 = vpack.c.bf16 %v2245_v62, %v2243_v41  ;;  %v8256_v58 = vpack.c.bf16 %v2285_v26, %v2283_v5  ;;  %v2328_v26 = vsel %vm2327_vm13, %v9061_v40, %v9026_v6 }
 0x4f7   : > { %v2290_v43 = vsel %vm2282_vm12, %v9046_v31, %v9047_v30  ;;  %v9067_v32 = vunpack.i.h.bf16 %v10657_v12  ;;  %v2329_v31 = vsel %vm2327_vm13, %v9026_v6, %v9027_v7  ;;  %v9092_v49 = vunpack.i.h.bf16 %v10655_v10 }
 0x4f8   : > { %8251 = vmatprep.subr.bf16.mxu0 %v8250_v24  ;;  %v2330_v24 = vsel %vm2327_vm13, %v9062_v45, %v9056_v55  ;;  %v8262_v28 = vpack.c.bf16 %v2331_v22, %v2329_v31  ;;  %v9091_v53 = vunpack.i.l.bf16 %v10655_v10 }
 0x4f9   : > { %8253 = vmatpush1.bf16.msra.mxu0 %v8252_v20  ;;  %v8264_v47 = vpack.c.bf16 %v2330_v24, %v2328_v26  ;;  %v8316_v24 = vpack.c.bf16 %v9037_v33, %v9072_v56 }
 0x4fa   : > { %v9105_v44 = vpop.permute.xlu0 %9104  ;;  %v10680_v52 = vpop.permute.xlu1 %9079  ;;  %8255 = vmatprep.subr.bf16.mxu0 %v8254_v57  ;;  %v2376_v13 = vsel %vm2372_vm14, %v9091_v53, %v9092_v49 }
 0x4fb   : > { %v9107_v18 = vunpack.i.h.bf16 %v9105_v44  ;;  %v9106_v4 = vunpack.i.l.bf16 %v9105_v44  ;;  %v9082_v5 = vunpack.i.h.bf16 %v10680_v52 }
 0x4fd   : > { %v2287_v8 = vsel %vm2282_vm12, %v8981_v37, %v9106_v4  ;;  %v8298_v9 = vpack.c.bf16 %v9047_v30, %v9107_v18  ;;  %v2288_v41 = vsel %vm2282_vm12, %v9106_v4, %v9107_v18  ;;  %8257 = vmatpush1.bf16.msra.mxu0 %v8256_v58  ;;  %v9066_v30 = vunpack.i.l.bf16 %v10657_v12 }
 0x4fe   : > { %v10691_v62 = vpop.permute.xlu0 %9109  ;;  %v9095_v20 = vpop.permute.xlu1 %9094  ;;  %v8258_v3 = vpack.c.bf16 %v2290_v43, %v2288_v41  ;;  %v8260_v21 = vpack.c.bf16 %v2289_v25, %v2287_v8  ;;  %v9077_v37 = vunpack.i.h.bf16 %v10627_v16  ;;  %v9081_v12 = vunpack.i.l.bf16 %v10680_v52 }
 0x4ff   : > { %8299 = vmatprep.subr.bf16.mxu1 %v8298_v9  ;;  %v9097_v7 = vunpack.i.h.bf16 %v9095_v20  ;;  %v2335_v38 = vsel %vm2327_vm13, %v9066_v30, %v9067_v32  ;;  %v9096_v52 = vunpack.i.l.bf16 %v9095_v20  ;;  %v8308_v16 = vpack.c.bf16 %v9032_v17, %v9052_v15 }
 0x500   : > { %8259 = vmatprep.subr.bf16.mxu0 %v8258_v3  ;;  %8301 = vmatpush3.bf16.msra.mxu1 %v8300_v34  ;;  %v2334_v6 = vsel %vm2327_vm13, %v9077_v37, %v9066_v30  ;;  %v2374_v58 = vsel %vm2372_vm14, %v9081_v12, %v9082_v5  ;;  %v8310_v9 = vpack.c.bf16 %v9092_v49, %v9082_v5  ;;  %v9111_v14 = vunpack.i.l.bf16 %v10691_v62 }
 0x501   : > { %8303 = vmatprep.subr.bf16.mxu1 %v8302_v36  ;;  %8261 = vmatpush1.bf16.msra.mxu0 %v8260_v21  ;;  %v8312_v41 = vpack.c.bf16 %v8992_v11, %v9012_v19  ;;  %v2375_v15 = vsel %vm2372_vm14, %v9097_v7, %v9091_v53  ;;  %v2373_v17 = vsel %vm2372_vm14, %v9096_v52, %v9081_v12  ;;  %v9112_v26 = vunpack.i.h.bf16 %v10691_v62 }
 0x502   : > { %v9120_v44 = vpop.permute.xlu0 %9119  ;;  %v10709_v57 = vpop.permute.xlu1 %9099  ;;  %8263 = vmatprep.subr.bf16.mxu0 %v8262_v28  ;;  %v8270_v43 = vpack.c.bf16 %v2376_v13, %v2374_v58  ;;  %v8320_v53 = vpack.c.bf16 %v8997_v54, %v9017_v61 }
 0x503   : > { %v9122_v34 = vunpack.i.h.bf16 %v9120_v44  ;;  %v9121_v46 = vunpack.i.l.bf16 %v9120_v44  ;;  %v9102_v25 = vunpack.i.h.bf16 %v10709_v57  ;;  %v9101_v20 = vunpack.i.l.bf16 %v10709_v57 }
 0x504   : > { %8305 = vmatpush3.bf16.msra.mxu1 %v8304_v23 }
 0x505   : > { %v2332_v55 = vsel %vm2327_vm13, %v9076_v29, %v9121_v46  ;;  %v8306_v18 = vpack.c.bf16 %v9067_v32, %v9122_v34  ;;  %v2333_v4 = vsel %vm2327_vm13, %v9121_v46, %v9122_v34  ;;  %8265 = vmatpush1.bf16.msra.mxu0 %v8264_v47  ;;  %v8272_v32 = vpack.c.bf16 %v2375_v15, %v2373_v17 }
 0x506   : > { %v9125_v45 = vpop.permute.xlu0 %9124  ;;  %v9115_v10 = vpop.permute.xlu1 %9114  ;;  %v8266_v40 = vpack.c.bf16 %v2335_v38, %v2333_v4  ;;  %v8268_v8 = vpack.c.bf16 %v2334_v6, %v2332_v55  ;;  %v2379_v5 = vsel %vm2372_vm14, %v9112_v26, %v9101_v20  ;;  %v2380_v27 = vsel %vm2372_vm14, %v9101_v20, %v9102_v25 }
 0x507   : > { %8307 = vmatprep.subr.bf16.mxu1 %v8306_v18  ;;  %v9127_v50 = vunpack.i.h.bf16 %v9125_v45  ;;  %v9117_v3 = vunpack.i.h.bf16 %v9115_v10  ;;  %v9126_v19 = vunpack.i.l.bf16 %v9125_v45  ;;  %v9116_v21 = vunpack.i.l.bf16 %v9115_v10 }
 0x508   : > { %8267 = vmatprep.subr.bf16.mxu0 %v8266_v40  ;;  %8309 = vmatpush3.bf16.msra.mxu1 %v8308_v16  ;;  %v8324_v40 = vpack.c.bf16 %v9042_v39, %v9087_v42 }
 0x509   : > { %8311 = vmatprep.subr.bf16.mxu1 %v8310_v9  ;;  %8269 = vmatpush1.bf16.msra.mxu0 %v8268_v8  ;;  %v8318_v33 = vpack.c.bf16 %v9127_v50, %v9117_v3  ;;  %v2419_v62 = vsel %vm2417_vm15, %v9116_v21, %v9117_v3  ;;  %v2421_v57 = vsel %vm2417_vm15, %v9126_v19, %v9127_v50 }
 0x50a   : > { %v9140_v59 = vpop.permute.xlu0 %9139  ;;  %v9130_v11 = vpop.permute.xlu1 %9129  ;;  %8271 = vmatprep.subr.bf16.mxu0 %v8270_v43  ;;  %v8278_v52 = vpack.c.bf16 %v2421_v57, %v2419_v62  ;;  %v2091_v43 = vld [vmem:[%s12716_s5] sm:$0xff] }
 0x50b   : > { %v9142_v36 = vunpack.i.h.bf16 %v9140_v59  ;;  %v9141_v22 = vunpack.i.l.bf16 %v9140_v59  ;;  %v9132_v23 = vunpack.i.h.bf16 %v9130_v11  ;;  %v9131_v31 = vunpack.i.l.bf16 %v9130_v11  ;;  %v2095_v11 = vld [vmem:[%s12716_s5 + $0x20] sm:$0xff] }
 0x50c   : > { %8313 = vmatpush3.bf16.msra.mxu1 %v8312_v41 }
 0x50d   : > { %v2377_v30 = vsel %vm2372_vm14, %v9111_v14, %v9141_v22  ;;  %v8314_v37 = vpack.c.bf16 %v9102_v25, %v9142_v36  ;;  %v2378_v48 = vsel %vm2372_vm14, %v9141_v22, %v9142_v36  ;;  %8273 = vmatpush1.bf16.msra.mxu0 %v8272_v32  ;;  %v2420_v46 = vsel %vm2417_vm15, %v9132_v23, %v9126_v19 }
 0x50e   : > { %v9145_v12 = vpop.permute.xlu0 %9144  ;;  %v9135_v44 = vpop.permute.xlu1 %9134  ;;  %v8276_v56 = vpack.c.bf16 %v2379_v5, %v2377_v30  ;;  %v8274_v34 = vpack.c.bf16 %v2380_v27, %v2378_v48  ;;  %v2418_v47 = vsel %vm2417_vm15, %v9131_v31, %v9116_v21  ;;  %v2096_v27 = vld [vmem:[%s12716_s5 + $0x28] sm:$0xff] }
 0x50f   : > { %8315 = vmatprep.subr.bf16.mxu1 %v8314_v37  ;;  %v9147_v28 = vunpack.i.h.bf16 %v9145_v12  ;;  %v9136_v29 = vunpack.i.l.bf16 %v9135_v44  ;;  %v9137_v49 = vunpack.i.h.bf16 %v9135_v44  ;;  %v9146_v55 = vunpack.i.l.bf16 %v9145_v12  ;;  %v2093_v12 = vld [vmem:[%s12716_s5 + $0x10] sm:$0xff] }
 0x510   : > { %8317 = vmatpush3.bf16.msra.mxu1 %v8316_v24  ;;  %8275 = vmatprep.subr.bf16.mxu0 %v8274_v34  ;;  %v8280_v10 = vpack.c.bf16 %v2420_v46, %v2418_v47  ;;  %v2094_v24 = vld [vmem:[%s12716_s5 + $0x18] sm:$0xff] }
 0x511   : > { %8319 = vmatprep.subr.bf16.mxu1 %v8318_v33  ;;  %8277 = vmatpush1.bf16.msra.mxu0 %v8276_v56  ;;  %v2424_v16 = vsel %vm2417_vm15, %v9147_v28, %v9136_v29  ;;  %v2425_v61 = vsel %vm2417_vm15, %v9136_v29, %v9137_v49  ;;  %v9959_v56 = vld [vmem:[#allocation4] sm:$0xff] }
 0x512   : > { %v9155_v7 = vpop.permute.xlu0 %9154  ;;  %v9150_v38 = vpop.permute.xlu1 %9149  ;;  %8279 = vmatprep.subr.bf16.mxu0 %v8278_v52 }
 0x513   : > { %v9157_v18 = vunpack.i.h.bf16 %v9155_v7  ;;  %v9156_v4 = vunpack.i.l.bf16 %v9155_v7  ;;  %v9152_v6 = vunpack.i.h.bf16 %v9150_v38  ;;  %v9151_v45 = vunpack.i.l.bf16 %v9150_v38  ;;  %v2809_v38 = vld [vmem:[%s12712_s1] sm:$0x7] }
 0x514   : > { %8321 = vmatpush3.bf16.msra.mxu1 %v8320_v53 }
 0x515   : > { %v2422_v60 = vsel %vm2417_vm15, %v9146_v55, %v9156_v4  ;;  %v8322_v1 = vpack.c.bf16 %v9137_v49, %v9157_v18  ;;  %v2423_v54 = vsel %vm2417_vm15, %v9156_v4, %v9157_v18  ;;  %8281 = vmatpush1.bf16.msra.mxu0 %v8280_v10  ;;  %v2464_v35 = vsel %vm2462_vm0, %v9151_v45, %v9152_v6 }
 0x516   : > { %v9160_v58 = vpop.permute.xlu0 %9159  ;;  %v9165_v8 = vpop.permute.xlu1 %9164  ;;  %v8282_v9 = vpack.c.bf16 %v2425_v61, %v2423_v54  ;;  %v8284_v41 = vpack.c.bf16 %v2424_v16, %v2422_v60  ;;  %v12743_v49 = vsub.s32 2, %v10245_v63  ;;  %v12745_v18 = vsub.s32 0, %v10245_v63 }
 0x517   : > { %v9162_v13 = vunpack.i.h.bf16 %v9160_v58  ;;  %v9161_v14 = vunpack.i.l.bf16 %v9160_v58  ;;  %v9167_v15 = vunpack.i.h.bf16 %v9165_v8  ;;  %v9166_v17 = vunpack.i.l.bf16 %v9165_v8  ;;  %8323 = vmatprep.subr.bf16.mxu1 %v8322_v1 }
 0x518   : > { %8283 = vmatprep.subr.bf16.mxu0 %v8282_v9  ;;  %8325 = vmatpush3.bf16.msra.mxu1 %v8324_v40  ;;  %v2826_v61 = vrot.slane %v2809_v38, %v12745_v18 }
 0x519   : > { %v2465_v51 = vsel %vm2462_vm0, %v9167_v15, %v9161_v14  ;;  %v2463_v39 = vsel %vm2462_vm0, %v9166_v17, %v9151_v45  ;;  %v8326_v42 = vpack.c.bf16 %v9162_v13, %v9152_v6  ;;  %v2466_v25 = vsel %vm2462_vm0, %v9161_v14, %v9162_v13  ;;  %8285 = vmatpush1.bf16.msra.mxu0 %v8284_v41 }
 0x51a   : > { %v9175_v20 = vpop.permute.xlu0 %9174  ;;  %v9170_v50 = vpop.permute.xlu1 %9169  ;;  %v8286_v3 = vpack.c.bf16 %v2466_v25, %v2464_v35  ;;  %v8288_v59 = vpack.c.bf16 %v2465_v51, %v2463_v39  ;;  %v12744_v6 = vsub.s32 1, %v10245_v63  ;;  %v2834_v45 = vrot.slane %v2809_v38, %v12743_v49 }
 0x51b   : > { %v9177_v19 = vunpack.i.h.bf16 %v9175_v20  ;;  %v9176_v21 = vunpack.i.l.bf16 %v9175_v20  ;;  %v9172_v36 = vunpack.i.h.bf16 %v9170_v50  ;;  %v9171_v22 = vunpack.i.l.bf16 %v9170_v50  ;;  %2718 = vmatmul.mubr.f32.vlgmr.msra.gmra.mrb[28].mxu1 %v2091_v43  ;;  %8327 = vmatprep.subr.bf16.mxu1 %v8326_v42 }
 0x51c   : > { %8287 = vmatprep.subr.bf16.mxu0 %v8286_v3  ;;  %8329 = vmatpush3.bf16.msra.mxu1 %v8326_v42  ;;  %v2830_v8 = vrot.slane %v2809_v38, %v12744_v6  ;;  %v12746_v3 = vmov 0.0|0.0  }
 0x51d   : > { %2722 = vmatprep.mubr.f32.mxu1 %v2095_v11  ;;  %v8330_v26 = vpack.c.bf16 %v9172_v36, %v9177_v19  ;;  %v2468_v32 = vsel %vm2462_vm0, %v9176_v21, %v9177_v19  ;;  %v2470_v30 = vsel %vm2462_vm0, %v9171_v22, %v9172_v36  ;;  %2564 = vmatmul.mubr.f32.vlgmr.msra.gmra.mrb[16].mxu0 %v2091_v43 }
 0x51e   : > { %v9180_v23 = vpop.permute.xlu0 %9179  ;;  %v8290_v31 = vpack.c.bf16 %v2470_v30, %v2468_v32  ;;  %8289 = vmatpush1.bf16.msra.mxu0 %v8288_v59  ;;  %2569 = vmatprep.mubr.f32.mxu0 %v2095_v11 }
 0x51f   : > { %v9182_v37 = vunpack.i.h.bf16 %v9180_v23  ;;  %v9181_v5 = vunpack.i.l.bf16 %v9180_v23  ;;  %2723 = vmatmul.mubr.f32.gmra.mrb[30].mxu1 %v2094_v24  ;;  %8331 = vmatprep.subr.bf16.mxu1 %v8330_v26 }
 0x520   : > { %8291 = vmatprep.subr.bf16.mxu0 %v8290_v31  ;;  %8333 = vmatpush3.bf16.msra.mxu1 %v8330_v26 }
 0x521   : > { %v2467_v44 = vsel %vm2462_vm0, %v9181_v5, %v9176_v21  ;;  %v2469_v48 = vsel %vm2462_vm0, %v9182_v37, %v9171_v22  ;;  %8025 = vmatprep.mubr.msk.f32.mxu1 %vm840_vm9, %v2093_v12  ;;  %2570 = vmatmul.mubr.f32.gmra.mrb[18].mxu0 %v2094_v24 }
 0x522   : > { %v8292_v33 = vpack.c.bf16 %v2469_v48, %v2467_v44  ;;  %2640 = vmatprep.mubr.f32.mxu0 %v9959_v56 }
 0x523   : > { %8026 = vmatmul.mubr.msk.f32.vlgmr.msra.gmra.mrb[32].mxu1 %vm840_vm9, %v2096_v27 }
 0x524   : > { %8293 = vmatpush1.bf16.msra.mxu0 %v8292_v33 }
 0x525   : > { %8370 = vmatprep.subr.bf16.mxu0 %v12746_v3 }
 0x527   : > { %7626 = vmatmul.mubr.msk.f32.vlgmr.msra.gmra.mrb[16].mxu0 %vm840_vm9, %v2093_v12 }
 0x528   : > { %2646 = vmatprep.mubr.f32.mxu0 %v9959_v56 }
 0x52b   : > { %7627 = vmatmul.mubr.msk.f32.gmra.mrb[18].mxu0 %vm840_vm9, %v2096_v27  ;;  %v2486_v53 = vpop.permute.xlu1 %2485 }
 0x52f   : > { %v2491_v47 = vpop.permute.xlu0 %2490 }
 0x5ee   : > { %v7843_v62 = vpop.f32.mrb[28].mxu1 }
 0x5ef   : > { %v7844_v57 = vpop.f32.mrb[29].mxu1 }
 0x5f0   : > { %v7845_v28 = vadd.f32 %v7844_v57, %v7843_v62  ;;  %v2882_v57 = vld [vmem:[%s12718_s7 + $0x8] sm:$0xff] }
 0x5f1   : > { %7632 = vmatprep.mubr.msk.f32.mxu0 %vm3085_vm6, %v2882_v57  ;;  %7630 = vmatprep.mubr.msk.f32.mxu1 %vm3085_vm6, %v2882_v57 }
 0x5f2   : > { %v7846_v29 = vpop.f32.mrb[30].mxu1  ;;  %v2720_v55 = vadd.f32 %v7845_v28, %v2486_v53  ;;  %v2885_v28 = vld [vmem:[%s12719_s8] sm:$0xff] }
 0x5f3   : > { %v7847_v34 = vpop.f32.mrb[31].mxu1 }
 0x5f4   : > { %v7848_v46 = vadd.f32 %v7847_v34, %v7846_v29  ;;  %v2886_v29 = vld [vmem:[%s12719_s8 + $0x8] sm:$0xff] }
 0x5f6   : > { %v2725_v7 = vadd.f32 %v7848_v46, %v2491_v47  ;;  %v8027_v52 = vpop.f32.mrb[32].mxu1 }
 0x5f7   : > { %v2794_v16 = vpop.f32.mrb[33].mxu1 }
 0x5f8   : > { %v2800_v4 = vadd.f32 %v8027_v52, %v2725_v7  ;;  %v2795_v10 = vadd.f32 %v2794_v16, %v2720_v55 }
 0x5fa   : > { %v2642_v60 = vpop.f32.mrb[16].mxu0  ;;  %v2805_v1 = vmax.f32 %v2795_v10, 0.0  ;;  %v2808_v20 = vmax.f32 %v2800_v4, 0.0 }
 0x5fb   : > { %v8784_v54 = vadd.f32 %v2642_v60, %v2486_v53  ;;  %v2644_v40 = vpop.f32.mrb[17].mxu0 }
 0x5fc   : > { %v8785_v58 = vadd.f32 %v2644_v40, %v2486_v53  ;;  %v2840_v9 = vmul.f32 %v2834_v45, %v2805_v1  ;;  %v2843_v59 = vmul.f32 %v2834_v45, %v2808_v20 }
 0x5fd   : > { %v2803_v41 = vmax.f32 %v8784_v54, 0.0 }
 0x5fe   : > { %v2804_v13 = vmax.f32 %v8785_v58, 0.0  ;;  %v2648_v14 = vpop.f32.mrb[18].mxu0  ;;  %2854 = vrot.lane.b32.xlu1 %v2840_v9, %s9976_s29 }
 0x5ff   : > { %v2838_v15 = vmul.f32 %v2826_v61, %v2803_v41  ;;  %v8786_v17 = vadd.f32 %v2648_v14, %v2491_v47  ;;  %v2650_v43 = vpop.f32.mrb[19].mxu0 }
 0x600   : > { %v2839_v35 = vmul.f32 %v2830_v8, %v2804_v13  ;;  %v8787_v51 = vadd.f32 %v2650_v43, %v2491_v47 }
 0x601   : > { %v2806_v39 = vmax.f32 %v8786_v17, 0.0 }
 0x602   : > { %v2807_v42 = vmax.f32 %v8787_v51, 0.0  ;;  %2852 = vrot.lane.b32.xlu0 %v2839_v35, %s9976_s29  ;;  %2850 = vrot.lane.b32.xlu1 %v2838_v15, %s9976_s29 }
 0x603   : > { %v2841_v25 = vmul.f32 %v2826_v61, %v2806_v39 }
 0x604   : > { %v2842_v50 = vmul.f32 %v2830_v8, %v2807_v42 }
 0x606   : > { %2856 = vrot.lane.b32.xlu0 %v2841_v25, %s9976_s29  ;;  %2858 = vrot.lane.b32.xlu1 %v2842_v50, %s9976_s29 }
 0x60a   : > { %2860 = vrot.lane.b32.xlu0 %v2843_v59, %s9976_s29  ;;  %s12767_s29 = smov 92  }
 0x670   : > { %v2855_v11 = vpop.permute.xlu1 %2854 }
 0x674   : > { %v2853_v19 = vpop.permute.xlu0 %2852  ;;  %v2851_v36 = vpop.permute.xlu1 %2850 }
 0x675   : > { %v2864_v21 = vsel %vm2862_vm3, %v2853_v19, %v2855_v11  ;;  %v2863_v22 = vsel %vm2862_vm3, %v2851_v36, %v2853_v19  ;;  %2874 = vst.msk [vmem:[#allocation3] sm:$0xff] %vm2873_vm5, %v2851_v36 }
 0x676   : > { %2877 = vst.msk [vmem:[#allocation3 + $0x10] sm:$0xff] %vm2876_vm4, %v2864_v21  ;;  %2875 = vst [vmem:[#allocation3 + $0x8] sm:$0xff] %v2863_v22 }
 0x678   : > { %v2857_v24 = vpop.permute.xlu0 %2856  ;;  %v2859_v26 = vpop.permute.xlu1 %2858 }
 0x679   : > { %2878 = vst.msk [vmem:[#allocation3 + $0x18] sm:$0xff] %vm2873_vm5, %v2857_v24  ;;  %v2865_v32 = vsel %vm2862_vm3, %v2857_v24, %v2859_v26  ;;  %vm3670_vm5 = vcmask 1048440  }
 0x67a   : > { %2879 = vst [vmem:[#allocation3 + $0x20] sm:$0xff] %v2865_v32  ;;  %v8334_v30 = vpack.c.bf16 %v2865_v32, %v2863_v22 }
 0x67c   : > { %v2861_v23 = vpop.permute.xlu0 %2860  ;;  %8335 = vmatprep.subr.bf16.mxu1 %v8334_v30  ;;  %v2887_v12 = vld [vmem:[#allocation3] sm:$0xff] }
 0x67d   : > { %v2866_v31 = vsel %vm2862_vm3, %v2859_v26, %v2861_v23  ;;  %v2889_v37 = vld [vmem:[#allocation3 + $0x10] sm:$0xff]  ;;  %vm3572_vm3 = vcmask 613720  }
 0x67e   : > { %2880 = vst.msk [vmem:[#allocation3 + $0x28] sm:$0xff] %vm2876_vm4, %v2866_v31  ;;  %v9188_v5 = vpack.i.bf16 %v2889_v37, %v2863_v22  ;;  %vm3265_vm4 = vcmask 48128  }
 0x680   : > { %9189 = vrot.lane.b32.xlu0 %v9188_v5, %s12766_s16  ;;  %9184 = vrot.lane.b32.xlu1 %v9188_v5, %s12764_s24  ;;  %v2890_v44 = vld [vmem:[#allocation3 + $0x18] sm:$0xff] }
 0x681   : > { %v8336_v48 = vpack.c.bf16 %v2890_v44, %v2887_v12  ;;  %v9208_v33 = vpack.i.bf16 %v2890_v44, %v2887_v12 }
 0x683   : > { %8337 = vmatpush1.bf16.msra.mxu1 %v8336_v48 }
 0x684   : > { %9199 = vrot.lane.b32.xlu0 %v9188_v5, %s10000_s30  ;;  %9194 = vrot.lane.b32.xlu1 %v9188_v5, %s9999_s23 }
 0x685   : > { %v2892_v27 = vld [vmem:[#allocation3 + $0x28] sm:$0xff] }
 0x686   : > { %v8371_v56 = vpack.c.bf16 %v2892_v27, %v2889_v37  ;;  %v9218_v62 = vpack.i.bf16 %v2892_v27, %v2865_v32 }
 0x688   : > { %9209 = vrot.lane.b32.xlu0 %v9208_v33, %s12766_s16  ;;  %9204 = vrot.lane.b32.xlu1 %v9208_v33, %s12764_s24 }
 0x689   : > { %8372 = vmatpush1.bf16.msra.mxu0 %v8371_v56 }
 0x68a   : > { %8373 = vmatprep.subr.bf16.mxu0 %v12746_v3 }
 0x68c   : > { %9214 = vrot.lane.b32.xlu1 %v9208_v33, %s9999_s23  ;;  %9219 = vrot.lane.b32.xlu0 %v9218_v62, %s12764_s24 }
 0x690   : > { %9229 = vrot.lane.b32.xlu1 %v9188_v5, %s9982_s22  ;;  %9224 = vrot.lane.b32.xlu0 %v9208_v33, %s10000_s30 }
 0x694   : > { %9234 = vrot.lane.b32.xlu1 %v9218_v62, %s12766_s16  ;;  %9244 = vrot.lane.b32.xlu0 %v9218_v62, %s9999_s23 }
 0x698   : > { %9239 = vrot.lane.b32.xlu1 %v9208_v33, %s9982_s22  ;;  %9249 = vrot.lane.b32.xlu0 %v9188_v5, %s12767_s29 }
 0x69c   : > { %9254 = vrot.lane.b32.xlu1 %v9218_v62, %s10000_s30  ;;  %9259 = vrot.lane.b32.xlu0 %v9218_v62, %s9982_s22  ;;  %s10010_s22 = smov 112   ;;  %s10011_s30 = smov 94  }
 0x6a0   : > { %9269 = vrot.lane.b32.xlu1 %v9188_v5, %s9997_s28  ;;  %9264 = vrot.lane.b32.xlu0 %v9208_v33, %s12767_s29 }
 0x6a4   : > { %9274 = vrot.lane.b32.xlu1 %v9218_v62, %s12767_s29  ;;  %9284 = vrot.lane.b32.xlu0 %v9218_v62, %s9997_s28 }
 0x6a8   : > { %9279 = vrot.lane.b32.xlu1 %v9208_v33, %s9997_s28  ;;  %9289 = vrot.lane.b32.xlu0 %v9188_v5, %s10002_s17 }
 0x6ac   : > { %9294 = vrot.lane.b32.xlu1 %v9218_v62, %s10002_s17  ;;  %9299 = vrot.lane.b32.xlu0 %v9208_v33, %s10002_s17  ;;  %s10006_s17 = smov 56  }
 0x6b0   : > { %3077 = vperm.xlu1 %8942, %v2885_v28   ;;  %3082 = vperm.xlu0 %8941, %v2886_v29  }
 0x6f2   : > { %v9190_v34 = vpop.permute.xlu0 %9189  ;;  %v9185_v46 = vpop.permute.xlu1 %9184 }
 0x6f3   : > { %v9187_v52 = vunpack.i.h.bf16 %v9185_v46  ;;  %v9186_v55 = vunpack.i.l.bf16 %v9185_v46  ;;  %v9192_v15 = vunpack.i.h.bf16 %v9190_v34  ;;  %v9191_v17 = vunpack.i.l.bf16 %v9190_v34 }
 0x6f5   : > { %v2912_v54 = vsel %vm2147_vm7, %v9186_v55, %v9187_v52  ;;  %v2934_v32 = vsel %vm2192_vm8, %v9191_v17, %v9192_v15 }
 0x6f6   : > { %v10846_v47 = vpop.permute.xlu0 %9199  ;;  %v10848_v53 = vpop.permute.xlu1 %9194 }
 0x6f7   : > { %v9197_v59 = vunpack.i.h.bf16 %v10848_v53  ;;  %v9196_v11 = vunpack.i.l.bf16 %v10848_v53  ;;  %v9202_v12 = vunpack.i.h.bf16 %v10846_v47  ;;  %v9201_v44 = vunpack.i.l.bf16 %v10846_v47 }
 0x6f9   : > { %v2956_v27 = vsel %vm2237_vm11, %v9196_v11, %v9197_v59 }
 0x6fa   : > { %v9210_v7 = vpop.permute.xlu0 %9209  ;;  %v9205_v38 = vpop.permute.xlu1 %9204 }
 0x6fb   : > { %v9206_v4 = vunpack.i.l.bf16 %v9205_v38  ;;  %v9207_v10 = vunpack.i.h.bf16 %v9205_v38  ;;  %v9212_v43 = vunpack.i.h.bf16 %v9210_v7  ;;  %v9211_v35 = vunpack.i.l.bf16 %v9210_v7 }
 0x6fd   : > { %v2911_v61 = vsel %vm2147_vm7, %v9206_v4, %v9186_v55  ;;  %v2933_v36 = vsel %vm2192_vm8, %v9211_v35, %v9191_v17 }
 0x6fe   : > { %v9220_v16 = vpop.permute.xlu0 %9219  ;;  %v9215_v45 = vpop.permute.xlu1 %9214 }
 0x6ff   : > { %v9222_v60 = vunpack.i.h.bf16 %v9220_v16  ;;  %v9221_v1 = vunpack.i.l.bf16 %v9220_v16  ;;  %v9217_v31 = vunpack.i.h.bf16 %v9215_v45  ;;  %v9216_v37 = vunpack.i.l.bf16 %v9215_v45 }
 0x701   : > { %v2913_v40 = vsel %vm2147_vm7, %v9207_v10, %v9221_v1  ;;  %v8374_v58 = vpack.c.bf16 %v9222_v60, %v9187_v52  ;;  %v2914_v8 = vsel %vm2147_vm7, %v9221_v1, %v9222_v60  ;;  %v2955_v38 = vsel %vm2237_vm11, %v9216_v37, %v9196_v11 }
 0x702   : > { %v9225_v9 = vpop.permute.xlu0 %9224  ;;  %v10854_v41 = vpop.permute.xlu1 %9229  ;;  %v8338_v13 = vpack.c.bf16 %v2914_v8, %v2912_v54  ;;  %v8340_v14 = vpack.c.bf16 %v2913_v40, %v2911_v61  ;;  %v2978_v40 = vsel %vm2282_vm12, %v9201_v44, %v9202_v12 }
 0x703   : > { %8375 = vmatpush1.bf16.msra.mxu0 %v8374_v58  ;;  %v9227_v33 = vunpack.i.h.bf16 %v9225_v9  ;;  %v9226_v56 = vunpack.i.l.bf16 %v9225_v9  ;;  %v9232_v47 = vunpack.i.h.bf16 %v10854_v41  ;;  %v9231_v52 = vunpack.i.l.bf16 %v10854_v41 }
 0x704   : > { %8339 = vmatprep.subr.bf16.mxu1 %v8338_v13  ;;  %8376 = vmatprep.subr.bf16.mxu0 %v12746_v3 }
 0x705   : > { %8341 = vmatpush1.bf16.msra.mxu1 %v8340_v14  ;;  %v2977_v45 = vsel %vm2282_vm12, %v9226_v56, %v9201_v44  ;;  %v3000_v17 = vsel %vm2327_vm13, %v9231_v52, %v9232_v47 }
 0x706   : > { %v9245_v51 = vpop.permute.xlu0 %9244  ;;  %v9235_v39 = vpop.permute.xlu1 %9234 }
 0x707   : > { %v9247_v42 = vunpack.i.h.bf16 %v9245_v51  ;;  %v9246_v25 = vunpack.i.l.bf16 %v9245_v51  ;;  %v9237_v20 = vunpack.i.h.bf16 %v9235_v39  ;;  %v9236_v50 = vunpack.i.l.bf16 %v9235_v39 }
 0x709   : > { %v8377_v19 = vpack.c.bf16 %v9237_v20, %v9192_v15  ;;  %v2935_v21 = vsel %vm2192_vm8, %v9212_v43, %v9236_v50  ;;  %v2936_v26 = vsel %vm2192_vm8, %v9236_v50, %v9237_v20  ;;  %v2958_v23 = vsel %vm2237_vm11, %v9246_v25, %v9247_v42 }
 0x70a   : > { %v10861_v22 = vpop.permute.xlu0 %9249  ;;  %v9240_v24 = vpop.permute.xlu1 %9239  ;;  %v8344_v30 = vpack.c.bf16 %v2935_v21, %v2933_v36  ;;  %v8342_v5 = vpack.c.bf16 %v2936_v26, %v2934_v32  ;;  %v8380_v48 = vpack.c.bf16 %v9247_v42, %v9197_v59  ;;  %v2957_v62 = vsel %vm2237_vm11, %v9217_v31, %v9246_v25 }
 0x70b   : > { %8378 = vmatpush1.bf16.msra.mxu0 %v8377_v19  ;;  %v8346_v29 = vpack.c.bf16 %v2958_v23, %v2956_v27  ;;  %v8348_v16 = vpack.c.bf16 %v2957_v62, %v2955_v38  ;;  %v9241_v10 = vunpack.i.l.bf16 %v9240_v24  ;;  %v9242_v61 = vunpack.i.h.bf16 %v9240_v24 }
 0x70c   : > { %8379 = vmatprep.subr.bf16.mxu0 %v12746_v3  ;;  %8343 = vmatprep.subr.bf16.mxu1 %v8342_v5  ;;  %v9252_v9 = vunpack.i.h.bf16 %v10861_v22  ;;  %v9251_v41 = vunpack.i.l.bf16 %v10861_v22 }
 0x70d   : > { %8345 = vmatpush1.bf16.msra.mxu1 %v8344_v30  ;;  %v2999_v43 = vsel %vm2327_vm13, %v9241_v10, %v9231_v52 }
 0x70e   : > { %v9260_v57 = vpop.permute.xlu0 %9259  ;;  %v9255_v28 = vpop.permute.xlu1 %9254  ;;  %8347 = vmatprep.subr.bf16.mxu1 %v8346_v29  ;;  %v3022_v36 = vsel %vm2372_vm14, %v9251_v41, %v9252_v9 }
 0x70f   : > { %v9262_v34 = vunpack.i.h.bf16 %v9260_v57  ;;  %v9261_v46 = vunpack.i.l.bf16 %v9260_v57  ;;  %v9257_v53 = vunpack.i.h.bf16 %v9255_v28  ;;  %v9256_v7 = vunpack.i.l.bf16 %v9255_v28  ;;  %8381 = vmatpush1.bf16.msra.mxu0 %v8380_v48 }
 0x710   : > { %8382 = vmatprep.subr.bf16.mxu0 %v12746_v3 }
 0x711   : > { %v8383_v55 = vpack.c.bf16 %v9257_v53, %v9202_v12  ;;  %v2979_v4 = vsel %vm2282_vm12, %v9227_v33, %v9256_v7  ;;  %v2980_v54 = vsel %vm2282_vm12, %v9256_v7, %v9257_v53  ;;  %8349 = vmatpush1.bf16.msra.mxu1 %v8348_v16  ;;  %v3002_v8 = vsel %vm2327_vm13, %v9261_v46, %v9262_v34 }
 0x712   : > { %v9265_v60 = vpop.permute.xlu0 %9264  ;;  %v9270_v1 = vpop.permute.xlu1 %9269  ;;  %v8352_v58 = vpack.c.bf16 %v2979_v4, %v2977_v45  ;;  %v8350_v13 = vpack.c.bf16 %v2980_v54, %v2978_v40  ;;  %v3001_v14 = vsel %vm2327_vm13, %v9242_v61, %v9261_v46  ;;  %v8386_v15 = vpack.c.bf16 %v9262_v34, %v9232_v47  ;;  %v2881_v54 = vld [vmem:[%s12718_s7] sm:$0xff]  ;;  %v2884_v61 = vld [vmem:[%s12718_s7 + $0x18] sm:$0xff]  ;;  %v2883_v40 = vld [vmem:[%s12718_s7 + $0x10] sm:$0xff] }
 0x713   : > { %8384 = vmatpush1.bf16.msra.mxu0 %v8383_v55  ;;  %v9267_v35 = vunpack.i.h.bf16 %v9265_v60  ;;  %v9266_v51 = vunpack.i.l.bf16 %v9265_v60  ;;  %v8354_v25 = vpack.c.bf16 %v3002_v8, %v3000_v17  ;;  %v9272_v19 = vunpack.i.h.bf16 %v9270_v1 }
 0x714   : > { %8385 = vmatprep.subr.bf16.mxu0 %v12746_v3  ;;  %8351 = vmatprep.subr.bf16.mxu1 %v8350_v13  ;;  %v8356_v21 = vpack.c.bf16 %v3001_v14, %v2999_v43  ;;  %v9271_v22 = vunpack.i.l.bf16 %v9270_v1  ;;  %vm3373_vm13 = vcmask 548120  }
 0x715   : > { %8353 = vmatpush1.bf16.msra.mxu1 %v8352_v58  ;;  %v3021_v30 = vsel %vm2372_vm14, %v9266_v51, %v9251_v41  ;;  %v3277_v58 = vadd.s32 8, %v10245_v63  ;;  %v10004_v41 = vmov 1.0|1.0  }
 0x716   : > { %v9285_v39 = vpop.permute.xlu0 %9284  ;;  %v9275_v42 = vpop.permute.xlu1 %9274  ;;  %8355 = vmatprep.subr.bf16.mxu1 %v8354_v25  ;;  %v3044_v28 = vsel %vm2417_vm15, %v9271_v22, %v9272_v19 }
 0x717   : > { %v9287_v20 = vunpack.i.h.bf16 %v9285_v39  ;;  %v9286_v50 = vunpack.i.l.bf16 %v9285_v39  ;;  %v9277_v59 = vunpack.i.h.bf16 %v9275_v42  ;;  %v9276_v11 = vunpack.i.l.bf16 %v9275_v42  ;;  %8387 = vmatpush1.bf16.msra.mxu0 %v8386_v15 }
 0x718   : > { %8388 = vmatprep.subr.bf16.mxu0 %v12746_v3  ;;  %v3278_v8 = vmul.u32 2, %v3277_v58 }
 0x719   : > { %v8389_v24 = vpack.c.bf16 %v9277_v59, %v9252_v9  ;;  %v3023_v26 = vsel %vm2372_vm14, %v9267_v35, %v9276_v11  ;;  %v3024_v32 = vsel %vm2372_vm14, %v9276_v11, %v9277_v59  ;;  %8357 = vmatpush1.bf16.msra.mxu1 %v8356_v21  ;;  %v3046_v48 = vsel %vm2417_vm15, %v9286_v50, %v9287_v20 }
 0x71a   : > { %v9290_v23 = vpop.permute.xlu0 %9289  ;;  %v9280_v31 = vpop.permute.xlu1 %9279  ;;  %v8358_v37 = vpack.c.bf16 %v3024_v32, %v3022_v36  ;;  %v8360_v44 = vpack.c.bf16 %v3023_v26, %v3021_v30  ;;  %v8392_v56 = vpack.c.bf16 %v9287_v20, %v9272_v19  ;;  %v8362_v46 = vpack.c.bf16 %v3046_v48, %v3044_v28 }
 0x71b   : > { %v9282_v5 = vunpack.i.h.bf16 %v9280_v31  ;;  %v9281_v12 = vunpack.i.l.bf16 %v9280_v31  ;;  %8390 = vmatpush1.bf16.msra.mxu0 %v8389_v24  ;;  %v9292_v27 = vunpack.i.h.bf16 %v9290_v23  ;;  %v9291_v33 = vunpack.i.l.bf16 %v9290_v23 }
 0x71c   : > { %8359 = vmatprep.subr.bf16.mxu1 %v8358_v37  ;;  %8391 = vmatprep.subr.bf16.mxu0 %v12746_v3  ;;  %vm3279_vm11 = vcmp.eq.s32.totalorder %v10247_v0, %v3278_v8 }
 0x71d   : > { %v3045_v62 = vsel %vm2417_vm15, %v9282_v5, %v9286_v50  ;;  %v3043_v57 = vsel %vm2417_vm15, %v9281_v12, %v9271_v22  ;;  %8361 = vmatpush1.bf16.msra.mxu1 %v8360_v44  ;;  %v3066_v55 = vsel %vm2462_vm0, %v9291_v33, %v9292_v27  ;;  %vm10916_vm12 = vmpackc.low %vm3279_vm11, %vm10251_vm10  ;;  %vm4687_vm10 = vcmask 31744  }
 0x71e   : > { %v9300_v29 = vpop.permute.xlu0 %9299  ;;  %v9295_v34 = vpop.permute.xlu1 %9294  ;;  %v8364_v53 = vpack.c.bf16 %v3045_v62, %v3043_v57  ;;  %8363 = vmatprep.subr.bf16.mxu1 %v8362_v46  ;;  %vm3471_vm15 = vcmask 1048376   ;;  %vm3770_vm11 = vcmask 679320  }
 0x71f   : > { %v9302_v7 = vunpack.i.h.bf16 %v9300_v29  ;;  %v9301_v38 = vunpack.i.l.bf16 %v9300_v29  ;;  %v9297_v47 = vunpack.i.h.bf16 %v9295_v34  ;;  %v9296_v52 = vunpack.i.l.bf16 %v9295_v34  ;;  %8393 = vmatpush1.bf16.msra.mxu0 %v8392_v56 }
 0x720   : > { %8394 = vmatprep.subr.bf16.mxu0 %v12746_v3 }
 0x721   : > { %v3065_v4 = vsel %vm2462_vm0, %v9301_v38, %v9291_v33  ;;  %v8395_v16 = vpack.c.bf16 %v9297_v47, %v9292_v27  ;;  %v3067_v45 = vsel %vm2462_vm0, %v9302_v7, %v9296_v52  ;;  %v3068_v10 = vsel %vm2462_vm0, %v9296_v52, %v9297_v47  ;;  %8365 = vmatpush1.bf16.msra.mxu1 %v8364_v53 }
 0x722   : > { %v8366_v60 = vpack.c.bf16 %v3068_v10, %v3066_v55  ;;  %v8368_v1 = vpack.c.bf16 %v3067_v45, %v3065_v4  ;;  %vm3473_vm0 = vcmask 56320  }
 0x723   : > { %8396 = vmatpush1.bf16.msra.mxu0 %v8395_v16 }
 0x724   : > { %8367 = vmatprep.subr.bf16.mxu1 %v8366_v60  ;;  %8430 = vmatprep.subr.msk.bf16.mxu0 %vm10916_vm12, %v10004_v41 }
 0x725   : > { %8369 = vmatpush1.bf16.msra.mxu1 %v8368_v1 }
 0x726   : > { %3234 = vmatmul.mubr.f32.vlgmr.msra.gmra.mrb[20].mxu0 %v2881_v54  ;;  %8398 = vmatprep.subr.msk.bf16.mxu1 %vm10916_vm12, %v10004_v41 }
 0x727   : > { %7633 = vmatprep.mubr.msk.f32.mxu0 %vm3085_vm6, %v2884_v61  ;;  %8432 = vmatpush3.bf16.msk.msra.mxu0 %vm10916_vm12, %v10004_v41 }
 0x728   : > { %3157 = vmatmul.mubr.f32.vlgmr.msra.gmra.mrb[34].mxu1 %v2881_v54  ;;  %8438 = vmatprep.subr.msk.bf16.mxu0 %vm10916_vm12, %v10004_v41 }
 0x729   : > { %7631 = vmatprep.mubr.msk.f32.mxu1 %vm3085_vm6, %v2884_v61  ;;  %8400 = vmatpush3.bf16.msk.msra.mxu1 %vm10916_vm12, %v10004_v41 }
 0x72a   : > { %3239 = vmatmul.mubr.f32.gmra.mrb[22].mxu0 %v2883_v40  ;;  %8402 = vmatprep.subr.msk.bf16.mxu1 %vm10916_vm12, %v10004_v41 }
 0x72c   : > { %3163 = vmatmul.mubr.f32.gmra.mrb[36].mxu1 %v2883_v40 }
 0x72f   : > { %v3078_v0 = vpop.permute.xlu1 %3077  ;;  %v3083_v15 = vpop.permute.xlu0 %3082 }
 0x7f9   : > { %v3235_v2 = vpop.f32.mrb[20].mxu0 }
 0x7fa   : > { %v3236_v13 = vadd.f32 %v3235_v2, %v3078_v0  ;;  %v3237_v14 = vpop.f32.mrb[21].mxu0 }
 0x7fb   : > { %v3158_v43 = vpop.f32.mrb[34].mxu1 }
 0x7fc   : > { %v3246_v17 = vmax.f32 %v3236_v13, 0.0  ;;  %v3159_v51 = vadd.f32 %v3158_v43, %v3078_v0  ;;  %v3160_v39 = vpop.f32.mrb[35].mxu1 }
 0x7fd   : > { %v3240_v35 = vpop.f32.mrb[22].mxu0  ;;  %v3161_v20 = vadd.f32 %v3160_v39, %v3078_v0 }
 0x7fe   : > { %3252 = vst.msk [vmem:[#allocation5 + $0x10] sm:$0xff] %vm840_vm9, %v3246_v17  ;;  %v3241_v42 = vadd.f32 %v3240_v35, %v3083_v15  ;;  %v3242_v25 = vpop.f32.mrb[23].mxu0  ;;  %v3244_v50 = vmax.f32 %v3159_v51, 0.0 }
 0x7ff   : > { %v3245_v11 = vmax.f32 %v3161_v20, 0.0  ;;  %v3164_v19 = vpop.f32.mrb[36].mxu1 }
 0x800   : > { %v3249_v59 = vmax.f32 %v3241_v42, 0.0  ;;  %3250 = vst [vmem:[#allocation5] sm:$0xff] %v3244_v50  ;;  %v3165_v21 = vadd.f32 %v3164_v19, %v3083_v15  ;;  %v3166_v36 = vpop.f32.mrb[37].mxu1  ;;  %3380 = vrot.lane.b32.xlu1 %v3244_v50, %s9999_s23  ;;  %8032 = vmatprep.mubr.msk.f32.mxu1 %vm3085_vm6, %v3244_v50 }
 0x801   : > { %v3167_v22 = vadd.f32 %v3166_v36, %v3083_v15 }
 0x802   : > { %3255 = vst.msk [vmem:[#allocation5 + $0x28] sm:$0xff] %vm840_vm9, %v3249_v59  ;;  %v3247_v24 = vmax.f32 %v3165_v21, 0.0  ;;  %vm3988_vm9 = vcmask 15360  }
 0x803   : > { %v3248_v26 = vmax.f32 %v3167_v22, 0.0 }
 0x804   : > { %3253 = vst [vmem:[#allocation5 + $0x18] sm:$0xff] %v3247_v24  ;;  %3382 = vrot.lane.b32.xlu0 %v3247_v24, %s9999_s23  ;;  %3481 = vrot.lane.b32.xlu1 %v3244_v50, %s12767_s29  ;;  %s10007_s23 = smov 38  }
 0x805   : > { %8033 = vmatmul.mubr.msk.f32.vlgmr.msra.gmra.mrb[38].mxu1 %vm3085_vm6, %v3247_v24  ;;  %v4672_v32 = vld [vmem:[#allocation5 + $0x10] sm:$0xff] }
 0x806   : > { %8404 = vmatpush3.bf16.msk.msra.mxu1 %vm10916_vm12, %v10004_v41 }
 0x807   : > { %8406 = vmatprep.subr.msk.bf16.mxu1 %vm10916_vm12, %v10004_v41 }
 0x808   : > { %3483 = vrot.lane.b32.xlu0 %v3247_v24, %s12767_s29  ;;  %3579 = vrot.lane.b32.xlu1 %v3244_v50, %s10005_s21 }
 0x809   : > { %v4674_v30 = vld [vmem:[#allocation5 + $0x28] sm:$0xff] }
 0x80c   : > { %3581 = vrot.lane.b32.xlu0 %v3247_v24, %s10005_s21  ;;  %3679 = vrot.lane.b32.xlu1 %v3244_v50, %s10006_s17  ;;  %s12770_s21 = smov 58  }
 0x810   : > { %3681 = vrot.lane.b32.xlu0 %v3247_v24, %s10006_s17  ;;  %3777 = vrot.lane.b32.xlu1 %v3244_v50, %s10007_s23  ;;  %s10013_s17 = smov 40  }
 0x814   : > { %3779 = vrot.lane.b32.xlu0 %v3247_v24, %s10007_s23  ;;  %3878 = vrot.lane.b32.xlu1 %v3244_v50, %s10008_s25  ;;  %s10014_s23 = smov 22  }
 0x818   : > { %3982 = vrot.lane.b32.xlu0 %v3245_v11, %s10009_s26  ;;  %3980 = vrot.lane.b32.xlu1 %v3244_v50, %s10009_s26 }
 0x81c   : > { %3880 = vrot.lane.b32.xlu0 %v3247_v24, %s10008_s25  ;;  %4087 = vrot.lane.b32.xlu1 %v3245_v11, %s10010_s22  ;;  %s10015_s25 = smov 4  }
 0x820   : > { %3986 = vrot.lane.b32.xlu0 %v3248_v26, %s10009_s26  ;;  %4185 = vrot.lane.b32.xlu1 %v3245_v11, %s10011_s30 }
 0x824   : > { %4089 = vrot.lane.b32.xlu0 %v3248_v26, %s10010_s22  ;;  %3984 = vrot.lane.b32.xlu1 %v3247_v24, %s10009_s26  ;;  %s10016_s26 = smov 114   ;;  %s12771_s22 = smov 35  }
 0x828   : > { %4187 = vrot.lane.b32.xlu0 %v3248_v26, %s10011_s30  ;;  %4283 = vrot.lane.b32.xlu1 %v3245_v11, %s10012_s20 }
 0x82c   : > { %4285 = vrot.lane.b32.xlu0 %v3248_v26, %s10012_s20  ;;  %4381 = vrot.lane.b32.xlu1 %v3245_v11, %s12770_s21  ;;  %s10017_s20 = smov 103  }
 0x830   : > { %4383 = vrot.lane.b32.xlu0 %v3248_v26, %s12770_s21  ;;  %4479 = vrot.lane.b32.xlu1 %v3245_v11, %s10013_s17 }
 0x834   : > { %4481 = vrot.lane.b32.xlu0 %v3248_v26, %s10013_s17  ;;  %4577 = vrot.lane.b32.xlu1 %v3245_v11, %s10014_s23  ;;  %s10018_s17 = smov 67  }
 0x838   : > { %4681 = vrot.lane.b32.xlu0 %v4672_v32, %s10015_s25  ;;  %4679 = vrot.lane.b32.xlu1 %v3245_v11, %s10015_s25 }
 0x83c   : > { %4685 = vrot.lane.b32.xlu0 %v4674_v30, %s10015_s25  ;;  %4683 = vrot.lane.b32.xlu1 %v3248_v26, %s10015_s25  ;;  %s10020_s25 = smov 75  }
 0x840   : > { %4579 = vrot.lane.b32.xlu0 %v3248_v26, %s10014_s23  ;;  %4784 = vrot.lane.b32.xlu1 %v4672_v32, %s10016_s26  ;;  %s10019_s23 = smov 43  }
 0x844   : > { %4786 = vrot.lane.b32.xlu0 %v4674_v30, %s10016_s26  ;;  %s10021_s26 = smov 111  }
 0x872   : > { %v3381_v23 = vpop.permute.xlu1 %3380 }
 0x873   : > { %8039 = vmatprep.mubr.msk.f32.mxu1 %vm3085_vm6, %v3381_v23 }
 0x876   : > { %v3383_v31 = vpop.permute.xlu0 %3382  ;;  %v3482_v37 = vpop.permute.xlu1 %3481 }
 0x877   : > { %8040 = vmatmul.mubr.msk.f32.vlgmr.msra.gmra.mrb[40].mxu1 %vm3085_vm6, %v3383_v31 }
 0x878   : > { %8408 = vmatpush3.bf16.msk.msra.mxu1 %vm10916_vm12, %v10004_v41  ;;  %8046 = vmatprep.mubr.msk.f32.mxu1 %vm3085_vm6, %v3482_v37 }
 0x879   : > { %8410 = vmatprep.subr.msk.bf16.mxu1 %vm10916_vm12, %v10004_v41 }
 0x87a   : > { %v3484_v5 = vpop.permute.xlu0 %3483  ;;  %v3580_v12 = vpop.permute.xlu1 %3579 }
 0x87b   : > { %8047 = vmatmul.mubr.msk.f32.vlgmr.msra.gmra.mrb[42].mxu1 %vm3085_vm6, %v3484_v5 }
 0x87c   : > { %8412 = vmatpush3.bf16.msk.msra.mxu1 %vm10916_vm12, %v10004_v41  ;;  %8053 = vmatprep.mubr.msk.f32.mxu1 %vm3085_vm6, %v3580_v12 }
 0x87d   : > { %8414 = vmatprep.subr.msk.bf16.mxu1 %vm10916_vm12, %v10004_v41 }
 0x87e   : > { %v3582_v44 = vpop.permute.xlu0 %3581  ;;  %v3680_v48 = vpop.permute.xlu1 %3679 }
 0x87f   : > { %8054 = vmatmul.mubr.msk.f32.vlgmr.msra.gmra.mrb[44].mxu1 %vm3085_vm6, %v3582_v44 }
 0x880   : > { %8416 = vmatpush3.bf16.msk.msra.mxu1 %vm10916_vm12, %v10004_v41  ;;  %8060 = vmatprep.mubr.msk.f32.mxu1 %vm3085_vm6, %v3680_v48 }
 0x881   : > { %8418 = vmatprep.subr.msk.bf16.mxu1 %vm10916_vm12, %v10004_v41 }
 0x882   : > { %v3682_v27 = vpop.permute.xlu0 %3681  ;;  %v3778_v33 = vpop.permute.xlu1 %3777 }
 0x883   : > { %8061 = vmatmul.mubr.msk.f32.vlgmr.msra.gmra.mrb[46].mxu1 %vm3085_vm6, %v3682_v27 }
 0x884   : > { %8420 = vmatpush3.bf16.msk.msra.mxu1 %vm10916_vm12, %v10004_v41  ;;  %8067 = vmatprep.mubr.msk.f32.mxu1 %vm3085_vm6, %v3778_v33 }
 0x885   : > { %8422 = vmatprep.subr.msk.bf16.mxu1 %vm10916_vm12, %v10004_v41 }
 0x886   : > { %v3780_v56 = vpop.permute.xlu0 %3779  ;;  %v3879_v62 = vpop.permute.xlu1 %3878 }
 0x887   : > { %8068 = vmatmul.mubr.msk.f32.vlgmr.msra.gmra.mrb[48].mxu1 %vm3085_vm6, %v3780_v56 }
 0x888   : > { %8074 = vmatprep.mubr.msk.f32.mxu1 %vm3085_vm6, %v3879_v62  ;;  %8424 = vmatpush3.bf16.msk.msra.mxu1 %vm10916_vm12, %v10004_v41 }
 0x889   : > { %8426 = vmatprep.subr.msk.bf16.mxu1 %vm10916_vm12, %v10004_v41 }
 0x88a   : > { %v3983_v57 = vpop.permute.xlu0 %3982  ;;  %v3981_v28 = vpop.permute.xlu1 %3980 }
 0x88b   : > { %v3989_v46 = vsel %vm3988_vm9, %v3981_v28, %v3983_v57 }
 0x88e   : > { %v3881_v29 = vpop.permute.xlu0 %3880  ;;  %v4088_v34 = vpop.permute.xlu1 %4087 }
 0x88f   : > { %8075 = vmatmul.mubr.msk.f32.vlgmr.msra.gmra.mrb[50].mxu1 %vm3085_vm6, %v3881_v29  ;;  %8088 = vmatprep.mubr.msk.f32.mxu0 %vm3085_vm6, %v4088_v34 }
 0x890   : > { %8081 = vmatprep.mubr.msk.f32.mxu1 %vm3085_vm6, %v3989_v46  ;;  %8428 = vmatpush3.bf16.msk.msra.mxu1 %vm10916_vm12, %v10004_v41 }
 0x891   : > { %8434 = vmatprep.subr.msk.bf16.mxu1 %vm10916_vm12, %v10004_v41 }
 0x892   : > { %v3987_v53 = vpop.permute.xlu0 %3986  ;;  %v4186_v7 = vpop.permute.xlu1 %4185 }
 0x896   : > { %v4090_v38 = vpop.permute.xlu0 %4089  ;;  %v3985_v47 = vpop.permute.xlu1 %3984 }
 0x897   : > { %v3990_v52 = vsel %vm3988_vm9, %v3985_v47, %v3987_v53  ;;  %8089 = vmatmul.mubr.msk.f32.vlgmr.msra.gmra.mrb[24].mxu0 %vm3085_vm6, %v4090_v38  ;;  %v11070_v53 = vld [vmem:[#allocation4 + $0x10] sm:$0xff]  ;;  %vm3969_vm9 = vcmask 744920  }
 0x898   : > { %8082 = vmatmul.mubr.msk.f32.vlgmr.msra.gmra.mrb[52].mxu1 %vm3085_vm6, %v3990_v52  ;;  %8440 = vmatpush3.bf16.msk.msra.mxu0 %vm10916_vm12, %v10004_v41  ;;  %3266 = vst.msk [vmem:[#allocation4 + $0x48] sm:$0xff] %vm3265_vm4, %v11070_v53  ;;  %3276 = vst.msk [vmem:[#allocation4 + $0x98] sm:$0xff] %vm3265_vm4, %v11070_v53 }
 0x899   : > { %8436 = vmatpush3.bf16.msk.msra.mxu1 %vm10916_vm12, %v10004_v41  ;;  %8095 = vmatprep.mubr.msk.f32.mxu1 %vm3085_vm6, %v4186_v7 }
 0x89a   : > { %v4188_v55 = vpop.permute.xlu0 %4187  ;;  %v4284_v4 = vpop.permute.xlu1 %4283  ;;  %8442 = vmatprep.subr.msk.bf16.mxu1 %vm10916_vm12, %v10004_v41  ;;  %8446 = vmatprep.subr.msk.bf16.mxu0 %vm10916_vm12, %v10004_v41 }
 0x89b   : > { %8102 = vmatprep.mubr.msk.f32.mxu0 %vm3085_vm6, %v4284_v4 }
 0x89c   : > { %8096 = vmatmul.mubr.msk.f32.vlgmr.msra.gmra.mrb[54].mxu1 %vm3085_vm6, %v4188_v55 }
 0x89d   : > { %8444 = vmatpush3.bf16.msk.msra.mxu1 %vm10916_vm12, %v10004_v41 }
 0x89e   : > { %v4286_v16 = vpop.permute.xlu0 %4285  ;;  %v4382_v45 = vpop.permute.xlu1 %4381  ;;  %8450 = vmatprep.subr.msk.bf16.mxu1 %vm10916_vm12, %v10004_v41 }
 0x89f   : > { %8103 = vmatmul.mubr.msk.f32.vlgmr.msra.gmra.mrb[26].mxu0 %vm3085_vm6, %v4286_v16  ;;  %8109 = vmatprep.mubr.msk.f32.mxu1 %vm3085_vm6, %v4382_v45 }
 0x8a0   : > { %8448 = vmatpush3.bf16.msk.msra.mxu0 %vm10916_vm12, %v10004_v41 }
 0x8a1   : > { %8454 = vmatprep.subr.msk.bf16.mxu0 %vm10916_vm12, %v10004_v41 }
 0x8a2   : > { %v4384_v10 = vpop.permute.xlu0 %4383  ;;  %v4480_v60 = vpop.permute.xlu1 %4479 }
 0x8a3   : > { %8110 = vmatmul.mubr.msk.f32.vlgmr.msra.gmra.mrb[56].mxu1 %vm3085_vm6, %v4384_v10  ;;  %8116 = vmatprep.mubr.msk.f32.mxu0 %vm3085_vm6, %v4480_v60  ;;  %v4899_v10 = vld [vmem:[#allocation4 + $0x48] sm:$0xff]  ;;  %v4900_v60 = vld [vmem:[#allocation4 + $0x98] sm:$0xff] }
 0x8a4   : > { %8452 = vmatpush3.bf16.msk.msra.mxu1 %vm10916_vm12, %v10004_v41  ;;  %5896 = vst.msk [vmem:[#allocation4 + $0x98] sm:$0xff] %vm3265_vm4, %v11070_v53  ;;  %5886 = vst.msk [vmem:[#allocation4 + $0x48] sm:$0xff] %vm3265_vm4, %v11070_v53 }
 0x8a5   : > { %8458 = vmatprep.subr.msk.bf16.mxu1 %vm10916_vm12, %v10004_v41  ;;  %6713 = vst.msk [vmem:[#allocation4 + $0x98] sm:$0xff] %vm3265_vm4, %v11070_v53 }
 0x8a6   : > { %v4482_v1 = vpop.permute.xlu0 %4481  ;;  %v4578_v54 = vpop.permute.xlu1 %4577 }
 0x8a7   : > { %8117 = vmatmul.mubr.msk.f32.vlgmr.msra.gmra.mrb[28].mxu0 %vm3085_vm6, %v4482_v1  ;;  %8123 = vmatprep.mubr.msk.f32.mxu1 %vm3085_vm6, %v4578_v54  ;;  %v11094_v54 = vpack.i.bf16 %v4900_v60, %v4899_v10 }
 0x8a8   : > { %8456 = vmatpush3.bf16.msk.msra.mxu0 %vm10916_vm12, %v10004_v41 }
 0x8aa   : > { %v4682_v61 = vpop.permute.xlu0 %4681  ;;  %v4680_v40 = vpop.permute.xlu1 %4679 }
 0x8ab   : > { %v4688_v58 = vsel %vm4687_vm10, %v4680_v40, %v4682_v61 }
 0x8ac   : > { %8130 = vmatprep.mubr.msk.f32.mxu0 %vm3085_vm6, %v4688_v58 }
 0x8ae   : > { %v4686_v8 = vpop.permute.xlu0 %4685  ;;  %v4684_v0 = vpop.permute.xlu1 %4683 }
 0x8af   : > { %v4689_v2 = vsel %vm4687_vm10, %v4684_v0, %v4686_v8  ;;  %vm4079_vm10 = vcmask 252928  }
 0x8b0   : > { %8131 = vmatmul.mubr.msk.f32.vlgmr.msra.gmra.mrb[30].mxu0 %vm3085_vm6, %v4689_v2 }
 0x8b2   : > { %v4580_v13 = vpop.permute.xlu0 %4579  ;;  %v4785_v14 = vpop.permute.xlu1 %4784 }
 0x8b3   : > { %8124 = vmatmul.mubr.msk.f32.vlgmr.msra.gmra.mrb[58].mxu1 %vm3085_vm6, %v4580_v13 }
 0x8b4   : > { %8460 = vmatpush3.bf16.msk.msra.mxu1 %vm10916_vm12, %v10004_v41  ;;  %8137 = vmatprep.mubr.msk.f32.mxu1 %vm3085_vm6, %v4785_v14  ;;  %vm3870_vm12 = vcmask 187392  }
 0x8b6   : > { %v4787_v15 = vpop.permute.xlu0 %4786 }
 0x8b7   : > { %8138 = vmatmul.mubr.msk.f32.vlgmr.msra.gmra.mrb[60].mxu1 %vm3085_vm6, %v4787_v15 }
 0x8d8   : > { %v8034_v17 = vpop.f32.mrb[38].mxu1 }
 0x8d9   : > { %3369 = vrot.lane.b32.xlu0 %v8034_v17, %s12771_s22  ;;  %v3356_v43 = vpop.f32.mrb[39].mxu1 }
 0x8da   : > { %3367 = vrot.lane.b32.xlu1 %v3356_v43, %s12771_s22 }
 0x94a   : > { %v8041_v35 = vpop.f32.mrb[40].mxu1 }
 0x94b   : > { %v3370_v51 = vpop.permute.xlu0 %3369  ;;  %3467 = vrot.lane.b32.xlu0 %v8041_v35, %s10017_s20  ;;  %v3454_v39 = vpop.f32.mrb[41].mxu1 }
 0x94c   : > { %3375 = vst.msk [vmem:[#allocation4 + $0x50] sm:$0xff] %vm3373_vm13, %v3370_v51  ;;  %v3368_v9 = vpop.permute.xlu1 %3367  ;;  %3465 = vrot.lane.b32.xlu1 %v3454_v39, %s10017_s20  ;;  %s10022_s20 = smov 83  }
 0x94d   : > { %3374 = vst.msk [vmem:[#allocation4] sm:$0xff] %vm3373_vm13, %v3368_v9  ;;  %vm4178_vm13 = vcmask 810520  }
 0x94e   : > { %v8048_v41 = vpop.f32.mrb[42].mxu1 }
 0x94f   : > { %v3555_v42 = vpop.f32.mrb[43].mxu1 }
 0x952   : > { %v8055_v25 = vpop.f32.mrb[44].mxu1 }
 0x953   : > { %v3653_v20 = vpop.f32.mrb[45].mxu1 }
 0x956   : > { %v8062_v50 = vpop.f32.mrb[46].mxu1 }
 0x957   : > { %v3753_v59 = vpop.f32.mrb[47].mxu1 }
 0x95a   : > { %v8069_v11 = vpop.f32.mrb[48].mxu1 }
 0x95b   : > { %v3851_v19 = vpop.f32.mrb[49].mxu1 }
 0x962   : > { %v8076_v21 = vpop.f32.mrb[50].mxu1 }
 0x963   : > { %v3952_v36 = vpop.f32.mrb[51].mxu1 }
 0x96a   : > { %v8090_v22 = vpop.f32.mrb[24].mxu0 }
 0x96b   : > { %v4161_v24 = vpop.f32.mrb[25].mxu0  ;;  %4174 = vrot.lane.b32.xlu0 %v8090_v22, %s10018_s17  ;;  %v8083_v26 = vpop.f32.mrb[52].mxu1 }
 0x96c   : > { %4172 = vrot.lane.b32.xlu1 %v4161_v24, %s10018_s17  ;;  %v4061_v32 = vpop.f32.mrb[53].mxu1  ;;  %s10023_s17 = smov 51  }
 0x96f   : > { %3568 = vrot.lane.b32.xlu0 %v8048_v41, %s10019_s23  ;;  %v8097_v30 = vpop.f32.mrb[54].mxu1 }
 0x970   : > { %3566 = vrot.lane.b32.xlu1 %v3555_v42, %s10019_s23  ;;  %v4259_v23 = vpop.f32.mrb[55].mxu1  ;;  %s10024_s23 = smov 119  }
 0x972   : > { %v8104_v31 = vpop.f32.mrb[26].mxu0 }
 0x973   : > { %v4357_v37 = vpop.f32.mrb[27].mxu0  ;;  %4370 = vrot.lane.b32.xlu0 %v8104_v31, %s10020_s25 }
 0x974   : > { %4368 = vrot.lane.b32.xlu1 %v4357_v37, %s10020_s25  ;;  %s10025_s25 = smov 59  }
 0x976   : > { %v8111_v5 = vpop.f32.mrb[56].mxu1 }
 0x977   : > { %3666 = vrot.lane.b32.xlu0 %v8055_v25, %s10021_s26  ;;  %v4455_v12 = vpop.f32.mrb[57].mxu1 }
 0x978   : > { %3664 = vrot.lane.b32.xlu1 %v3653_v20, %s10021_s26  ;;  %s10026_s26 = smov 7  }
 0x97a   : > { %v8118_v44 = vpop.f32.mrb[28].mxu0 }
 0x97b   : > { %v4553_v48 = vpop.f32.mrb[29].mxu0  ;;  %4566 = vrot.lane.b32.xlu0 %v8118_v44, %s10022_s20 }
 0x97c   : > { %4564 = vrot.lane.b32.xlu1 %v4553_v48, %s10022_s20  ;;  %s10027_s20 = smov 31  }
 0x97f   : > { %3766 = vrot.lane.b32.xlu0 %v8062_v50, %s10023_s17 }
 0x980   : > { %3764 = vrot.lane.b32.xlu1 %v3753_v59, %s10023_s17  ;;  %s10029_s17 = smov 60  }
 0x983   : > { %v8132_v27 = vpop.f32.mrb[30].mxu0 }
 0x984   : > { %v4760_v33 = vpop.f32.mrb[31].mxu0  ;;  %4773 = vrot.lane.b32.xlu1 %v8132_v27, %s9997_s28 }
 0x985   : > { %4771 = vrot.lane.b32.xlu0 %v4760_v33, %s9997_s28  ;;  %s12772_s28 = smov 23  }
 0x986   : > { %v8125_v56 = vpop.f32.mrb[58].mxu1 }
 0x987   : > { %v4651_v62 = vpop.f32.mrb[59].mxu1 }
 0x988   : > { %3862 = vrot.lane.b32.xlu1 %v3851_v19, %s10024_s23 }
 0x989   : > { %3864 = vrot.lane.b32.xlu0 %v8069_v11, %s10024_s23 }
 0x98a   : > { %v8139_v57 = vpop.f32.mrb[60].mxu1 }
 0x98b   : > { %v4858_v28 = vpop.f32.mrb[61].mxu1 }
 0x98c   : > { %3963 = vrot.lane.b32.xlu1 %v3952_v36, %s10025_s25 }
 0x98d   : > { %3965 = vrot.lane.b32.xlu0 %v8076_v21, %s10025_s25 }
 0x990   : > { %4072 = vrot.lane.b32.xlu1 %v4061_v32, %s12764_s24 }
 0x991   : > { %4074 = vrot.lane.b32.xlu0 %v8083_v26, %s12764_s24 }
 0x994   : > { %4270 = vrot.lane.b32.xlu1 %v4259_v23, %s10026_s26 }
 0x995   : > { %4272 = vrot.lane.b32.xlu0 %v8097_v30, %s10026_s26 }
 0x998   : > { %4466 = vrot.lane.b32.xlu1 %v4455_v12, %s12765_s27 }
 0x999   : > { %4468 = vrot.lane.b32.xlu0 %v8111_v5, %s12765_s27  ;;  %s10028_s27 = smov 93  }
 0x99c   : > { %4664 = vrot.lane.b32.xlu1 %v8125_v56, %s12772_s28 }
 0x99d   : > { %4662 = vrot.lane.b32.xlu0 %v4651_v62, %s12772_s28 }
 0x9a0   : > { %4871 = vrot.lane.b32.xlu1 %v8139_v57, %s10027_s20 }
 0x9a1   : > { %4869 = vrot.lane.b32.xlu0 %v4858_v28, %s10027_s20 }
 0x9bd   : > { %v3468_v29 = vpop.permute.xlu0 %3467 }
 0x9be   : > { %3475 = vst.msk [vmem:[#allocation4 + $0x50] sm:$0xff] %vm3471_vm15, %v3468_v29  ;;  %v3466_v34 = vpop.permute.xlu1 %3465 }
 0x9bf   : > { %3476 = vst.msk [vmem:[#allocation4 + $0x58] sm:$0xff] %vm3473_vm0, %v3468_v29  ;;  %3474 = vst.msk [vmem:[#allocation4 + $0x8] sm:$0xff] %vm3473_vm0, %v3466_v34  ;;  %vm4374_vm0 = vcmask 876120  }
 0x9c0   : > { %3472 = vst.msk [vmem:[#allocation4] sm:$0xff] %vm3471_vm15, %v3466_v34  ;;  %vm4276_vm15 = vcmask 318520  }
 0x9c5   : > { %v4890_v46 = vld [vmem:[#allocation4 + $0x50] sm:$0xff] }
 0x9c6   : > { %6704 = vst [vmem:[#allocation4 + $0x50] sm:$0xff] %v11070_v53 }
 0x9c7   : > { %v4881_v7 = vld [vmem:[#allocation4] sm:$0xff] }
 0x9c8   : > { %v9303_v38 = vpack.i.bf16 %v4890_v46, %v4881_v7  ;;  %5877 = vst [vmem:[#allocation4] sm:$0xff] %v11070_v53  ;;  %v8463_v15 = vpack.c.bf16 %v4890_v46, %v4881_v7  ;;  %v11183_v46 = vld [vmem:[%s12720_s9 + $0x8] sm:$0xff] }
 0x9c9   : > { %7699 = vmatprep.mubr.msk.f32.mxu0 %vm3085_vm6, %v11183_v46  ;;  %7700 = vmatprep.mubr.msk.f32.mxu1 %vm3085_vm6, %v11183_v46 }
 0x9ca   : > { %9304 = vrot.lane.b32.xlu1 %v9303_v38, %s12764_s24  ;;  %9309 = vrot.lane.b32.xlu0 %v9303_v38, %s12766_s16 }
 0x9ce   : > { %9314 = vrot.lane.b32.xlu1 %v9303_v38, %s10011_s30  ;;  %9319 = vrot.lane.b32.xlu0 %v9303_v38, %s10028_s27 }
 0x9d2   : > { %9324 = vrot.lane.b32.xlu1 %v9303_v38, %s12767_s29  ;;  %9329 = vrot.lane.b32.xlu0 %v9303_v38, %s10029_s17 }
 0x9d6   : > { %9334 = vrot.lane.b32.xlu1 %v9303_v38, %s10025_s25  ;;  %9339 = vrot.lane.b32.xlu0 %v9303_v38, %s12770_s21 }
 0x9dd   : > { %v11082_v47 = vpop.permute.xlu0 %4174 }
 0x9de   : > { %v4173_v52 = vpop.permute.xlu1 %4172 }
 0x9e1   : > { %v3569_v55 = vpop.permute.xlu0 %3568 }
 0x9e2   : > { %3574 = vst.msk [vmem:[#allocation4 + $0x58] sm:$0xff] %vm3572_vm3, %v3569_v55  ;;  %v3567_v4 = vpop.permute.xlu1 %3566 }
 0x9e3   : > { %3573 = vst.msk [vmem:[#allocation4 + $0x8] sm:$0xff] %vm3572_vm3, %v3567_v4  ;;  %vm4472_vm3 = vcmask 384120  }
 0x9e5   : > { %v11088_v16 = vpop.permute.xlu0 %4370 }
 0x9e6   : > { %v11090_v45 = vpop.permute.xlu1 %4368 }
 0x9e9   : > { %v3667_v1 = vpop.permute.xlu0 %3666 }
 0x9ea   : > { %3673 = vst.msk [vmem:[#allocation4 + $0x58] sm:$0xff] %vm3670_vm5, %v3667_v1  ;;  %v3665_v61 = vpop.permute.xlu1 %3664 }
 0x9eb   : > { %3674 = vst.msk [vmem:[#allocation4 + $0x60] sm:$0xff] %vm1563_vm2, %v3667_v1  ;;  %3672 = vst.msk [vmem:[#allocation4 + $0x10] sm:$0xff] %vm1563_vm2, %v3665_v61  ;;  %vm3868_vm2 = vcmask 1048504  }
 0x9ec   : > { %3671 = vst.msk [vmem:[#allocation4 + $0x8] sm:$0xff] %vm3670_vm5, %v3665_v61  ;;  %vm4668_vm5 = vcmask 449720  }
 0x9ed   : > { %v11102_v40 = vpop.permute.xlu0 %4566 }
 0x9ee   : > { %v11104_v58 = vpop.permute.xlu1 %4564 }
 0x9f1   : > { %v4891_v8 = vld [vmem:[#allocation4 + $0x58] sm:$0xff]  ;;  %v3767_v0 = vpop.permute.xlu0 %3766 }
 0x9f2   : > { %6705 = vst [vmem:[#allocation4 + $0x58] sm:$0xff] %v11070_v53  ;;  %3772 = vst.msk [vmem:[#allocation4 + $0x60] sm:$0xff] %vm3770_vm11, %v3767_v0  ;;  %v3765_v2 = vpop.permute.xlu1 %3764 }
 0x9f3   : > { %v11107_v13 = vld [vmem:[#allocation4 + $0x8] sm:$0xff]  ;;  %3771 = vst.msk [vmem:[#allocation4 + $0x10] sm:$0xff] %vm3770_vm11, %v3765_v2  ;;  %vm4777_vm11 = vcmask 1007320  }
 0x9f4   : > { %v8461_v14 = vpack.c.bf16 %v4891_v8, %v11107_v13 }
 0x9f6   : > { %8462 = vmatprep.subr.bf16.mxu0 %v8461_v14  ;;  %v11110_v17 = vpop.permute.xlu1 %4773 }
 0x9f7   : > { %8464 = vmatpush1.bf16.msra.mxu0 %v8463_v15  ;;  %v11112_v43 = vpop.permute.xlu0 %4771 }
 0x9fa   : > { %v3863_v35 = vpop.permute.xlu1 %3862 }
 0x9fb   : > { %3869 = vst.msk [vmem:[#allocation4 + $0x10] sm:$0xff] %vm3868_vm2, %v3863_v35  ;;  %v3865_v51 = vpop.permute.xlu0 %3864 }
 0x9fc   : > { %3871 = vst.msk [vmem:[#allocation4 + $0x18] sm:$0xff] %vm3870_vm12, %v3863_v35  ;;  %3873 = vst.msk [vmem:[#allocation4 + $0x68] sm:$0xff] %vm3870_vm12, %v3865_v51  ;;  %vm5166_vm12 = vcmask 760832  }
 0x9fd   : > { %3872 = vst.msk [vmem:[#allocation4 + $0x60] sm:$0xff] %vm3868_vm2, %v3865_v51  ;;  %vm4875_vm2 = vcmask 515320  }
 0x9fe   : > { %v3964_v39 = vpop.permute.xlu1 %3963 }
 0x9ff   : > { %3970 = vst.msk [vmem:[#allocation4 + $0x18] sm:$0xff] %vm3969_vm9, %v3964_v39  ;;  %v3966_v9 = vpop.permute.xlu0 %3965 }
 0xa00   : > { %3971 = vst.msk [vmem:[#allocation4 + $0x68] sm:$0xff] %vm3969_vm9, %v3966_v9  ;;  %vm5095_vm9 = vcmask 769024  }
 0xa02   : > { %v4073_v41 = vpop.permute.xlu1 %4072  ;;  %v4883_v21 = vld [vmem:[#allocation4 + $0x10] sm:$0xff] }
 0xa03   : > { %4078 = vst.msk [vmem:[#allocation4 + $0x18] sm:$0xff] %vm1561_vm1, %v4073_v41  ;;  %v4075_v25 = vpop.permute.xlu0 %4074  ;;  %v9383_v44 = vpack.i.bf16 %v4883_v21, %v11107_v13 }
 0xa04   : > { %v4892_v42 = vld [vmem:[#allocation4 + $0x60] sm:$0xff]  ;;  %4080 = vst.msk [vmem:[#allocation4 + $0x20] sm:$0xff] %vm4079_vm10, %v4073_v41  ;;  %4082 = vst.msk [vmem:[#allocation4 + $0x70] sm:$0xff] %vm4079_vm10, %v4075_v25  ;;  %vm5313_vm10 = vcmask 490496  }
 0xa05   : > { %6706 = vst [vmem:[#allocation4 + $0x60] sm:$0xff] %v11070_v53  ;;  %4179 = vst.msk [vmem:[#allocation4 + $0x20] sm:$0xff] %vm4178_vm13, %v4173_v52  ;;  %v9348_v20 = vpack.i.bf16 %v4892_v42, %v4891_v8  ;;  %v8499_v32 = vpack.c.bf16 %v4892_v42, %v4883_v21 }
 0xa06   : > { %4081 = vst.msk [vmem:[#allocation4 + $0x68] sm:$0xff] %vm1561_vm1, %v4075_v25  ;;  %v4271_v50 = vpop.permute.xlu1 %4270  ;;  %vm4570_vm1 = vcmask 941720  }
 0xa07   : > { %4180 = vst.msk [vmem:[#allocation4 + $0x70] sm:$0xff] %vm4178_vm13, %v11082_v47  ;;  %9349 = vrot.lane.b32.xlu1 %v9348_v20, %s12766_s16  ;;  %9344 = vrot.lane.b32.xlu0 %v9348_v20, %s12764_s24  ;;  %v4273_v59 = vpop.permute.xlu0 %4272  ;;  %vm5467_vm13 = vcmask 474112  }
 0xa08   : > { %4277 = vst.msk [vmem:[#allocation4 + $0x28] sm:$0xff] %vm4276_vm15, %v4271_v50  ;;  %4278 = vst.msk [vmem:[#allocation4 + $0x78] sm:$0xff] %vm4276_vm15, %v4273_v59  ;;  %vm5390_vm15 = vcmask 482304  }
 0xa09   : > { %4375 = vst.msk [vmem:[#allocation4 + $0x28] sm:$0xff] %vm4374_vm0, %v11090_v45  ;;  %4376 = vst.msk [vmem:[#allocation4 + $0x78] sm:$0xff] %vm4374_vm0, %v11088_v16  ;;  %vm5980_vm0 = vcmask 285696  }
 0xa0a   : > { %v4467_v11 = vpop.permute.xlu1 %4466  ;;  %v4884_v19 = vld [vmem:[#allocation4 + $0x18] sm:$0xff] }
 0xa0b   : > { %9359 = vrot.lane.b32.xlu1 %v9348_v20, %s10028_s27  ;;  %9354 = vrot.lane.b32.xlu0 %v9348_v20, %s10011_s30  ;;  %4473 = vst.msk [vmem:[#allocation4 + $0x30] sm:$0xff] %vm4472_vm3, %v4467_v11  ;;  %v4469_v22 = vpop.permute.xlu0 %4468  ;;  %v4880_v11 = vld [vmem:[%s12721_s10] sm:$0xff] }
 0xa0c   : > { %4571 = vst.msk [vmem:[#allocation4 + $0x30] sm:$0xff] %vm4570_vm1, %v11104_v58  ;;  %v11168_v28 = vld [vmem:[#allocation4 + $0x20] sm:$0xff] }
 0xa0d   : > { %v4893_v36 = vld [vmem:[#allocation4 + $0x68] sm:$0xff]  ;;  %4474 = vst.msk [vmem:[#allocation4 + $0x80] sm:$0xff] %vm4472_vm3, %v4469_v22  ;;  %v9463_v29 = vpack.i.bf16 %v11168_v28, %v4884_v19  ;;  %vm6325_vm3 = vcmask 588800  }
 0xa0e   : > { %v11124_v24 = vld [vmem:[#allocation4 + $0x70] sm:$0xff]  ;;  %6707 = vst [vmem:[#allocation4 + $0x68] sm:$0xff] %v11070_v53  ;;  %v8497_v26 = vpack.c.bf16 %v4893_v36, %v4884_v19  ;;  %4572 = vst.msk [vmem:[#allocation4 + $0x80] sm:$0xff] %vm4570_vm1, %v11102_v40  ;;  %v4665_v30 = vpop.permute.xlu1 %4664  ;;  %vm10030_vm1 = vmmov 0  }
 0xa0f   : > { %6708 = vst [vmem:[#allocation4 + $0x70] sm:$0xff] %v11070_v53  ;;  %9369 = vrot.lane.b32.xlu1 %v9348_v20, %s10029_s17  ;;  %4670 = vst.msk [vmem:[#allocation4 + $0x88] sm:$0xff] %vm4668_vm5, %v4665_v30  ;;  %9364 = vrot.lane.b32.xlu0 %v9348_v20, %s12767_s29  ;;  %v4663_v23 = vpop.permute.xlu0 %4662  ;;  %v9423_v34 = vpack.i.bf16 %v11124_v24, %v4893_v36 }
 0xa10   : > { %8498 = vmatprep.subr.bf16.mxu1 %v8497_v26  ;;  %v11134_v31 = vld [vmem:[#allocation4 + $0x78] sm:$0xff]  ;;  %4779 = vst.msk [vmem:[#allocation4 + $0x88] sm:$0xff] %vm4777_vm11, %v11110_v17  ;;  %v11201_v38 = vld [vmem:[#allocation4 + $0x28] sm:$0xff] }
 0xa11   : > { %8500 = vmatpush1.bf16.msra.mxu1 %v8499_v32  ;;  %4669 = vst.msk [vmem:[#allocation4 + $0x38] sm:$0xff] %vm4668_vm5, %v4663_v23  ;;  %6709 = vst [vmem:[#allocation4 + $0x78] sm:$0xff] %v11070_v53 }
 0xa12   : > { %4778 = vst.msk [vmem:[#allocation4 + $0x38] sm:$0xff] %vm4777_vm11, %v11112_v43  ;;  %v4872_v37 = vpop.permute.xlu1 %4871 }
 0xa13   : > { %9379 = vrot.lane.b32.xlu1 %v9348_v20, %s12770_s21  ;;  %4877 = vst.msk [vmem:[#allocation4 + $0x90] sm:$0xff] %vm4875_vm2, %v4872_v37  ;;  %9374 = vrot.lane.b32.xlu0 %v9348_v20, %s10025_s25  ;;  %v4870_v5 = vpop.permute.xlu0 %4869  ;;  %v11197_v7 = vld [vmem:[#allocation4 + $0x30] sm:$0xff] }
 0xa14   : > { %4876 = vst.msk [vmem:[#allocation4 + $0x40] sm:$0xff] %vm4875_vm2, %v4870_v5  ;;  %v9543_v47 = vpack.i.bf16 %v11197_v7, %v11201_v38 }
 0xa15   : > { %v11141_v12 = vld [vmem:[#allocation4 + $0x80] sm:$0xff] }
 0xa16   : > { %6710 = vst [vmem:[#allocation4 + $0x80] sm:$0xff] %v11070_v53  ;;  %v9523_v48 = vpack.i.bf16 %v11141_v12, %v11134_v31 }
 0xa17   : > { %9384 = vrot.lane.b32.xlu1 %v9383_v44, %s12764_s24  ;;  %v11148_v27 = vld [vmem:[#allocation4 + $0x88] sm:$0xff]  ;;  %9389 = vrot.lane.b32.xlu0 %v9383_v44, %s12766_s16 }
 0xa18   : > { %6711 = vst [vmem:[#allocation4 + $0x88] sm:$0xff] %v11070_v53 }
 0xa19   : > { %v11229_v4 = vld [vmem:[#allocation4 + $0x38] sm:$0xff] }
 0xa1a   : > { %v11152_v33 = vld [vmem:[#allocation4 + $0x90] sm:$0xff] }
 0xa1b   : > { %9394 = vrot.lane.b32.xlu1 %v9383_v44, %s10011_s30  ;;  %6712 = vst [vmem:[#allocation4 + $0x90] sm:$0xff] %v11070_v53  ;;  %v11156_v56 = vld [vmem:[#allocation4 + $0x40] sm:$0xff]  ;;  %9399 = vrot.lane.b32.xlu0 %v9383_v44, %s10028_s27  ;;  %v11161_v62 = vpack.i.bf16 %v11152_v33, %v11148_v27 }
 0xa1c   : > { %5885 = vst [vmem:[#allocation4 + $0x40] sm:$0xff] %v11070_v53  ;;  %v9618_v10 = vpack.i.bf16 %v11156_v56, %v11229_v4 }
 0xa1f   : > { %9404 = vrot.lane.b32.xlu1 %v9383_v44, %s12767_s29  ;;  %9409 = vrot.lane.b32.xlu0 %v9383_v44, %s10029_s17 }
 0xa23   : > { %9414 = vrot.lane.b32.xlu1 %v9383_v44, %s10025_s25  ;;  %9419 = vrot.lane.b32.xlu0 %v9383_v44, %s12770_s21 }
 0xa27   : > { %9464 = vrot.lane.b32.xlu1 %v9463_v29, %s12764_s24  ;;  %9424 = vrot.lane.b32.xlu0 %v9423_v34, %s12764_s24 }
 0xa2b   : > { %9469 = vrot.lane.b32.xlu1 %v9463_v29, %s12766_s16  ;;  %9429 = vrot.lane.b32.xlu0 %v9423_v34, %s12766_s16 }
 0xa2f   : > { %9474 = vrot.lane.b32.xlu1 %v9463_v29, %s10011_s30  ;;  %9434 = vrot.lane.b32.xlu0 %v9423_v34, %s10011_s30 }
 0xa33   : > { %9479 = vrot.lane.b32.xlu1 %v9463_v29, %s10028_s27  ;;  %9439 = vrot.lane.b32.xlu0 %v9423_v34, %s10028_s27 }
 0xa37   : > { %9484 = vrot.lane.b32.xlu1 %v9463_v29, %s12767_s29  ;;  %9444 = vrot.lane.b32.xlu0 %v9423_v34, %s12767_s29 }
 0xa3b   : > { %9489 = vrot.lane.b32.xlu1 %v9463_v29, %s10029_s17  ;;  %9449 = vrot.lane.b32.xlu0 %v9423_v34, %s10029_s17 }
 0xa3c   : > { %v11219_v52 = vpop.permute.xlu1 %9304  ;;  %v11221_v55 = vpop.permute.xlu0 %9309 }
 0xa3d   : > { %v9307_v51 = vunpack.i.h.bf16 %v11219_v52  ;;  %v9306_v39 = vunpack.i.l.bf16 %v11219_v52  ;;  %v9312_v42 = vunpack.i.h.bf16 %v11221_v55  ;;  %v9311_v25 = vunpack.i.l.bf16 %v11221_v55 }
 0xa3f   : > { %9494 = vrot.lane.b32.xlu1 %v9463_v29, %s10025_s25  ;;  %9454 = vrot.lane.b32.xlu0 %v9423_v34, %s10025_s25 }
 0xa40   : > { %v11231_v16 = vpop.permute.xlu1 %9314  ;;  %v11233_v45 = vpop.permute.xlu0 %9319 }
 0xa41   : > { %v9317_v20 = vunpack.i.h.bf16 %v11231_v16  ;;  %v9316_v50 = vunpack.i.l.bf16 %v11231_v16  ;;  %v9322_v19 = vunpack.i.h.bf16 %v11233_v45  ;;  %v9321_v21 = vunpack.i.l.bf16 %v11233_v45 }
 0xa43   : > { %9499 = vrot.lane.b32.xlu1 %v9463_v29, %s12770_s21  ;;  %9459 = vrot.lane.b32.xlu0 %v9423_v34, %s12770_s21 }
 0xa44   : > { %v11240_v60 = vpop.permute.xlu1 %9324  ;;  %v11242_v1 = vpop.permute.xlu0 %9329 }
 0xa45   : > { %v9331_v6 = vunpack.i.l.bf16 %v11242_v1 }
 0xa47   : > { %9544 = vrot.lane.b32.xlu1 %v9543_v47, %s12764_s24  ;;  %9504 = vrot.lane.b32.xlu0 %v9523_v48, %s12764_s24 }
 0xa48   : > { %v11250_v61 = vpop.permute.xlu1 %9334  ;;  %v11252_v40 = vpop.permute.xlu0 %9339 }
 0xa49   : > { %v9337_v18 = vunpack.i.h.bf16 %v11250_v61 }
 0xa4b   : > { %9549 = vrot.lane.b32.xlu1 %v9543_v47, %s12766_s16  ;;  %9509 = vrot.lane.b32.xlu0 %v9523_v48, %s12766_s16 }
 0xa4f   : > { %9554 = vrot.lane.b32.xlu1 %v9543_v47, %s10011_s30  ;;  %9514 = vrot.lane.b32.xlu0 %v9523_v48, %s10011_s30 }
 0xa53   : > { %9559 = vrot.lane.b32.xlu1 %v9543_v47, %s10028_s27  ;;  %9519 = vrot.lane.b32.xlu0 %v9523_v48, %s10028_s27 }
 0xa57   : > { %9564 = vrot.lane.b32.xlu1 %v9543_v47, %s12767_s29  ;;  %9524 = vrot.lane.b32.xlu0 %v9523_v48, %s12767_s29 }
 0xa5b   : > { %9569 = vrot.lane.b32.xlu1 %v9543_v47, %s10029_s17  ;;  %9529 = vrot.lane.b32.xlu0 %v9523_v48, %s10029_s17 }
 0xa5f   : > { %9574 = vrot.lane.b32.xlu1 %v9543_v47, %s10025_s25  ;;  %9534 = vrot.lane.b32.xlu0 %v9523_v48, %s10025_s25 }
 0xa63   : > { %9579 = vrot.lane.b32.xlu1 %v9543_v47, %s12770_s21  ;;  %9539 = vrot.lane.b32.xlu0 %v9523_v48, %s12770_s21 }
 0xa67   : > { %9584 = vrot.lane.b32.xlu1 %v11094_v54, %s10029_s17  ;;  %9589 = vrot.lane.b32.xlu0 %v11161_v62, %s12764_s24 }
 0xa6b   : > { %9619 = vrot.lane.b32.xlu1 %v9618_v10, %s12764_s24  ;;  %9594 = vrot.lane.b32.xlu0 %v11161_v62, %s12766_s16 }
 0xa6f   : > { %9624 = vrot.lane.b32.xlu1 %v9618_v10, %s12766_s16  ;;  %9599 = vrot.lane.b32.xlu0 %v11161_v62, %s10011_s30 }
 0xa73   : > { %9629 = vrot.lane.b32.xlu1 %v9618_v10, %s10011_s30  ;;  %9604 = vrot.lane.b32.xlu0 %v11161_v62, %s10028_s27 }
 0xa77   : > { %9634 = vrot.lane.b32.xlu1 %v9618_v10, %s10028_s27  ;;  %9609 = vrot.lane.b32.xlu0 %v11161_v62, %s12767_s29 }
 0xa79   : > { %v11257_v58 = vpop.permute.xlu1 %9349  ;;  %v11259_v8 = vpop.permute.xlu0 %9344 }
 0xa7a   : > { %v12754_v43 = vunpack.i.h.bf16 %v11259_v8  ;;  %v9346_v35 = vunpack.i.l.bf16 %v11259_v8  ;;  %v12752_v9 = vunpack.i.h.bf16 %v11257_v58  ;;  %v9351_v41 = vunpack.i.l.bf16 %v11257_v58 }
 0xa7b   : > { %9639 = vrot.lane.b32.xlu1 %v9618_v10, %s12767_s29  ;;  %9614 = vrot.lane.b32.xlu0 %v11161_v62, %s10029_s17 }
 0xa7c   : > { %v4963_v32 = vsel %vm2147_vm7, %v9307_v51, %v9346_v35  ;;  %v4964_v37 = vsel %vm2147_vm7, %v9346_v35, %v12754_v43 }
 0xa7d   : > { %v11264_v0 = vpop.permute.xlu1 %9359  ;;  %v11266_v2 = vpop.permute.xlu0 %9354 }
 0xa7e   : > { %v12748_v5 = vunpack.i.h.bf16 %v11264_v0  ;;  %v9361_v55 = vunpack.i.l.bf16 %v11264_v0  ;;  %v12749_v16 = vunpack.i.h.bf16 %v11266_v2 }
 0xa7f   : > { %9644 = vrot.lane.b32.xlu1 %v9618_v10, %s10029_s17  ;;  %9654 = vrot.lane.b32.xlu0 %v11094_v54, %s10025_s25 }
 0xa81   : > { %v11271_v13 = vpop.permute.xlu1 %9369  ;;  %v11273_v14 = vpop.permute.xlu0 %9364 }
 0xa82   : > { %v9366_v57 = vunpack.i.l.bf16 %v11273_v14 }
 0xa83   : > { %9649 = vrot.lane.b32.xlu1 %v11161_v62, %s10025_s25  ;;  %9659 = vrot.lane.b32.xlu0 %v9618_v10, %s10025_s25 }
 0xa85   : > { %v11278_v15 = vpop.permute.xlu1 %9379  ;;  %v11280_v17 = vpop.permute.xlu0 %9374 }
 0xa87   : > { %9669 = vrot.lane.b32.xlu1 %v9618_v10, %s12770_s21  ;;  %9664 = vrot.lane.b32.xlu0 %v11161_v62, %s12770_s21  ;;  %v5034_v62 = vsel %vm2192_vm8, %v9351_v41, %v12752_v9  ;;  %v9336_v9 = vunpack.i.l.bf16 %v11250_v61 }
 0xa89   : > { %v11295_v59 = vpop.permute.xlu1 %9384  ;;  %v11304_v26 = vpop.permute.xlu0 %9389 }
 0xa8a   : > { %v12755_v36 = vunpack.i.h.bf16 %v11295_v59  ;;  %v9386_v22 = vunpack.i.l.bf16 %v11295_v59  ;;  %v12753_v30 = vunpack.i.h.bf16 %v11304_v26  ;;  %v9391_v23 = vunpack.i.l.bf16 %v11304_v26 }
 0xa8b   : > { %9674 = vrot.lane.b32.xlu1 %v11094_v54, %s12770_s21  ;;  %5506 = vperm.xlu0 %8941, %v4880_v11   ;;  %v9356_v54 = vunpack.i.l.bf16 %v11266_v2  ;;  %v9326_v11 = vunpack.i.l.bf16 %v11240_v60 }
 0xa8c   : > { %v4955_v44 = vsel %vm2147_vm7, %v9306_v39, %v9386_v22  ;;  %v4956_v48 = vsel %vm2147_vm7, %v9386_v22, %v12755_v36  ;;  %v5026_v52 = vsel %vm2192_vm8, %v9391_v23, %v12753_v30  ;;  %v9327_v39 = vunpack.i.h.bf16 %v11240_v60 }
 0xa8d   : > { %v11323_v29 = vpop.permute.xlu1 %9394  ;;  %v8465_v34 = vpack.c.bf16 %v4964_v37, %v4956_v48  ;;  %v8467_v47 = vpack.c.bf16 %v4963_v32, %v4955_v44  ;;  %v11332_v51 = vpop.permute.xlu0 %9399  ;;  %v5025_v22 = vsel %vm2192_vm8, %v9311_v25, %v9391_v23  ;;  %v8469_v32 = vpack.c.bf16 %v5034_v62, %v5026_v52 }
 0xa8e   : > { %v12751_v10 = vunpack.i.h.bf16 %v11323_v29  ;;  %v9396_v35 = vunpack.i.l.bf16 %v11323_v29  ;;  %v9332_v37 = vunpack.i.h.bf16 %v11242_v1  ;;  %v12750_v44 = vunpack.i.h.bf16 %v11332_v51 }
 0xa8f   : > { %8466 = vmatprep.subr.bf16.mxu0 %v8465_v34  ;;  %v9401_v48 = vunpack.i.l.bf16 %v11332_v51  ;;  %v5033_v60 = vsel %vm2192_vm8, %v9312_v42, %v9351_v41  ;;  %v5104_v25 = vsel %vm5095_vm9, %v9317_v20, %v9356_v54  ;;  %v12759_v62 = vunpack.i.h.bf16 %v11271_v13 }
 0xa90   : > { %8468 = vmatpush1.bf16.msra.mxu0 %v8467_v47  ;;  %v5097_v49 = vsel %vm5095_vm9, %v9396_v35, %v12751_v10  ;;  %v8471_v47 = vpack.c.bf16 %v5033_v60, %v5025_v22  ;;  %v5105_v52 = vsel %vm5095_vm9, %v9356_v54, %v12749_v16  ;;  %v5176_v1 = vsel %vm5166_vm12, %v9361_v55, %v12748_v5 }
 0xa91   : > { %v11347_v23 = vpop.permute.xlu1 %9404  ;;  %8470 = vmatprep.subr.bf16.mxu0 %v8469_v32  ;;  %v11350_v34 = vpop.permute.xlu0 %9409  ;;  %v9371_v41 = vunpack.i.l.bf16 %v11271_v13  ;;  %v9367_v42 = vunpack.i.h.bf16 %v11273_v14  ;;  %v5096_v20 = vsel %vm5095_vm9, %v9316_v50, %v9396_v35  ;;  %v8473_v32 = vpack.c.bf16 %v5105_v52, %v5097_v49 }
 0xa92   : > { %v9407_v3 = vunpack.i.h.bf16 %v11347_v23  ;;  %v9406_v22 = vunpack.i.l.bf16 %v11347_v23  ;;  %v5168_v54 = vsel %vm5166_vm12, %v9401_v48, %v12750_v44  ;;  %v12756_v60 = vunpack.i.h.bf16 %v11278_v15 }
 0xa93   : > { %v9381_v5 = vunpack.i.l.bf16 %v11278_v15  ;;  %v12757_v16 = vunpack.i.h.bf16 %v11280_v17  ;;  %v9376_v50 = vunpack.i.l.bf16 %v11280_v17  ;;  %v5167_v35 = vsel %vm5166_vm12, %v9321_v21, %v9401_v48 }
 0xa94   : > { %8472 = vmatpush1.bf16.msra.mxu0 %v8471_v47  ;;  %v9412_v47 = vunpack.i.h.bf16 %v11350_v34  ;;  %v9411_v52 = vunpack.i.l.bf16 %v11350_v34  ;;  %v8475_v10 = vpack.c.bf16 %v5104_v25, %v5096_v20  ;;  %v5175_v30 = vsel %vm5166_vm12, %v9322_v19, %v9361_v55 }
 0xa95   : > { %v11371_v49 = vpop.permute.xlu1 %9414  ;;  %8474 = vmatprep.subr.bf16.mxu0 %v8473_v32  ;;  %v11378_v44 = vpop.permute.xlu0 %9419  ;;  %v11385_v43 = vsel %vm5313_vm10, %v9332_v37, %v9371_v41  ;;  %v8477_v32 = vpack.c.bf16 %v5176_v1, %v5168_v54  ;;  %v5245_v36 = vsel %vm2372_vm14, %v9327_v39, %v9366_v57  ;;  %v5238_v21 = vsel %vm2372_vm14, %v9406_v22, %v9407_v3 }
 0xa96   : > { %v5246_v48 = vsel %vm2372_vm14, %v9366_v57, %v9367_v42  ;;  %v5324_v45 = vsel %vm5313_vm10, %v9371_v41, %v12759_v62  ;;  %v11398_v61 = vsel %vm5390_vm15, %v9337_v18, %v9376_v50  ;;  %v8479_v55 = vpack.c.bf16 %v5175_v30, %v5167_v35 }
 0xa97   : > { %v11410_v57 = vsel %vm5467_vm13, %v9381_v5, %v12756_v60  ;;  %v5237_v39 = vsel %vm2372_vm14, %v9326_v11, %v9406_v22  ;;  %v5315_v30 = vsel %vm5313_vm10, %v9411_v52, %v9412_v47  ;;  %v5314_v1 = vsel %vm5313_vm10, %v9331_v6, %v9411_v52 }
 0xa98   : > { %8476 = vmatpush1.bf16.msra.mxu0 %v8475_v10  ;;  %v5401_v10 = vsel %vm5390_vm15, %v9376_v50, %v12757_v16  ;;  %v8481_v54 = vpack.c.bf16 %v5246_v48, %v5238_v21  ;;  %v9417_v50 = vunpack.i.h.bf16 %v11371_v49  ;;  %v9416_v11 = vunpack.i.l.bf16 %v11371_v49 }
 0xa99   : > { %v11400_v19 = vpop.permute.xlu1 %9464  ;;  %8478 = vmatprep.subr.bf16.mxu0 %v8477_v32  ;;  %v11415_v25 = vpop.permute.xlu0 %9424  ;;  %v12773_v22 = vunpack.i.h.bf16 %v11295_v59  ;;  %v12774_v6 = vunpack.i.h.bf16 %v11259_v8  ;;  %v8483_v48 = vpack.c.bf16 %v5245_v36, %v5237_v39  ;;  %v8485_v59 = vpack.c.bf16 %v5324_v45, %v5315_v30 }
 0xa9a   : > { %v12758_v18 = vunpack.i.h.bf16 %v11400_v19  ;;  %v9466_v37 = vunpack.i.l.bf16 %v11400_v19  ;;  %v9427_v41 = vunpack.i.h.bf16 %v11415_v25  ;;  %v9426_v20 = vunpack.i.l.bf16 %v11415_v25 }
 0xa9b   : > { %v9421_v8 = vunpack.i.l.bf16 %v11378_v44  ;;  %v8487_v62 = vpack.c.bf16 %v11385_v43, %v5314_v1  ;;  %v12775_v36 = vunpack.i.h.bf16 %v11304_v26  ;;  %v5392_v30 = vsel %vm5390_vm15, %v9416_v11, %v9417_v50 }
 0xa9c   : > { %v4957_v35 = vsel %vm2147_vm7, %v12773_v22, %v9466_v37  ;;  %8480 = vmatpush1.bf16.msra.mxu0 %v8479_v55  ;;  %v4958_v32 = vsel %vm2147_vm7, %v9466_v37, %v12758_v18  ;;  %v4965_v52 = vsel %vm2147_vm7, %v12774_v6, %v9426_v20  ;;  %v4966_v21 = vsel %vm2147_vm7, %v9426_v20, %v9427_v41 }
 0xa9d   : > { %v11434_v60 = vpop.permute.xlu1 %9469  ;;  %8482 = vmatprep.subr.bf16.mxu0 %v8481_v54  ;;  %v11441_v16 = vpop.permute.xlu0 %9429  ;;  %v8501_v37 = vpack.c.bf16 %v4966_v21, %v4958_v32  ;;  %v8503_v18 = vpack.c.bf16 %v4965_v52, %v4957_v35  ;;  %v9422_v20 = vunpack.i.h.bf16 %v11378_v44  ;;  %v9341_v35 = vunpack.i.l.bf16 %v11252_v40 }
 0xa9e   : > { %v9472_v22 = vunpack.i.h.bf16 %v11434_v60  ;;  %v9471_v55 = vunpack.i.l.bf16 %v11434_v60  ;;  %v9432_v6 = vunpack.i.h.bf16 %v11441_v16  ;;  %v9431_v54 = vunpack.i.l.bf16 %v11441_v16 }
 0xa9f   : > { %8502 = vmatprep.subr.bf16.mxu1 %v8501_v37  ;;  %v5391_v43 = vsel %vm5390_vm15, %v9336_v9, %v9416_v11  ;;  %v12776_v1 = vunpack.i.h.bf16 %v11257_v58  ;;  %v5468_v58 = vsel %vm5467_vm13, %v9341_v35, %v9421_v8  ;;  %v12778_v35 = vunpack.i.h.bf16 %v11266_v2 }
 0xaa0   : > { %v5027_v45 = vsel %vm2192_vm8, %v12775_v36, %v9471_v55  ;;  %8484 = vmatpush1.bf16.msra.mxu0 %v8483_v48  ;;  %v5028_v39 = vsel %vm2192_vm8, %v9471_v55, %v9472_v22  ;;  %8504 = vmatpush1.bf16.msra.mxu1 %v8503_v18  ;;  %v5036_v52 = vsel %vm2192_vm8, %v9431_v54, %v9432_v6 }
 0xaa1   : > { %v5035_v26 = vsel %vm2192_vm8, %v12776_v1, %v9431_v54  ;;  %v11462_v32 = vpop.permute.xlu1 %9474  ;;  %8486 = vmatprep.subr.bf16.mxu0 %v8485_v59  ;;  %v11469_v55 = vpop.permute.xlu0 %9434  ;;  %v8505_v37 = vpack.c.bf16 %v5036_v52, %v5028_v39  ;;  %v8489_v36 = vpack.c.bf16 %v5401_v10, %v5392_v30  ;;  %v12777_v59 = vunpack.i.h.bf16 %v11323_v29 }
 0xaa2   : > { %v9477_v21 = vunpack.i.h.bf16 %v11462_v32  ;;  %v9476_v48 = vunpack.i.l.bf16 %v11462_v32  ;;  %v8507_v9 = vpack.c.bf16 %v5035_v26, %v5027_v45  ;;  %v9437_v11 = vunpack.i.h.bf16 %v11469_v55 }
 0xaa3   : > { %v9436_v18 = vunpack.i.l.bf16 %v11469_v55  ;;  %8506 = vmatprep.subr.bf16.mxu1 %v8505_v37  ;;  %v5469_v45 = vsel %vm5467_vm13, %v9421_v8, %v9422_v20  ;;  %v9342_v39 = vunpack.i.h.bf16 %v11252_v40  ;;  %v8491_v30 = vpack.c.bf16 %v11398_v61, %v5391_v43 }
 0xaa4   : > { %v5098_v1 = vsel %vm5095_vm9, %v12777_v59, %v9476_v48  ;;  %8488 = vmatpush1.bf16.msra.mxu0 %v8487_v62  ;;  %v5099_v54 = vsel %vm5095_vm9, %v9476_v48, %v9477_v21  ;;  %8508 = vmatpush1.bf16.msra.mxu1 %v8507_v9  ;;  %v8493_v9 = vpack.c.bf16 %v11410_v57, %v5469_v45  ;;  %v12779_v61 = vunpack.i.h.bf16 %v11332_v51 }
 0xaa5   : > { %v5106_v10 = vsel %vm5095_vm9, %v12778_v35, %v9436_v18  ;;  %v11487_v29 = vpop.permute.xlu1 %9479  ;;  %8490 = vmatprep.subr.bf16.mxu0 %v8489_v36  ;;  %v5107_v62 = vsel %vm5095_vm9, %v9436_v18, %v9437_v11  ;;  %v11495_v52 = vpop.permute.xlu0 %9439  ;;  %v5477_v18 = vsel %vm5467_vm13, %v9342_v39, %v9381_v5  ;;  %v12780_v59 = vunpack.i.h.bf16 %v11264_v0 }
 0xaa6   : > { %v9482_v26 = vunpack.i.h.bf16 %v11487_v29  ;;  %v9481_v8 = vunpack.i.l.bf16 %v11487_v29  ;;  %v8509_v40 = vpack.c.bf16 %v5107_v62, %v5099_v54  ;;  %v8511_v2 = vpack.c.bf16 %v5106_v10, %v5098_v1 }
 0xaa7   : > { %v9442_v48 = vunpack.i.h.bf16 %v11495_v52  ;;  %v9441_v37 = vunpack.i.l.bf16 %v11495_v52  ;;  %v8495_v51 = vpack.c.bf16 %v5477_v18, %v5468_v58  ;;  %v11531_v58 = vld [vmem:[%s12720_s9] sm:$0xff] }
 0xaa8   : > { %v5169_v43 = vsel %vm5166_vm12, %v12779_v61, %v9481_v8  ;;  %8510 = vmatprep.subr.bf16.mxu1 %v8509_v40  ;;  %8492 = vmatpush1.bf16.msra.mxu0 %v8491_v30  ;;  %v5170_v36 = vsel %vm5166_vm12, %v9481_v8, %v9482_v26  ;;  %v8533_v30 = vpack.c.bf16 %v11134_v31, %v11201_v38 }
 0xaa9   : > { %v5177_v1 = vsel %vm5166_vm12, %v12780_v59, %v9441_v37  ;;  %8512 = vmatpush1.bf16.msra.mxu1 %v8511_v2  ;;  %v11512_v57 = vpop.permute.xlu1 %9484  ;;  %8494 = vmatprep.subr.bf16.mxu0 %v8493_v9  ;;  %v5178_v5 = vsel %vm5166_vm12, %v9441_v37, %v9442_v48  ;;  %v11519_v39 = vpop.permute.xlu0 %9444  ;;  %v8535_v38 = vpack.c.bf16 %v11124_v24, %v11168_v28  ;;  %v12781_v28 = vunpack.i.h.bf16 %v11271_v13 }
 0xaaa   : > { %v9487_v54 = vunpack.i.h.bf16 %v11512_v57  ;;  %v9486_v45 = vunpack.i.l.bf16 %v11512_v57  ;;  %v8513_v35 = vpack.c.bf16 %v5178_v5, %v5170_v36  ;;  %v8515_v10 = vpack.c.bf16 %v5177_v1, %v5169_v43 }
 0xaab   : > { %v9447_v0 = vunpack.i.h.bf16 %v11519_v39  ;;  %v9446_v62 = vunpack.i.l.bf16 %v11519_v39 }
 0xaac   : > { %v5239_v8 = vsel %vm2372_vm14, %v9407_v3, %v9486_v45  ;;  %8514 = vmatprep.subr.bf16.mxu1 %v8513_v35  ;;  %8496 = vmatpush1.bf16.msra.mxu0 %v8495_v51  ;;  %v5240_v40 = vsel %vm2372_vm14, %v9486_v45, %v9487_v54 }
 0xaad   : > { %v5247_v2 = vsel %vm2372_vm14, %v9367_v42, %v9446_v62  ;;  %8516 = vmatpush1.bf16.msra.mxu1 %v8515_v10  ;;  %v11539_v31 = vpop.permute.xlu1 %9489  ;;  %8534 = vmatprep.subr.bf16.mxu0 %v8533_v30  ;;  %v5248_v3 = vsel %vm2372_vm14, %v9446_v62, %v9447_v0  ;;  %v11548_v9 = vpop.permute.xlu0 %9449  ;;  %v12782_v30 = vunpack.i.h.bf16 %v11280_v17 }
 0xaae   : > { %v9492_v23 = vunpack.i.h.bf16 %v11539_v31  ;;  %v9491_v37 = vunpack.i.l.bf16 %v11539_v31  ;;  %v8517_v14 = vpack.c.bf16 %v5248_v3, %v5240_v40  ;;  %v8519_v18 = vpack.c.bf16 %v5247_v2, %v5239_v8 }
 0xaaf   : > { %v9452_v42 = vunpack.i.h.bf16 %v11548_v9  ;;  %v9451_v61 = vunpack.i.l.bf16 %v11548_v9  ;;  %5577 = vmatmul.mubr.f32.vlgmr.msra.gmra.mrb[32].mxu0 %v11531_v58 }
 0xab0   : > { %v5316_v43 = vsel %vm5313_vm10, %v9412_v47, %v9491_v37  ;;  %8518 = vmatprep.subr.bf16.mxu1 %v8517_v14  ;;  %8536 = vmatpush1.bf16.msra.mxu0 %v8535_v38  ;;  %v5317_v24 = vsel %vm5313_vm10, %v9491_v37, %v9492_v23 }
 0xab1   : > { %v5325_v36 = vsel %vm5313_vm10, %v12781_v28, %v9451_v61  ;;  %8520 = vmatpush1.bf16.msra.mxu1 %v8519_v18  ;;  %v11562_v59 = vpop.permute.xlu1 %9494  ;;  %v5326_v1 = vsel %vm5313_vm10, %v9451_v61, %v9452_v42  ;;  %7701 = vmatprep.mubr.msk.f32.mxu0 %vm3085_vm6, %v11183_v46  ;;  %v11571_v5 = vpop.permute.xlu0 %9454 }
 0xab2   : > { %v9497_v34 = vunpack.i.h.bf16 %v11562_v59  ;;  %v9496_v47 = vunpack.i.l.bf16 %v11562_v59  ;;  %v8521_v51 = vpack.c.bf16 %v5326_v1, %v5317_v24  ;;  %v8523_v13 = vpack.c.bf16 %v5325_v36, %v5316_v43 }
 0xab3   : > { %v9457_v45 = vunpack.i.h.bf16 %v11571_v5  ;;  %v9456_v35 = vunpack.i.l.bf16 %v11571_v5  ;;  %v12783_v43 = vunpack.i.h.bf16 %v11278_v15 }
 0xab4   : > { %v5393_v10 = vsel %vm5390_vm15, %v9417_v50, %v9496_v47  ;;  %8522 = vmatprep.subr.bf16.mxu1 %v8521_v51  ;;  %v5394_v62 = vsel %vm5390_vm15, %v9496_v47, %v9497_v34 }
 0xab5   : > { %v5402_v8 = vsel %vm5390_vm15, %v12782_v30, %v9456_v35  ;;  %8524 = vmatpush1.bf16.msra.mxu1 %v8523_v13  ;;  %v11584_v40 = vpop.permute.xlu1 %9499  ;;  %v5403_v2 = vsel %vm5390_vm15, %v9456_v35, %v9457_v45  ;;  %v11591_v3 = vpop.permute.xlu0 %9459  ;;  %v12784_v35 = vunpack.i.h.bf16 %v11400_v19 }
 0xab6   : > { %v9502_v49 = vunpack.i.h.bf16 %v11584_v40  ;;  %v9501_v50 = vunpack.i.l.bf16 %v11584_v40  ;;  %v8525_v38 = vpack.c.bf16 %v5403_v2, %v5394_v62  ;;  %v8527_v37 = vpack.c.bf16 %v5402_v8, %v5393_v10 }
 0xab7   : > { %v9462_v14 = vunpack.i.h.bf16 %v11591_v3  ;;  %v9461_v17 = vunpack.i.l.bf16 %v11591_v3  ;;  %v8569_v62 = vpack.c.bf16 %v11148_v27, %v11229_v4 }
 0xab8   : > { %v5470_v18 = vsel %vm5467_vm13, %v9422_v20, %v9501_v50  ;;  %8526 = vmatprep.subr.bf16.mxu1 %v8525_v38  ;;  %v5471_v61 = vsel %vm5467_vm13, %v9501_v50, %v9502_v49 }
 0xab9   : > { %v5479_v24 = vsel %vm5467_vm13, %v12783_v43, %v9461_v17  ;;  %8528 = vmatpush1.bf16.msra.mxu1 %v8527_v37  ;;  %v11604_v28 = vpop.permute.xlu1 %9544  ;;  %v5480_v36 = vsel %vm5467_vm13, %v9461_v17, %v9462_v14  ;;  %v11611_v1 = vpop.permute.xlu0 %9504  ;;  %v8571_v17 = vpack.c.bf16 %v11141_v12, %v11197_v7 }
 0xaba   : > { %v9547_v44 = vunpack.i.h.bf16 %v11604_v28  ;;  %v9546_v20 = vunpack.i.l.bf16 %v11604_v28  ;;  %v8529_v47 = vpack.c.bf16 %v5480_v36, %v5471_v61  ;;  %v8531_v51 = vpack.c.bf16 %v5479_v24, %v5470_v18 }
 0xabb   : > { %v9507_v13 = vunpack.i.h.bf16 %v11611_v1  ;;  %v9506_v15 = vunpack.i.l.bf16 %v11611_v1 }
 0xabc   : > { %v4959_v10 = vsel %vm2147_vm7, %v12784_v35, %v9546_v20  ;;  %8530 = vmatprep.subr.bf16.mxu1 %v8529_v47  ;;  %v4960_v30 = vsel %vm2147_vm7, %v9546_v20, %v9547_v44 }
 0xabd   : > { %v4967_v8 = vsel %vm2147_vm7, %v9427_v41, %v9506_v15  ;;  %8532 = vmatpush1.bf16.msra.mxu1 %v8531_v51  ;;  %v11626_v2 = vpop.permute.xlu1 %9549  ;;  %v4968_v19 = vsel %vm2147_vm7, %v9506_v15, %v9507_v13  ;;  %v11633_v27 = vpop.permute.xlu0 %9509 }
 0xabe   : > { %v9552_v50 = vunpack.i.h.bf16 %v11626_v2  ;;  %v9551_v38 = vunpack.i.l.bf16 %v11626_v2  ;;  %8570 = vmatprep.subr.bf16.mxu1 %v8569_v62  ;;  %v8537_v4 = vpack.c.bf16 %v4968_v19, %v4960_v30  ;;  %v8539_v37 = vpack.c.bf16 %v4967_v8, %v4959_v10 }
 0xabf   : > { %v9512_v25 = vunpack.i.h.bf16 %v11633_v27  ;;  %v9511_v41 = vunpack.i.l.bf16 %v11633_v27 }
 0xac0   : > { %v5029_v18 = vsel %vm2192_vm8, %v9472_v22, %v9551_v38  ;;  %5648 = vmatmul.mubr.f32.vlgmr.msra.gmra.mrb[62].mxu1 %v11531_v58  ;;  %8538 = vmatprep.subr.bf16.mxu0 %v8537_v4  ;;  %v5030_v61 = vsel %vm2192_vm8, %v9551_v38, %v9552_v50 }
 0xac1   : > { %v5037_v43 = vsel %vm2192_vm8, %v9432_v6, %v9511_v41  ;;  %8540 = vmatpush1.bf16.msra.mxu0 %v8539_v37  ;;  %8572 = vmatpush1.bf16.msra.mxu1 %v8571_v17  ;;  %v11649_v24 = vpop.permute.xlu1 %9554  ;;  %v5038_v12 = vsel %vm2192_vm8, %v9511_v41, %v9512_v25  ;;  %v11656_v22 = vpop.permute.xlu0 %9514 }
 0xac2   : > { %v9557_v7 = vunpack.i.h.bf16 %v11649_v24  ;;  %v9556_v60 = vunpack.i.l.bf16 %v11649_v24  ;;  %v8541_v36 = vpack.c.bf16 %v5038_v12, %v5030_v61  ;;  %v8543_v20 = vpack.c.bf16 %v5037_v43, %v5029_v18  ;;  %7702 = vmatprep.mubr.msk.f32.mxu1 %vm3085_vm6, %v11183_v46 }
 0xac3   : > { %v9517_v16 = vunpack.i.h.bf16 %v11656_v22  ;;  %v9516_v6 = vunpack.i.l.bf16 %v11656_v22 }
 0xac4   : > { %v5100_v47 = vsel %vm5095_vm9, %v9477_v21, %v9556_v60  ;;  %8542 = vmatprep.subr.bf16.mxu0 %v8541_v36  ;;  %v5101_v51 = vsel %vm5095_vm9, %v9556_v60, %v9557_v7 }
 0xac5   : > { %v5108_v15 = vsel %vm5095_vm9, %v9437_v11, %v9516_v6  ;;  %8544 = vmatpush1.bf16.msra.mxu0 %v8543_v20  ;;  %v11671_v35 = vpop.permute.xlu1 %9559  ;;  %v5109_v10 = vsel %vm5095_vm9, %v9516_v6, %v9517_v16  ;;  %v11678_v62 = vpop.permute.xlu0 %9519 }
 0xac6   : > { %v9562_v32 = vunpack.i.h.bf16 %v11671_v35  ;;  %v9561_v21 = vunpack.i.l.bf16 %v11671_v35  ;;  %v8545_v30 = vpack.c.bf16 %v5109_v10, %v5101_v51  ;;  %v8547_v8 = vpack.c.bf16 %v5108_v15, %v5100_v47 }
 0xac7   : > { %v9522_v19 = vunpack.i.h.bf16 %v11678_v62  ;;  %v9521_v55 = vunpack.i.l.bf16 %v11678_v62 }
 0xac8   : > { %v5171_v11 = vsel %vm5166_vm12, %v9482_v26, %v9561_v21  ;;  %8546 = vmatprep.subr.bf16.mxu0 %v8545_v30  ;;  %v5172_v38 = vsel %vm5166_vm12, %v9561_v21, %v9562_v32 }
 0xac9   : > { %v5179_v4 = vsel %vm5166_vm12, %v9442_v48, %v9521_v55  ;;  %8548 = vmatpush1.bf16.msra.mxu0 %v8547_v8  ;;  %v11691_v37 = vpop.permute.xlu1 %9564  ;;  %v5180_v41 = vsel %vm5166_vm12, %v9521_v55, %v9522_v19  ;;  %v11698_v17 = vpop.permute.xlu0 %9524 }
 0xaca   : > { %v9567_v29 = vunpack.i.h.bf16 %v11691_v37  ;;  %v9566_v26 = vunpack.i.l.bf16 %v11691_v37  ;;  %v8549_v18 = vpack.c.bf16 %v5180_v41, %v5172_v38  ;;  %v8551_v61 = vpack.c.bf16 %v5179_v4, %v5171_v11 }
 0xacb   : > { %v9527_v43 = vunpack.i.h.bf16 %v11698_v17  ;;  %v9526_v52 = vunpack.i.l.bf16 %v11698_v17 }
 0xacc   : > { %v5241_v48 = vsel %vm2372_vm14, %v9487_v54, %v9566_v26  ;;  %8550 = vmatprep.subr.bf16.mxu0 %v8549_v18  ;;  %v5242_v12 = vsel %vm2372_vm14, %v9566_v26, %v9567_v29 }
 0xacd   : > { %v5249_v60 = vsel %vm2372_vm14, %v9447_v0, %v9526_v52  ;;  %8552 = vmatpush1.bf16.msra.mxu0 %v8551_v61  ;;  %v11711_v36 = vpop.permute.xlu1 %9569  ;;  %v5250_v20 = vsel %vm2372_vm14, %v9526_v52, %v9527_v43  ;;  %v11718_v6 = vpop.permute.xlu0 %9529 }
 0xace   : > { %v9572_v57 = vunpack.i.h.bf16 %v11711_v36  ;;  %v9571_v54 = vunpack.i.l.bf16 %v11711_v36  ;;  %v8553_v47 = vpack.c.bf16 %v5250_v20, %v5242_v12  ;;  %v8555_v51 = vpack.c.bf16 %v5249_v60, %v5241_v48 }
 0xacf   : > { %v9532_v15 = vunpack.i.h.bf16 %v11718_v6  ;;  %v9531_v39 = vunpack.i.l.bf16 %v11718_v6 }
 0xad0   : > { %v5318_v0 = vsel %vm5313_vm10, %v9492_v23, %v9571_v54  ;;  %8554 = vmatprep.subr.bf16.mxu0 %v8553_v47  ;;  %v5319_v10 = vsel %vm5313_vm10, %v9571_v54, %v9572_v57 }
 0xad1   : > { %v5327_v21 = vsel %vm5313_vm10, %v9452_v42, %v9531_v39  ;;  %8556 = vmatpush1.bf16.msra.mxu0 %v8555_v51  ;;  %v11731_v30 = vpop.permute.xlu1 %9574  ;;  %v5328_v8 = vsel %vm5313_vm10, %v9531_v39, %v9532_v15  ;;  %v11738_v55 = vpop.permute.xlu0 %9534 }
 0xad2   : > { %v9577_v31 = vunpack.i.h.bf16 %v11731_v30  ;;  %v9576_v23 = vunpack.i.l.bf16 %v11731_v30  ;;  %v8557_v11 = vpack.c.bf16 %v5328_v8, %v5319_v10  ;;  %v8559_v38 = vpack.c.bf16 %v5327_v21, %v5318_v0 }
 0xad3   : > { %v9537_v4 = vunpack.i.h.bf16 %v11738_v55  ;;  %v9536_v9 = vunpack.i.l.bf16 %v11738_v55 }
 0xad4   : > { %v5395_v42 = vsel %vm5390_vm15, %v9497_v34, %v9576_v23  ;;  %8558 = vmatprep.subr.bf16.mxu0 %v8557_v11  ;;  %v5396_v41 = vsel %vm5390_vm15, %v9576_v23, %v9577_v31  ;;  %v12785_v11 = vmov 0.0|0.0  }
 0xad5   : > { %v5404_v26 = vsel %vm5390_vm15, %v9457_v45, %v9536_v9  ;;  %8560 = vmatpush1.bf16.msra.mxu0 %v8559_v38  ;;  %v11751_v18 = vpop.permute.xlu1 %9579  ;;  %v5405_v61 = vsel %vm5390_vm15, %v9536_v9, %v9537_v4  ;;  %v11758_v52 = vpop.permute.xlu0 %9539 }
 0xad6   : > { %v9582_v59 = vunpack.i.h.bf16 %v11751_v18  ;;  %v9581_v34 = vunpack.i.l.bf16 %v11751_v18  ;;  %v8561_v48 = vpack.c.bf16 %v5405_v61, %v5396_v41  ;;  %v8563_v12 = vpack.c.bf16 %v5404_v26, %v5395_v42 }
 0xad7   : > { %v9542_v60 = vunpack.i.h.bf16 %v11758_v52  ;;  %v9541_v5 = vunpack.i.l.bf16 %v11758_v52  ;;  %v12786_v61 = vpack.c.bf16 %v11152_v33, %v11156_v56 }
 0xad8   : > { %v5472_v45 = vsel %vm5467_vm13, %v9502_v49, %v9581_v34  ;;  %8562 = vmatprep.subr.bf16.mxu0 %v8561_v48  ;;  %v5473_v20 = vsel %vm5467_vm13, %v9581_v34, %v9582_v59 }
 0xad9   : > { %v5481_v54 = vsel %vm5467_vm13, %v9462_v14, %v9541_v5  ;;  %8564 = vmatpush1.bf16.msra.mxu0 %v8563_v12  ;;  %v11771_v47 = vpop.permute.xlu1 %9584  ;;  %v5482_v51 = vsel %vm5467_vm13, %v9541_v5, %v9542_v60  ;;  %v9590_v39 = vpop.permute.xlu0 %9589 }
 0xada   : > { %v8565_v40 = vpack.c.bf16 %v5482_v51, %v5473_v20  ;;  %v8567_v0 = vpack.c.bf16 %v5481_v54, %v5472_v45  ;;  %v9592_v49 = vunpack.i.h.bf16 %v9590_v39  ;;  %v9591_v10 = vunpack.i.l.bf16 %v9590_v39 }
 0xadc   : > { %8566 = vmatprep.subr.bf16.mxu0 %v8565_v40  ;;  %v4969_v9 = vsel %vm2147_vm7, %v9507_v13, %v9591_v10  ;;  %v4970_v26 = vsel %vm2147_vm7, %v9591_v10, %v9592_v49 }
 0xadd   : > { %8568 = vmatpush1.bf16.msra.mxu0 %v8567_v0  ;;  %v9620_v21 = vpop.permute.xlu1 %9619  ;;  %v9595_v3 = vpop.permute.xlu0 %9594 }
 0xade   : > { %v9622_v8 = vunpack.i.h.bf16 %v9620_v21  ;;  %v9621_v23 = vunpack.i.l.bf16 %v9620_v21  ;;  %8605 = vmatprep.subr.bf16.mxu0 %v12785_v11  ;;  %v9597_v14 = vunpack.i.h.bf16 %v9595_v3  ;;  %v9596_v38 = vunpack.i.l.bf16 %v9595_v3 }
 0xae0   : > { %v4961_v42 = vsel %vm2147_vm7, %v9547_v44, %v9621_v23  ;;  %5719 = vmatmul.mubr.f32.vlgmr.msra.gmra.mrb[34].mxu0 %v11531_v58  ;;  %v4962_v41 = vsel %vm2147_vm7, %v9621_v23, %v9622_v8  ;;  %v8609_v28 = vpack.c.bf16 %v9592_v49, %v9622_v8  ;;  %v5039_v44 = vsel %vm2192_vm8, %v9512_v25, %v9596_v38 }
 0xae1   : > { %8607 = vmatpush1.bf16.msra.mxu0 %v12786_v61  ;;  %v9625_v34 = vpop.permute.xlu1 %9624  ;;  %v8573_v48 = vpack.c.bf16 %v4970_v26, %v4962_v41  ;;  %v8575_v12 = vpack.c.bf16 %v4969_v9, %v4961_v42  ;;  %v9600_v13 = vpop.permute.xlu0 %9599  ;;  %7703 = vmatprep.mubr.msk.f32.mxu0 %vm3085_vm6, %v11183_v46  ;;  %v5040_v33 = vsel %vm2192_vm8, %v9596_v38, %v9597_v14  ;;  %vm5998_vm6 = vcmask 1047832  }
 0xae2   : > { %v9627_v1 = vunpack.i.h.bf16 %v9625_v34  ;;  %v9626_v5 = vunpack.i.l.bf16 %v9625_v34  ;;  %8608 = vmatprep.subr.bf16.mxu0 %v12785_v11  ;;  %v9602_v45 = vunpack.i.h.bf16 %v9600_v13  ;;  %v9601_v20 = vunpack.i.l.bf16 %v9600_v13 }
 0xae3   : > { %8574 = vmatprep.subr.bf16.mxu1 %v8573_v48 }
 0xae4   : > { %v5031_v56 = vsel %vm2192_vm8, %v9552_v50, %v9626_v5  ;;  %8576 = vmatpush1.bf16.msra.mxu1 %v8575_v12  ;;  %v5032_v54 = vsel %vm2192_vm8, %v9626_v5, %v9627_v1  ;;  %v8612_v25 = vpack.c.bf16 %v9597_v14, %v9627_v1  ;;  %v5110_v2 = vsel %vm5095_vm9, %v9517_v16, %v9601_v20 }
 0xae5   : > { %8610 = vmatpush1.bf16.msra.mxu0 %v8609_v28  ;;  %v9630_v51 = vpop.permute.xlu1 %9629  ;;  %v8577_v46 = vpack.c.bf16 %v5040_v33, %v5032_v54  ;;  %v8579_v39 = vpack.c.bf16 %v5039_v44, %v5031_v56  ;;  %v9605_v0 = vpop.permute.xlu0 %9604  ;;  %v5111_v8 = vsel %vm5095_vm9, %v9601_v20, %v9602_v45  ;;  %v9587_v56 = vunpack.i.h.bf16 %v11771_v47 }
 0xae6   : > { %v9632_v40 = vunpack.i.h.bf16 %v9630_v51  ;;  %v9631_v27 = vunpack.i.l.bf16 %v9630_v51  ;;  %8611 = vmatprep.subr.bf16.mxu0 %v12785_v11  ;;  %v9607_v49 = vunpack.i.h.bf16 %v9605_v0  ;;  %v9606_v10 = vunpack.i.l.bf16 %v9605_v0 }
 0xae7   : > { %8578 = vmatprep.subr.bf16.mxu1 %v8577_v46  ;;  %v9586_v51 = vunpack.i.l.bf16 %v11771_v47 }
 0xae8   : > { %v5102_v50 = vsel %vm5095_vm9, %v9557_v7, %v9631_v27  ;;  %8580 = vmatpush1.bf16.msra.mxu1 %v8579_v39  ;;  %v5103_v21 = vsel %vm5095_vm9, %v9631_v27, %v9632_v40  ;;  %v8615_v22 = vpack.c.bf16 %v9602_v45, %v9632_v40  ;;  %v5181_v24 = vsel %vm5166_vm12, %v9522_v19, %v9606_v10 }
 0xae9   : > { %8613 = vmatpush1.bf16.msra.mxu0 %v8612_v25  ;;  %v9635_v23 = vpop.permute.xlu1 %9634  ;;  %v8581_v3 = vpack.c.bf16 %v5111_v8, %v5103_v21  ;;  %v8583_v14 = vpack.c.bf16 %v5110_v2, %v5102_v50  ;;  %v9610_v42 = vpop.permute.xlu0 %9609  ;;  %v5182_v7 = vsel %vm5166_vm12, %v9606_v10, %v9607_v49 }
 0xaea   : > { %v9637_v38 = vunpack.i.h.bf16 %v9635_v23  ;;  %v9636_v9 = vunpack.i.l.bf16 %v9635_v23  ;;  %8614 = vmatprep.subr.bf16.mxu0 %v12785_v11  ;;  %v9612_v41 = vunpack.i.h.bf16 %v9610_v42  ;;  %v9611_v26 = vunpack.i.l.bf16 %v9610_v42 }
 0xaeb   : > { %8582 = vmatprep.subr.bf16.mxu1 %v8581_v3 }
 0xaec   : > { %v5173_v16 = vsel %vm5166_vm12, %v9562_v32, %v9636_v9  ;;  %8584 = vmatpush1.bf16.msra.mxu1 %v8583_v14  ;;  %v5174_v61 = vsel %vm5166_vm12, %v9636_v9, %v9637_v38  ;;  %v8618_v19 = vpack.c.bf16 %v9607_v49, %v9637_v38  ;;  %v5251_v35 = vsel %vm2372_vm14, %v9527_v43, %v9611_v26 }
 0xaed   : > { %8616 = vmatpush1.bf16.msra.mxu0 %v8615_v22  ;;  %v9640_v34 = vpop.permute.xlu1 %9639  ;;  %v8585_v48 = vpack.c.bf16 %v5182_v7, %v5174_v61  ;;  %v8587_v12 = vpack.c.bf16 %v5181_v24, %v5173_v16  ;;  %v9615_v5 = vpop.permute.xlu0 %9614  ;;  %v5252_v33 = vsel %vm2372_vm14, %v9611_v26, %v9612_v41 }
 0xaee   : > { %v9642_v1 = vunpack.i.h.bf16 %v9640_v34  ;;  %v9641_v62 = vunpack.i.l.bf16 %v9640_v34  ;;  %8617 = vmatprep.subr.bf16.mxu0 %v12785_v11  ;;  %v9617_v13 = vunpack.i.h.bf16 %v9615_v5  ;;  %v9616_v28 = vunpack.i.l.bf16 %v9615_v5 }
 0xaef   : > { %8586 = vmatprep.subr.bf16.mxu1 %v8585_v48 }
 0xaf0   : > { %v5243_v32 = vsel %vm2372_vm14, %v9567_v29, %v9641_v62  ;;  %8588 = vmatpush1.bf16.msra.mxu1 %v8587_v12  ;;  %v5244_v44 = vsel %vm2372_vm14, %v9641_v62, %v9642_v1  ;;  %v8621_v37 = vpack.c.bf16 %v9612_v41, %v9642_v1  ;;  %v5331_v29 = vsel %vm5313_vm10, %v9617_v13, %v9587_v56 }
 0xaf1   : > { %8619 = vmatpush1.bf16.msra.mxu0 %v8618_v19  ;;  %v9645_v45 = vpop.permute.xlu1 %9644  ;;  %v8589_v20 = vpack.c.bf16 %v5252_v33, %v5244_v44  ;;  %v8591_v54 = vpack.c.bf16 %v5251_v35, %v5243_v32  ;;  %v9655_v43 = vpop.permute.xlu0 %9654  ;;  %v5329_v39 = vsel %vm5313_vm10, %v9532_v15, %v9616_v28  ;;  %v5330_v0 = vsel %vm5313_vm10, %v9616_v28, %v9617_v13 }
 0xaf2   : > { %v9647_v17 = vunpack.i.h.bf16 %v9645_v45  ;;  %v9646_v46 = vunpack.i.l.bf16 %v9645_v45  ;;  %8620 = vmatprep.subr.bf16.mxu0 %v12785_v11  ;;  %v9657_v6 = vunpack.i.h.bf16 %v9655_v43  ;;  %v9656_v8 = vunpack.i.l.bf16 %v9655_v43 }
 0xaf3   : > { %8590 = vmatprep.subr.bf16.mxu1 %v8589_v20  ;;  %v12787_v32 = vsub.s32 0, %v10245_v63  ;;  %v12788_v45 = vsub.s32 1, %v10245_v63 }
 0xaf4   : > { %v5322_v40 = vsel %vm5313_vm10, %v9647_v17, %v9586_v51  ;;  %v5320_v27 = vsel %vm5313_vm10, %v9572_v57, %v9646_v46  ;;  %8592 = vmatpush1.bf16.msra.mxu1 %v8591_v54  ;;  %v5321_v47 = vsel %vm5313_vm10, %v9646_v46, %v9647_v17  ;;  %v5913_v46 = vsub.s32 3, %v10245_v63 }
 0xaf5   : > { %8622 = vmatpush1.bf16.msra.mxu0 %v8621_v37  ;;  %v9650_v25 = vpop.permute.xlu1 %9649  ;;  %v8593_v49 = vpack.c.bf16 %v5330_v0, %v5321_v47  ;;  %v8595_v10 = vpack.c.bf16 %v5329_v39, %v5320_v27  ;;  %v8624_v2 = vpack.c.bf16 %v5331_v29, %v5322_v40  ;;  %v9660_v21 = vpop.permute.xlu0 %9659  ;;  %v12789_v29 = vsub.s32 2, %v10245_v63 }
 0xaf6   : > { %v9652_v50 = vunpack.i.h.bf16 %v9650_v25  ;;  %v9651_v15 = vunpack.i.l.bf16 %v9650_v25  ;;  %8623 = vmatprep.subr.bf16.mxu0 %v12785_v11  ;;  %v9662_v36 = vunpack.i.h.bf16 %v9660_v21  ;;  %v9661_v23 = vunpack.i.l.bf16 %v9660_v21 }
 0xaf7   : > { %8594 = vmatprep.subr.bf16.mxu1 %v8593_v49 }
 0xaf8   : > { %v5406_v57 = vsel %vm5390_vm15, %v9537_v4, %v9651_v15  ;;  %v5408_v3 = vsel %vm5390_vm15, %v9652_v50, %v9657_v6  ;;  %8596 = vmatpush1.bf16.msra.mxu1 %v8595_v10  ;;  %v5407_v14 = vsel %vm5390_vm15, %v9651_v15, %v9652_v50  ;;  %v5397_v38 = vsel %vm5390_vm15, %v9577_v31, %v9661_v23 }
 0xaf9   : > { %v5399_v9 = vsel %vm5390_vm15, %v9662_v36, %v9656_v8  ;;  %8625 = vmatpush1.bf16.msra.mxu0 %v8624_v2  ;;  %v9670_v42 = vpop.permute.xlu1 %9669  ;;  %v5398_v22 = vsel %vm5390_vm15, %v9661_v23, %v9662_v36  ;;  %v9665_v55 = vpop.permute.xlu0 %9664  ;;  %v8599_v4 = vpack.c.bf16 %v5406_v57, %v5397_v38  ;;  %v5917_v2 = vsub.s32 4, %v10245_v63 }
 0xafa   : > { %v9672_v24 = vunpack.i.h.bf16 %v9670_v42  ;;  %v9671_v7 = vunpack.i.l.bf16 %v9670_v42  ;;  %v8597_v16 = vpack.c.bf16 %v5407_v14, %v5398_v22  ;;  %8626 = vmatprep.subr.bf16.mxu0 %v12785_v11  ;;  %v9667_v41 = vunpack.i.h.bf16 %v9665_v55 }
 0xafb   : > { %v9666_v26 = vunpack.i.l.bf16 %v9665_v55  ;;  %v8627_v61 = vpack.c.bf16 %v5408_v3, %v5399_v9  ;;  %v5921_v6 = vsub.s32 5, %v10245_v63  ;;  %v5925_v9 = vsub.s32 6, %v10245_v63 }
 0xafc   : > { %v5474_v30 = vsel %vm5467_vm13, %v9582_v59, %v9671_v7  ;;  %8598 = vmatprep.subr.bf16.mxu1 %v8597_v16  ;;  %v5475_v31 = vsel %vm5467_vm13, %v9671_v7, %v9672_v24  ;;  %v5929_v42 = vsub.s32 7, %v10245_v63 }
 0xafd   : > { %v5483_v34 = vsel %vm5467_vm13, %v9542_v60, %v9666_v26  ;;  %8600 = vmatpush1.bf16.msra.mxu1 %v8599_v4  ;;  %8628 = vmatpush1.bf16.msra.mxu0 %v8627_v61  ;;  %v9675_v48 = vpop.permute.xlu1 %9674  ;;  %v5484_v12 = vsel %vm5467_vm13, %v9666_v26, %v9667_v41  ;;  %v5875_v60 = vld [vmem:[%s12713_s2] sm:$0xff] }
 0xafe   : > { %v9677_v1 = vunpack.i.h.bf16 %v9675_v48  ;;  %v9676_v62 = vunpack.i.l.bf16 %v9675_v48  ;;  %v8601_v5 = vpack.c.bf16 %v5484_v12, %v5475_v31  ;;  %v8603_v19 = vpack.c.bf16 %v5483_v34, %v5474_v30  ;;  %8629 = vmatprep.subr.bf16.mxu0 %v12785_v11  ;;  %v11912_v34 = vld [vmem:[%s12713_s2 + $0x8] ss:$0 sm:$0xff] }
 0xaff   : > { %v11872_v44 = vrot.slane %v5875_v60, %v12787_v32  ;;  %v11876_v20 = vrot.slane %v5875_v60, %v12788_v45  ;;  %v11885_v39 = vrot.slane %v5875_v60, %v12789_v29  ;;  %v11887_v47 = vrot.slane %v5875_v60, %v5913_v46 }
 0xb00   : > { %v5476_v18 = vsel %vm5467_vm13, %v9672_v24, %v9676_v62  ;;  %v5485_v59 = vsel %vm5467_vm13, %v9667_v41, %v9677_v1  ;;  %8602 = vmatprep.subr.bf16.mxu1 %v8601_v5  ;;  %v11895_v21 = vrot.slane %v5875_v60, %v5917_v2  ;;  %v11897_v23 = vrot.slane %v5875_v60, %v5921_v6  ;;  %v11920_v62 = vld [vmem:[#allocation4 + $0x48] sm:$0xff] }
 0xb01   : > { %8604 = vmatpush1.bf16.msra.mxu1 %v8603_v19  ;;  %v8630_v52 = vpack.c.bf16 %v5485_v59, %v5476_v18  ;;  %v11905_v7 = vrot.slane %v5875_v60, %v5925_v9  ;;  %v11907_v4 = vrot.slane %v5875_v60, %v5929_v42  ;;  %6703 = vst.msk [vmem:[#allocation4 + $0x48] sm:$0xff] %vm3265_vm4, %v11070_v53  ;;  %vm6007_vm4 = vcmask 809984  }
 0xb03   : > { %8631 = vmatpush1.bf16.msra.mxu0 %v8630_v52 }
 0xb04   : > { %5790 = vmatmul.mubr.f32.vlgmr.msra.gmra.mrb[64].mxu1 %v11531_v58 }
 0xb05   : > { %6393 = vmatprep.mubr.f32.mxu1 %v11070_v53 }
 0xb06   : > { %5861 = vmatmul.mubr.f32.vlgmr.msra.gmra.mrb[36].mxu0 %v11531_v58 }
 0xb07   : > { %6535 = vmatprep.mubr.f32.mxu0 %v11070_v53 }
 0xb0a   : > { %v5507_v13 = vpop.permute.xlu0 %5506 }
 0xb82   : > { %v5578_v28 = vpop.f32.mrb[32].mxu0 }
 0xb83   : > { %v5579_v35 = vadd.f32 %v5578_v28, %v5507_v13  ;;  %v5580_v33 = vpop.f32.mrb[33].mxu0 }
 0xb84   : > { %v5581_v56 = vadd.f32 %v5580_v33, %v5507_v13 }
 0xb85   : > { %v5866_v58 = vmax.f32 %v5579_v35, 0.0 }
 0xb86   : > { %v5867_v54 = vmax.f32 %v5581_v56, 0.0 }
 0xb87   : > { %v5944_v51 = vmul.f32 %v11872_v44, %v5866_v58 }
 0xb88   : > { %v5945_v17 = vmul.f32 %v11876_v20, %v5867_v54 }
 0xb89   : > { %5962 = vrot.lane.b32.xlu1 %v5944_v51, %s12771_s22 }
 0xb8a   : > { %5964 = vrot.lane.b32.xlu0 %v5945_v17, %s12771_s22 }
 0xb93   : > { %v5649_v43 = vpop.f32.mrb[62].mxu1 }
 0xb94   : > { %v5650_v37 = vadd.f32 %v5649_v43, %v5507_v13  ;;  %v5651_v40 = vpop.f32.mrb[63].mxu1 }
 0xb95   : > { %v5652_v27 = vadd.f32 %v5651_v40, %v5507_v13 }
 0xb96   : > { %v5868_v0 = vmax.f32 %v5650_v37, 0.0 }
 0xb97   : > { %v5869_v25 = vmax.f32 %v5652_v27, 0.0 }
 0xb98   : > { %v5946_v49 = vmul.f32 %v11885_v39, %v5868_v0 }
 0xb99   : > { %v5947_v10 = vmul.f32 %v11887_v47, %v5869_v25 }
 0xb9a   : > { %5966 = vrot.lane.b32.xlu1 %v5946_v49, %s12771_s22 }
 0xb9b   : > { %5968 = vrot.lane.b32.xlu0 %v5947_v10, %s12771_s22  ;;  %v6010_v10 = vld [vmem:[%s12723_s12] sm:$0xff] }
 0xbb3   : > { %v5720_v50 = vpop.f32.mrb[34].mxu0 }
 0xbb4   : > { %v5721_v15 = vadd.f32 %v5720_v50, %v5507_v13  ;;  %v5722_v8 = vpop.f32.mrb[35].mxu0 }
 0xbb5   : > { %v5723_v36 = vadd.f32 %v5722_v8, %v5507_v13 }
 0xbb6   : > { %v5870_v57 = vmax.f32 %v5721_v15, 0.0 }
 0xbb7   : > { %v5871_v3 = vmax.f32 %v5723_v36, 0.0 }
 0xbb8   : > { %v5948_v14 = vmul.f32 %v11895_v21, %v5870_v57 }
 0xbb9   : > { %v5949_v38 = vmul.f32 %v11897_v23, %v5871_v3 }
 0xbba   : > { %5970 = vrot.lane.b32.xlu1 %v5948_v14, %s12771_s22 }
 0xbbb   : > { %5972 = vrot.lane.b32.xlu0 %v5949_v38, %s12771_s22 }
 0xbd7   : > { %v5791_v22 = vpop.f32.mrb[64].mxu1 }
 0xbd8   : > { %v5792_v24 = vadd.f32 %v5791_v22, %v5507_v13  ;;  %v5793_v55 = vpop.f32.mrb[65].mxu1 }
 0xbd9   : > { %v5794_v16 = vadd.f32 %v5793_v55, %v5507_v13  ;;  %v5862_v41 = vpop.f32.mrb[36].mxu0 }
 0xbda   : > { %v5872_v26 = vmax.f32 %v5792_v24, 0.0  ;;  %v5863_v61 = vadd.f32 %v5862_v41, %v5507_v13  ;;  %v5864_v30 = vpop.f32.mrb[37].mxu0 }
 0xbdb   : > { %v5873_v31 = vmax.f32 %v5794_v16, 0.0 }
 0xbdc   : > { %v5950_v63 = vmul.f32 %v11905_v7, %v5872_v26  ;;  %v5874_v48 = vmax.f32 %v5863_v61, 0.0 }
 0xbdd   : > { %v5951_v12 = vmul.f32 %v11907_v4, %v5873_v31 }
 0xbde   : > { %v5952_v1 = vmul.f32 %v11912_v34, %v5874_v48  ;;  %5974 = vrot.lane.b32.xlu1 %v5950_v63, %s12771_s22 }
 0xbdf   : > { %5976 = vrot.lane.b32.xlu0 %v5951_v12, %s12771_s22 }
 0xbe2   : > { %5978 = vrot.lane.b32.xlu1 %v5952_v1, %s12771_s22 }
 0xbfb   : > { %v5963_v5 = vpop.permute.xlu1 %5962 }
 0xbfc   : > { %5999 = vst.msk [vmem:[#allocation4] sm:$0xff] %vm5998_vm6, %v5963_v5  ;;  %v5965_v18 = vpop.permute.xlu0 %5964 }
 0xbfd   : > { %v11931_v59 = vsel %vm5980_vm0, %v5963_v5, %v5965_v18 }
 0xc03   : > { %v11925_v19 = vld [vmem:[#allocation4] sm:$0xff] }
 0xc04   : > { %6282 = vrot.lane.b32.xlu1 %v11925_v19, %s12770_s21  ;;  %6694 = vst [vmem:[#allocation4] sm:$0xff] %v11070_v53 }
 0xc08   : > { %6284 = vrot.lane.b32.xlu1 %v11931_v59, %s12770_s21 }
 0xc0c   : > { %v5967_v52 = vpop.permute.xlu1 %5966 }
 0xc0d   : > { %v11936_v60 = vsel %vm5980_vm0, %v5965_v18, %v5967_v52  ;;  %v5969_v28 = vpop.permute.xlu0 %5968 }
 0xc0e   : > { %v9688_v13 = vpack.i.bf16 %v11936_v60, %v11931_v59  ;;  %v11945_v35 = vsel %vm5980_vm0, %v5967_v52, %v5969_v28 }
 0xc0f   : > { %v9713_v32 = vpack.i.bf16 %v11945_v35, %v11925_v19 }
 0xc10   : > { %9689 = vrot.lane.b32.xlu1 %v9688_v13, %s10011_s30  ;;  %9679 = vrot.lane.b32.xlu0 %v9688_v13, %s12764_s24 }
 0xc14   : > { %9699 = vrot.lane.b32.xlu1 %v9688_v13, %s12767_s29  ;;  %9684 = vrot.lane.b32.xlu0 %v9688_v13, %s12766_s16 }
 0xc18   : > { %9709 = vrot.lane.b32.xlu1 %v9688_v13, %s10025_s25  ;;  %9694 = vrot.lane.b32.xlu0 %v9688_v13, %s10028_s27 }
 0xc1c   : > { %9714 = vrot.lane.b32.xlu1 %v9713_v32, %s12764_s24  ;;  %9704 = vrot.lane.b32.xlu0 %v9688_v13, %s10029_s17 }
 0xc20   : > { %9724 = vrot.lane.b32.xlu1 %v9713_v32, %s10011_s30  ;;  %6286 = vrot.lane.b32.xlu0 %v11936_v60, %s12770_s21 }
 0xc24   : > { %9734 = vrot.lane.b32.xlu1 %v9713_v32, %s12767_s29  ;;  %9719 = vrot.lane.b32.xlu0 %v9713_v32, %s12766_s16 }
 0xc28   : > { %9744 = vrot.lane.b32.xlu1 %v9713_v32, %s10025_s25  ;;  %9729 = vrot.lane.b32.xlu0 %v9713_v32, %s10028_s27 }
 0xc2c   : > { %v5971_v33 = vpop.permute.xlu1 %5970  ;;  %9739 = vrot.lane.b32.xlu0 %v9713_v32, %s10029_s17 }
 0xc2d   : > { %v11962_v56 = vsel %vm5980_vm0, %v5969_v28, %v5971_v33  ;;  %v5973_v45 = vpop.permute.xlu0 %5972 }
 0xc2e   : > { %6252 = vrot.lane.b32.xlu1 %v11962_v56, %s10025_s25  ;;  %v11969_v58 = vsel %vm5980_vm0, %v5971_v33, %v5973_v45 }
 0xc2f   : > { %v9758_v54 = vpack.i.bf16 %v11969_v58, %v11962_v56 }
 0xc30   : > { %6288 = vrot.lane.b32.xlu0 %v11945_v35, %s12770_s21 }
 0xc32   : > { %6290 = vrot.lane.b32.xlu1 %v11962_v56, %s12770_s21 }
 0xc34   : > { %6214 = vrot.lane.b32.xlu0 %v11962_v56, %s10029_s17 }
 0xc36   : > { %9759 = vrot.lane.b32.xlu1 %v9758_v54, %s10011_s30 }
 0xc38   : > { %9749 = vrot.lane.b32.xlu0 %v9758_v54, %s12764_s24 }
 0xc3a   : > { %9769 = vrot.lane.b32.xlu1 %v9758_v54, %s12767_s29 }
 0xc3c   : > { %9754 = vrot.lane.b32.xlu0 %v9758_v54, %s12766_s16 }
 0xc40   : > { %9764 = vrot.lane.b32.xlu0 %v9758_v54, %s10028_s27 }
 0xc50   : > { %v5975_v51 = vpop.permute.xlu1 %5974 }
 0xc51   : > { %v11983_v17 = vsel %vm5980_vm0, %v5973_v45, %v5975_v51  ;;  %v5977_v46 = vpop.permute.xlu0 %5976 }
 0xc52   : > { %v9778_v43 = vpack.i.bf16 %v11983_v17, %v11969_v58  ;;  %v11988_v37 = vsel %vm5980_vm0, %v5975_v51, %v5977_v46 }
 0xc53   : > { %v9793_v27 = vpack.i.bf16 %v11988_v37, %v11983_v17 }
 0xc54   : > { %v5979_v29 = vpop.permute.xlu1 %5978  ;;  %9779 = vrot.lane.b32.xlu1 %v9778_v43, %s10025_s25  ;;  %9774 = vrot.lane.b32.xlu0 %v9778_v43, %s10029_s17 }
 0xc55   : > { %v5988_v40 = vsel %vm5980_vm0, %v5977_v46, %v5979_v29 }
 0xc56   : > { %6008 = vst.msk [vmem:[#allocation4 + $0x40] sm:$0xff] %vm6007_vm4, %v5988_v40 }
 0xc58   : > { %9794 = vrot.lane.b32.xlu1 %v9793_v27, %s10011_s30  ;;  %9784 = vrot.lane.b32.xlu0 %v9793_v27, %s12764_s24 }
 0xc5c   : > { %9804 = vrot.lane.b32.xlu1 %v9793_v27, %s12767_s29  ;;  %9789 = vrot.lane.b32.xlu0 %v9793_v27, %s12766_s16 }
 0xc5d   : > { %v12000_v0 = vld [vmem:[#allocation4 + $0x40] sm:$0xff] }
 0xc5e   : > { %6702 = vst [vmem:[#allocation4 + $0x40] sm:$0xff] %v11070_v53  ;;  %v9808_v25 = vpack.i.bf16 %v12000_v0, %v11988_v37 }
 0xc60   : > { %9799 = vrot.lane.b32.xlu0 %v9793_v27, %s10028_s27  ;;  %6046 = vrot.lane.b32.xlu1 %v12000_v0, %s12764_s24 }
 0xc64   : > { %6081 = vrot.lane.b32.xlu0 %v12000_v0, %s12766_s16  ;;  %6116 = vrot.lane.b32.xlu1 %v12000_v0, %s10011_s30 }
 0xc68   : > { %6151 = vrot.lane.b32.xlu0 %v12000_v0, %s10028_s27  ;;  %6186 = vrot.lane.b32.xlu1 %v12000_v0, %s12767_s29 }
 0xc6c   : > { %9809 = vrot.lane.b32.xlu0 %v9808_v25, %s10029_s17  ;;  %9814 = vrot.lane.b32.xlu1 %v9808_v25, %s10025_s25 }
 0xc70   : > { %6292 = vrot.lane.b32.xlu0 %v11969_v58, %s12770_s21  ;;  %6294 = vrot.lane.b32.xlu1 %v11983_v17, %s12770_s21 }
 0xc74   : > { %6296 = vrot.lane.b32.xlu0 %v11988_v37, %s12770_s21  ;;  %6298 = vrot.lane.b32.xlu1 %v12000_v0, %s12770_s21 }
 0xc76   : > { %v12026_v49 = vpop.permute.xlu1 %6282 }
 0xc78   : > { %6224 = vrot.lane.b32.xlu0 %v11920_v62, %s10029_s17  ;;  %6262 = vrot.lane.b32.xlu1 %v11920_v62, %s10025_s25 }
 0xc7a   : > { %v12037_v2 = vpop.permute.xlu1 %6284 }
 0xc7c   : > { %6300 = vrot.lane.b32.xlu0 %v11920_v62, %s12770_s21  ;;  %6322 = vperm.xlu1 %8942, %v6010_v10  }
 0xc82   : > { %v12039_v6 = vpop.permute.xlu0 %9679  ;;  %v12041_v50 = vpop.permute.xlu1 %9689 }
 0xc83   : > { %v9682_v15 = vunpack.i.h.bf16 %v12039_v6  ;;  %v9681_v8 = vunpack.i.l.bf16 %v12039_v6  ;;  %v9692_v24 = vunpack.i.h.bf16 %v12041_v50  ;;  %v9691_v55 = vunpack.i.l.bf16 %v12041_v50 }
 0xc85   : > { %v6049_v36 = vsel %vm2147_vm7, %v9681_v8, %v9682_v15  ;;  %v6119_v12 = vsel %vm5095_vm9, %v9691_v55, %v9692_v24 }
 0xc86   : > { %v12048_v57 = vpop.permute.xlu0 %9684  ;;  %v12050_v3 = vpop.permute.xlu1 %9699  ;;  %v8632_v14 = vpack.c.bf16 %v6049_v36, %v11931_v59 }
 0xc87   : > { %v9687_v42 = vunpack.i.h.bf16 %v12048_v57  ;;  %v9686_v22 = vunpack.i.l.bf16 %v12048_v57  ;;  %v9702_v59 = vunpack.i.h.bf16 %v12050_v3 }
 0xc88   : > { %8633 = vmatprep.subr.bf16.mxu1 %v8632_v14 }
 0xc89   : > { %v6084_v61 = vsel %vm2192_vm8, %v9686_v22, %v9687_v42 }
 0xc8a   : > { %v12053_v38 = vpop.permute.xlu0 %9694  ;;  %v12055_v9 = vpop.permute.xlu1 %9709  ;;  %v8636_v1 = vpack.c.bf16 %v6119_v12, %v6084_v61 }
 0xc8b   : > { %v9697_v62 = vunpack.i.h.bf16 %v12053_v38  ;;  %v9696_v5 = vunpack.i.l.bf16 %v12053_v38  ;;  %v9712_v43 = vunpack.i.h.bf16 %v12055_v9  ;;  %v9711_v29 = vunpack.i.l.bf16 %v12055_v9 }
 0xc8d   : > { %v6154_v45 = vsel %vm5166_vm12, %v9696_v5, %v9697_v62 }
 0xc8e   : > { %v12061_v16 = vpop.permute.xlu0 %9704  ;;  %v12063_v41 = vpop.permute.xlu1 %9714 }
 0xc8f   : > { %v9716_v26 = vunpack.i.l.bf16 %v12063_v41  ;;  %v9707_v32 = vunpack.i.h.bf16 %v12061_v16  ;;  %v9706_v33 = vunpack.i.l.bf16 %v12061_v16 }
 0xc91   : > { %v6048_v30 = vsel %vm2147_vm7, %v9716_v26, %v9681_v8  ;;  %v6227_v14 = vsel %vm5313_vm10, %v9706_v33, %v9707_v32 }
 0xc92   : > { %v8634_v31 = vpack.c.bf16 %v6048_v30, %v11925_v19  ;;  %v12071_v63 = vpop.permute.xlu0 %6286  ;;  %v12073_v48 = vpop.permute.xlu1 %9724  ;;  %v9701_v19 = vunpack.i.l.bf16 %v12050_v3 }
 0xc93   : > { %v9726_v18 = vunpack.i.l.bf16 %v12073_v48 }
 0xc94   : > { %8635 = vmatpush1.bf16.msra.mxu1 %v8634_v31  ;;  %v6189_v10 = vsel %vm2372_vm14, %v9701_v19, %v9702_v59  ;;  %v6265_v31 = vsel %vm5390_vm15, %v9711_v29, %v9712_v43 }
 0xc95   : > { %8637 = vmatprep.subr.bf16.mxu1 %v8636_v1  ;;  %v6118_v54 = vsel %vm5095_vm9, %v9726_v18, %v9691_v55  ;;  %v8640_v36 = vpack.c.bf16 %v6189_v10, %v6154_v45  ;;  %v8644_v1 = vpack.c.bf16 %v6265_v31, %v6227_v14 }
 0xc96   : > { %v12083_v52 = vpop.permute.xlu0 %9719  ;;  %v12085_v13 = vpop.permute.xlu1 %9734 }
 0xc97   : > { %v9721_v28 = vunpack.i.l.bf16 %v12083_v52  ;;  %v9736_v46 = vunpack.i.l.bf16 %v12085_v13  ;;  %v9737_v57 = vunpack.i.h.bf16 %v12085_v13 }
 0xc99   : > { %v6083_v51 = vsel %vm2192_vm8, %v9721_v28, %v9686_v22  ;;  %v6188_v22 = vsel %vm2372_vm14, %v9736_v46, %v9701_v19  ;;  %v6190_v38 = vsel %vm2372_vm14, %v9702_v59, %v9737_v57 }
 0xc9a   : > { %v8638_v40 = vpack.c.bf16 %v6118_v54, %v6083_v51  ;;  %v12098_v27 = vpop.permute.xlu0 %9729  ;;  %v12100_v25 = vpop.permute.xlu1 %9744  ;;  %v6303_v51 = vsel %vm5467_vm13, %v12037_v2, %v12071_v63 }
 0xc9b   : > { %v9731_v8 = vunpack.i.l.bf16 %v12098_v27  ;;  %v9746_v26 = vunpack.i.l.bf16 %v12100_v25 }
 0xc9c   : > { %8639 = vmatpush1.bf16.msra.mxu1 %v8638_v40  ;;  %v12132_v40 = vld [vmem:[%s12722_s11] sm:$0xff] }
 0xc9d   : > { %v6153_v55 = vsel %vm5166_vm12, %v9731_v8, %v9696_v5  ;;  %8641 = vmatprep.subr.bf16.mxu1 %v8640_v36  ;;  %v6264_v19 = vsel %vm5390_vm15, %v9746_v26, %v9711_v29  ;;  %v9717_v29 = vunpack.i.h.bf16 %v12063_v41 }
 0xc9e   : > { %v8642_v61 = vpack.c.bf16 %v6188_v22, %v6153_v55  ;;  %v12112_v30 = vpop.permute.xlu0 %9739  ;;  %v9727_v22 = vunpack.i.h.bf16 %v12073_v48 }
 0xc9f   : > { %v9741_v12 = vunpack.i.l.bf16 %v12112_v30  ;;  %v6050_v14 = vsel %vm2147_vm7, %v9682_v15, %v9717_v29 }
 0xca0   : > { %v12118_v18 = vpop.permute.xlu1 %6252  ;;  %8643 = vmatpush1.bf16.msra.mxu1 %v8642_v61  ;;  %v8650_v31 = vpack.c.bf16 %v6050_v14, %v11936_v60  ;;  %v6120_v60 = vsel %vm5095_vm9, %v9692_v24, %v9727_v22 }
 0xca1   : > { %v6226_v5 = vsel %vm5313_vm10, %v9741_v12, %v9706_v33  ;;  %8645 = vmatprep.subr.bf16.mxu1 %v8644_v1  ;;  %v6302_v33 = vsel %vm5467_vm13, %v12026_v49, %v12037_v2  ;;  %v9722_v49 = vunpack.i.h.bf16 %v12083_v52  ;;  %v9732_v52 = vunpack.i.h.bf16 %v12098_v27 }
 0xca2   : > { %v8646_v28 = vpack.c.bf16 %v6264_v19, %v6226_v5  ;;  %v6289_v45 = vpop.permute.xlu0 %6288  ;;  %v9742_v19 = vunpack.i.h.bf16 %v12112_v30 }
 0xca3   : > { %v6085_v15 = vsel %vm2192_vm8, %v9687_v42, %v9722_v49 }
 0xca4   : > { %v12122_v54 = vpop.permute.xlu1 %6290  ;;  %8647 = vmatpush1.bf16.msra.mxu1 %v8646_v28  ;;  %v8654_v27 = vpack.c.bf16 %v6120_v60, %v6085_v15  ;;  %v6155_v28 = vsel %vm5166_vm12, %v9697_v62, %v9732_v52 }
 0xca5   : > { %6345 = vmatprep.subr.mxu1 %v6303_v51  ;;  %v9747_v51 = vunpack.i.h.bf16 %v12100_v25  ;;  %v8658_v30 = vpack.c.bf16 %v6190_v38, %v6155_v28  ;;  %v6305_v59 = vsel %vm5467_vm13, %v6289_v45, %v12122_v54 }
 0xca6   : > { %v12127_v46 = vpop.permute.xlu0 %6214 }
 0xca7   : > { %v6229_v50 = vsel %vm5313_vm10, %v9742_v19, %v12127_v46  ;;  %v6267_v25 = vsel %vm5390_vm15, %v9747_v51, %v12118_v18  ;;  %v6266_v14 = vsel %vm5390_vm15, %v9712_v43, %v9747_v51 }
 0xca8   : > { %v12138_v10 = vpop.permute.xlu1 %9759  ;;  %6346 = vmatpush1.msra.mxu1 %v6302_v33  ;;  %v6228_v33 = vsel %vm5313_vm10, %v9707_v32, %v9742_v19 }
 0xca9   : > { %7705 = vmatmul.mubr.msk.f32.vlgmr.msra.gmra.mrb[66].mxu1 %vm6325_vm3, %v12132_v40  ;;  %v9761_v2 = vunpack.i.l.bf16 %v12138_v10  ;;  %v8662_v3 = vpack.c.bf16 %v6266_v14, %v6228_v33  ;;  %v9762_v15 = vunpack.i.h.bf16 %v12138_v10 }
 0xcaa   : > { %v12142_v8 = vpop.permute.xlu0 %9749  ;;  %6464 = vmatprep.mubr.f32.mxu1 %v11070_v53 }
 0xcab   : > { %v9751_v36 = vunpack.i.l.bf16 %v12142_v8  ;;  %v9752_v32 = vunpack.i.h.bf16 %v12142_v8 }
 0xcac   : > { %v12153_v55 = vpop.permute.xlu1 %9769 }
 0xcad   : > { %v6051_v41 = vsel %vm2147_vm7, %v9717_v29, %v9751_v36  ;;  %v9771_v12 = vunpack.i.l.bf16 %v12153_v55  ;;  %v8660_v29 = vpack.c.bf16 %v6267_v25, %v6229_v50 }
 0xcae   : > { %v12155_v26 = vpop.permute.xlu0 %9754  ;;  %v8648_v61 = vpack.c.bf16 %v6051_v41, %v11945_v35  ;;  %v6121_v35 = vsel %vm5095_vm9, %v9727_v22, %v9761_v2 }
 0xcaf   : > { %v9756_v6 = vunpack.i.l.bf16 %v12155_v26  ;;  %v6191_v13 = vsel %vm2372_vm14, %v9737_v57, %v9771_v12  ;;  %v9772_v57 = vunpack.i.h.bf16 %v12153_v55 }
 0xcb0   : > { %8649 = vmatprep.subr.bf16.mxu1 %v8648_v61  ;;  %v6052_v61 = vsel %vm2147_vm7, %v9751_v36, %v9752_v32 }
 0xcb1   : > { %8651 = vmatpush1.bf16.msra.mxu1 %v8650_v31  ;;  %v6086_v48 = vsel %vm2192_vm8, %v9722_v49, %v9756_v6  ;;  %v6304_v49 = vsel %vm5467_vm13, %v12071_v63, %v6289_v45  ;;  %v9757_v31 = vunpack.i.h.bf16 %v12155_v26  ;;  %v8666_v8 = vpack.c.bf16 %v6052_v61, %v11962_v56 }
 0xcb2   : > { %v12173_v1 = vpop.permute.xlu0 %9764  ;;  %v8652_v42 = vpack.c.bf16 %v6121_v35, %v6086_v48  ;;  %v6192_v10 = vsel %vm2372_vm14, %v9771_v12, %v9772_v57 }
 0xcb3   : > { %v9766_v5 = vunpack.i.l.bf16 %v12173_v1  ;;  %v6087_v26 = vsel %vm2192_vm8, %v9756_v6, %v9757_v31  ;;  %v6122_v6 = vsel %vm5095_vm9, %v9761_v2, %v9762_v15 }
 0xcb4   : > { %8653 = vmatprep.subr.bf16.mxu1 %v8652_v42  ;;  %v9767_v42 = vunpack.i.h.bf16 %v12173_v1  ;;  %v8670_v25 = vpack.c.bf16 %v6122_v6, %v6087_v26 }
 0xcb5   : > { %8655 = vmatpush1.bf16.msra.mxu1 %v8654_v27  ;;  %v6156_v24 = vsel %vm5166_vm12, %v9732_v52, %v9766_v5 }
 0xcb6   : > { %v8656_v62 = vpack.c.bf16 %v6191_v13, %v6156_v24  ;;  %v6157_v33 = vsel %vm5166_vm12, %v9766_v5, %v9767_v42 }
 0xcb7   : > { %v8674_v12 = vpack.c.bf16 %v6192_v10, %v6157_v33 }
 0xcb8   : > { %8657 = vmatprep.subr.bf16.mxu1 %v8656_v62 }
 0xcb9   : > { %8659 = vmatpush1.bf16.msra.mxu1 %v8658_v30 }
 0xcba   : > { %8661 = vmatprep.subr.bf16.mxu1 %v8660_v29 }
 0xcbd   : > { %8663 = vmatpush1.bf16.msra.mxu1 %v8662_v3 }
 0xcbe   : > { %6416 = vmatprep.subr.mxu1 %v6305_v59 }
 0xcc1   : > { %6417 = vmatpush1.msra.mxu1 %v6304_v49 }
 0xcc2   : > { %7706 = vmatmul.mubr.msk.f32.vlgmr.msra.gmra.mrb[68].mxu1 %vm6325_vm3, %v12132_v40 }
 0xcc3   : > { %6606 = vmatprep.mubr.f32.mxu1 %v11070_v53 }
 0xcc6   : > { %v12207_v16 = vpop.permute.xlu0 %9774  ;;  %v12209_v9 = vpop.permute.xlu1 %9779 }
 0xcc7   : > { %v9777_v27 = vunpack.i.h.bf16 %v12207_v16  ;;  %v9776_v19 = vunpack.i.l.bf16 %v12207_v16  ;;  %v9782_v28 = vunpack.i.h.bf16 %v12209_v9  ;;  %v9781_v51 = vunpack.i.l.bf16 %v12209_v9 }
 0xcc9   : > { %v6231_v59 = vsel %vm5313_vm10, %v9776_v19, %v9777_v27  ;;  %v6269_v55 = vsel %vm5390_vm15, %v9781_v51, %v9782_v28  ;;  %v6268_v61 = vsel %vm5390_vm15, %v12118_v18, %v9781_v51 }
 0xcca   : > { %v9785_v43 = vpop.permute.xlu0 %9784  ;;  %v9795_v41 = vpop.permute.xlu1 %9794 }
 0xccb   : > { %v9786_v22 = vunpack.i.l.bf16 %v9785_v43  ;;  %v9796_v63 = vunpack.i.l.bf16 %v9795_v41  ;;  %v9787_v52 = vunpack.i.h.bf16 %v9785_v43  ;;  %v9797_v2 = vunpack.i.h.bf16 %v9795_v41 }
 0xccd   : > { %v6053_v45 = vsel %vm2147_vm7, %v9752_v32, %v9786_v22  ;;  %v6123_v50 = vsel %vm5095_vm9, %v9762_v15, %v9796_v63  ;;  %v6054_v24 = vsel %vm2147_vm7, %v9786_v22, %v9787_v52  ;;  %v6124_v15 = vsel %vm5095_vm9, %v9796_v63, %v9797_v2 }
 0xcce   : > { %v9790_v48 = vpop.permute.xlu0 %9789  ;;  %v12216_v35 = vpop.permute.xlu1 %9804  ;;  %v8664_v60 = vpack.c.bf16 %v6053_v45, %v11969_v58  ;;  %v8682_v1 = vpack.c.bf16 %v6054_v24, %v11983_v17  ;;  %v6230_v17 = vsel %vm5313_vm10, %v12127_v46, %v9776_v19 }
 0xccf   : > { %v9791_v36 = vunpack.i.l.bf16 %v9790_v48  ;;  %v9806_v58 = vunpack.i.l.bf16 %v12216_v35  ;;  %v9792_v13 = vunpack.i.h.bf16 %v9790_v48 }
 0xcd0   : > { %8665 = vmatprep.subr.bf16.mxu0 %v8664_v60  ;;  %v8676_v60 = vpack.c.bf16 %v6269_v55, %v6231_v59 }
 0xcd1   : > { %8667 = vmatpush1.bf16.msra.mxu0 %v8666_v8  ;;  %v6088_v56 = vsel %vm2192_vm8, %v9757_v31, %v9791_v36  ;;  %v6193_v49 = vsel %vm2372_vm14, %v9772_v57, %v9806_v58  ;;  %v6089_v32 = vsel %vm2192_vm8, %v9791_v36, %v9792_v13 }
 0xcd2   : > { %v9800_v38 = vpop.permute.xlu0 %9799  ;;  %v12234_v62 = vpop.permute.xlu1 %6046  ;;  %v8668_v30 = vpack.c.bf16 %v6123_v50, %v6088_v56  ;;  %v8686_v8 = vpack.c.bf16 %v6124_v15, %v6089_v32 }
 0xcd3   : > { %v9801_v29 = vunpack.i.l.bf16 %v9800_v38  ;;  %v6055_v14 = vsel %vm2147_vm7, %v9787_v52, %v12234_v62  ;;  %v9807_v52 = vunpack.i.h.bf16 %v12216_v35  ;;  %v8697_v16 = vpack.c.bf16 %v12234_v62, %v12000_v0 }
 0xcd4   : > { %v8680_v3 = vpack.c.bf16 %v6055_v14, %v11988_v37  ;;  %8669 = vmatprep.subr.bf16.mxu0 %v8668_v30  ;;  %v9802_v37 = vunpack.i.h.bf16 %v9800_v38 }
 0xcd5   : > { %8671 = vmatpush1.bf16.msra.mxu0 %v8670_v25  ;;  %v6158_v5 = vsel %vm5166_vm12, %v9767_v42, %v9801_v29  ;;  %v8678_v42 = vpack.c.bf16 %v6268_v61, %v6230_v17  ;;  %v6194_v63 = vsel %vm2372_vm14, %v9806_v58, %v9807_v52 }
 0xcd6   : > { %v12255_v43 = vpop.permute.xlu0 %6081  ;;  %v12257_v41 = vpop.permute.xlu1 %6116  ;;  %8681 = vmatprep.subr.bf16.mxu1 %v8680_v3  ;;  %v8672_v22 = vpack.c.bf16 %v6193_v49, %v6158_v5  ;;  %v6159_v46 = vsel %vm5166_vm12, %v9801_v29, %v9802_v37 }
 0xcd7   : > { %v6090_v31 = vsel %vm2192_vm8, %v9792_v13, %v12255_v43  ;;  %v6125_v45 = vsel %vm5095_vm9, %v9797_v2, %v12257_v41  ;;  %8683 = vmatpush1.bf16.msra.mxu1 %v8682_v1  ;;  %v8690_v19 = vpack.c.bf16 %v6194_v63, %v6159_v46  ;;  %v8700_v0 = vpack.c.bf16 %v12257_v41, %v12255_v43 }
 0xcd8   : > { %v8684_v48 = vpack.c.bf16 %v6125_v45, %v6090_v31  ;;  %8673 = vmatprep.subr.bf16.mxu0 %v8672_v22 }
 0xcd9   : > { %8675 = vmatpush1.bf16.msra.mxu0 %v8674_v12 }
 0xcda   : > { %v6152_v57 = vpop.permute.xlu0 %6151  ;;  %v6187_v18 = vpop.permute.xlu1 %6186  ;;  %8677 = vmatprep.subr.bf16.mxu0 %v8676_v60  ;;  %8685 = vmatprep.subr.bf16.mxu1 %v8684_v48 }
 0xcdb   : > { %v6160_v36 = vsel %vm5166_vm12, %v9802_v37, %v6152_v57  ;;  %v6195_v26 = vsel %vm2372_vm14, %v9807_v52, %v6187_v18  ;;  %8687 = vmatpush1.bf16.msra.mxu1 %v8686_v8  ;;  %v8703_v1 = vpack.c.bf16 %v6187_v18, %v6152_v57 }
 0xcdc   : > { %v8688_v35 = vpack.c.bf16 %v6195_v26, %v6160_v36 }
 0xcdd   : > { %8679 = vmatpush1.bf16.msra.mxu0 %v8678_v42 }
 0xcde   : > { %v9810_v51 = vpop.permute.xlu0 %9809  ;;  %v9815_v56 = vpop.permute.xlu1 %9814  ;;  %8689 = vmatprep.subr.bf16.mxu1 %v8688_v35 }
 0xcdf   : > { %v9812_v50 = vunpack.i.h.bf16 %v9810_v51  ;;  %v9811_v6 = vunpack.i.l.bf16 %v9810_v51  ;;  %v9817_v24 = vunpack.i.h.bf16 %v9815_v56  ;;  %v9816_v13 = vunpack.i.l.bf16 %v9815_v56  ;;  %8691 = vmatpush1.bf16.msra.mxu1 %v8690_v19 }
 0xce1   : > { %v6232_v38 = vsel %vm5313_vm10, %v9777_v27, %v9811_v6  ;;  %v6270_v30 = vsel %vm5390_vm15, %v9782_v28, %v9816_v13  ;;  %v6233_v58 = vsel %vm5313_vm10, %v9811_v6, %v9812_v50  ;;  %v6271_v25 = vsel %vm5390_vm15, %v9816_v13, %v9817_v24 }
 0xce2   : > { %v8694_v33 = vpack.c.bf16 %v6270_v30, %v6232_v38  ;;  %v6293_v29 = vpop.permute.xlu0 %6292  ;;  %v6295_v14 = vpop.permute.xlu1 %6294  ;;  %v8692_v10 = vpack.c.bf16 %v6271_v25, %v6233_v58 }
 0xce3   : > { %v6306_v2 = vsel %vm5467_vm13, %v12122_v54, %v6293_v29  ;;  %v6307_v3 = vsel %vm5467_vm13, %v6293_v29, %v6295_v14 }
 0xce4   : > { %6487 = vmatprep.subr.mxu0 %v6307_v3  ;;  %8693 = vmatprep.subr.bf16.mxu1 %v8692_v10 }
 0xce5   : > { %6488 = vmatpush1.msra.mxu0 %v6306_v2  ;;  %8695 = vmatpush1.bf16.msra.mxu1 %v8694_v33 }
 0xce6   : > { %v6297_v9 = vpop.permute.xlu0 %6296  ;;  %v6299_v27 = vpop.permute.xlu1 %6298  ;;  %7707 = vmatmul.mubr.msk.f32.vlgmr.msra.gmra.mrb[38].mxu0 %vm6325_vm3, %v12132_v40  ;;  %8696 = vmatprep.subr.bf16.mxu0 %v12785_v11 }
 0xce7   : > { %v6308_v28 = vsel %vm5467_vm13, %v6295_v14, %v6297_v9  ;;  %8698 = vmatpush3.bf16.msra.mxu0 %v8697_v16  ;;  %v6309_v54 = vsel %vm5467_vm13, %v6297_v9, %v6299_v27  ;;  %8158 = vmatprep.mubr.msk.f32.mxu0 %vm10030_vm1, %v11070_v53 }
 0xce8   : > { %6558 = vmatprep.subr.mxu1 %v6309_v54  ;;  %8699 = vmatprep.subr.bf16.mxu0 %v12785_v11 }
 0xce9   : > { %6559 = vmatpush1.msra.mxu1 %v6308_v28 }
 0xcea   : > { %7708 = vmatmul.mubr.msk.f32.vlgmr.msra.gmra.mrb[70].mxu1 %vm6325_vm3, %v12132_v40  ;;  %v6225_v62 = vpop.permute.xlu0 %6224  ;;  %v6263_v59 = vpop.permute.xlu1 %6262 }
 0xceb   : > { %8701 = vmatpush3.bf16.msra.mxu0 %v8700_v0  ;;  %7206 = vmatprep.mubr.f32.mxu1 %v11070_v53  ;;  %v6234_v5 = vsel %vm5313_vm10, %v9812_v50, %v6225_v62  ;;  %v6272_v49 = vsel %vm5390_vm15, %v9817_v24, %v6263_v59 }
 0xcec   : > { %8702 = vmatprep.subr.bf16.mxu0 %v12785_v11  ;;  %v8706_v55 = vpack.c.bf16 %v6272_v49, %v6234_v5 }
 0xcee   : > { %v6301_v12 = vpop.permute.xlu0 %6300 }
 0xcef   : > { %8704 = vmatpush3.bf16.msra.mxu0 %v8703_v1  ;;  %v6310_v32 = vsel %vm5467_vm13, %v6299_v27, %v6301_v12 }
 0xcf0   : > { %8705 = vmatprep.subr.bf16.mxu0 %v12785_v11 }
 0xcf3   : > { %8707 = vmatpush3.bf16.msra.mxu0 %v8706_v55 }
 0xcf4   : > { %8156 = vmatprep.subr.mxu0 %v11070_v53 }
 0xcf7   : > { %8157 = vmatpush3.msra.mxu0 %v6310_v32 }
 0xcf8   : > { %8159 = vmatmul.mubr.msk.f32.vlgmr.msra.gmra.mrb[40].mxu0 %vm6325_vm3, %v12132_v40 }
 0xcf9   : > { %7277 = vmatprep.mubr.f32.mxu0 %v11070_v53 }
 0xcfb   : > { %v6323_v37 = vpop.permute.xlu1 %6322 }
 0xd7c   : > { %v6395_v43 = vpop.f32.mrb[66].mxu1 }
 0xd7d   : > { %v6396_v41 = vadd.f32 %v6395_v43, %v6323_v37  ;;  %v6397_v22 = vpop.f32.mrb[67].mxu1  ;;  %v6824_v43 = vld [vmem:[%s12725_s14] sm:$0x7] }
 0xd7e   : > { %v6398_v17 = vadd.f32 %v6397_v22, %v6323_v37 }
 0xd7f   : > { %v6683_v61 = vmax.f32 %v6396_v41, 0.0 }
 0xd80   : > { %v6684_v31 = vmax.f32 %v6398_v17, 0.0 }
 0xd81   : > { %v6761_v45 = vmul.f32 %v6683_v61, %v11872_v44 }
 0xd82   : > { %v6762_v15 = vmul.f32 %v6684_v31, %v11876_v20 }
 0xd83   : > { %6779 = vrot.lane.b32.xlu0 %v6761_v45, %s12771_s22 }
 0xd84   : > { %6781 = vrot.lane.b32.xlu1 %v6762_v15, %s12771_s22 }
 0xd95   : > { %v6466_v52 = vpop.f32.mrb[68].mxu1 }
 0xd96   : > { %v6467_v48 = vadd.f32 %v6466_v52, %v6323_v37  ;;  %v6468_v40 = vpop.f32.mrb[69].mxu1 }
 0xd97   : > { %v6469_v60 = vadd.f32 %v6468_v40, %v6323_v37 }
 0xd98   : > { %v6685_v8 = vmax.f32 %v6467_v48, 0.0 }
 0xd99   : > { %v6686_v46 = vmax.f32 %v6469_v60, 0.0 }
 0xd9a   : > { %v6763_v57 = vmul.f32 %v6685_v8, %v11885_v39 }
 0xd9b   : > { %v6764_v18 = vmul.f32 %v6686_v46, %v11887_v47 }
 0xd9c   : > { %6783 = vrot.lane.b32.xlu0 %v6763_v57, %s12771_s22 }
 0xd9d   : > { %6785 = vrot.lane.b32.xlu1 %v6764_v18, %s12771_s22 }
 0xdb9   : > { %v6537_v44 = vpop.f32.mrb[38].mxu0 }
 0xdba   : > { %v6538_v20 = vadd.f32 %v6537_v44, %v6323_v37  ;;  %v6539_v42 = vpop.f32.mrb[39].mxu0 }
 0xdbb   : > { %v6540_v36 = vadd.f32 %v6539_v42, %v6323_v37 }
 0xdbc   : > { %v6687_v26 = vmax.f32 %v6538_v20, 0.0 }
 0xdbd   : > { %v6688_v63 = vmax.f32 %v6540_v36, 0.0  ;;  %v6608_v35 = vpop.f32.mrb[70].mxu1 }
 0xdbe   : > { %v6765_v19 = vmul.f32 %v6687_v26, %v11895_v21  ;;  %v6609_v51 = vadd.f32 %v6608_v35, %v6323_v37  ;;  %v6610_v56 = vpop.f32.mrb[71].mxu1 }
 0xdbf   : > { %v6766_v50 = vmul.f32 %v6688_v63, %v11897_v23  ;;  %v6611_v39 = vadd.f32 %v6610_v56, %v6323_v37 }
 0xdc0   : > { %v6689_v6 = vmax.f32 %v6609_v51, 0.0  ;;  %6787 = vrot.lane.b32.xlu0 %v6765_v19, %s12771_s22 }
 0xdc1   : > { %v6690_v47 = vmax.f32 %v6611_v39, 0.0  ;;  %6789 = vrot.lane.b32.xlu1 %v6766_v50, %s12771_s22 }
 0xdc2   : > { %v6767_v24 = vmul.f32 %v6689_v6, %v11905_v7 }
 0xdc3   : > { %v6768_v13 = vmul.f32 %v6690_v47, %v11907_v4 }
 0xdc4   : > { %6791 = vrot.lane.b32.xlu0 %v6767_v24, %s12771_s22 }
 0xdc5   : > { %6793 = vrot.lane.b32.xlu1 %v6768_v13, %s12771_s22 }
 0xdcb   : > { %v6679_v21 = vpop.f32.mrb[40].mxu0 }
 0xdcc   : > { %v6680_v38 = vadd.f32 %v6679_v21, %v6323_v37  ;;  %v8160_v30 = vpop.f32.mrb[41].mxu0  ;;  %v6834_v37 = vld [vmem:[#allocation4 + $0x48] sm:$0xff] }
 0xdce   : > { %v6691_v58 = vmax.f32 %v6680_v38, 0.0 }
 0xdd0   : > { %v6769_v23 = vmul.f32 %v11912_v34, %v6691_v58 }
 0xdd2   : > { %6795 = vrot.lane.b32.xlu0 %v6769_v23, %s12771_s22 }
 0xdf5   : > { %v6780_v25 = vpop.permute.xlu0 %6779 }
 0xdf6   : > { %6814 = vst.msk [vmem:[#allocation4] sm:$0xff] %vm5998_vm6, %v6780_v25  ;;  %v6782_v33 = vpop.permute.xlu1 %6781 }
 0xdf7   : > { %v12328_v7 = vsel %vm5980_vm0, %v6780_v25, %v6782_v33 }
 0xdf8   : > { %6815 = vst [vmem:[#allocation4 + $0x8] sm:$0xff] %v12328_v7 }
 0xdfd   : > { %v12331_v4 = vld [vmem:[#allocation4] sm:$0xff] }
 0xdfe   : > { %7096 = vrot.lane.b32.xlu1 %v12331_v4, %s12770_s21 }
 0xe02   : > { %7098 = vrot.lane.b32.xlu1 %v12328_v7, %s12770_s21 }
 0xe0e   : > { %v6784_v34 = vpop.permute.xlu0 %6783 }
 0xe0f   : > { %v12338_v29 = vsel %vm5980_vm0, %v6782_v33, %v6784_v34  ;;  %v6786_v14 = vpop.permute.xlu1 %6785 }
 0xe10   : > { %6816 = vst [vmem:[#allocation4 + $0x10] sm:$0xff] %v12338_v29  ;;  %v12342_v10 = vsel %vm5980_vm0, %v6784_v34, %v6786_v14  ;;  %v9828_v2 = vpack.i.bf16 %v12338_v29, %v12328_v7 }
 0xe11   : > { %6817 = vst [vmem:[#allocation4 + $0x18] sm:$0xff] %v12342_v10  ;;  %v9853_v3 = vpack.i.bf16 %v12342_v10, %v12331_v4 }
 0xe12   : > { %9829 = vrot.lane.b32.xlu0 %v9828_v2, %s10011_s30  ;;  %9819 = vrot.lane.b32.xlu1 %v9828_v2, %s12764_s24 }
 0xe16   : > { %9839 = vrot.lane.b32.xlu0 %v9828_v2, %s12767_s29  ;;  %9824 = vrot.lane.b32.xlu1 %v9828_v2, %s12766_s16 }
 0xe1a   : > { %9849 = vrot.lane.b32.xlu0 %v9828_v2, %s10025_s25  ;;  %9834 = vrot.lane.b32.xlu1 %v9828_v2, %s10028_s27 }
 0xe1e   : > { %7100 = vrot.lane.b32.xlu0 %v12338_v29, %s12770_s21  ;;  %9844 = vrot.lane.b32.xlu1 %v9828_v2, %s10029_s17 }
 0xe22   : > { %9854 = vrot.lane.b32.xlu0 %v9853_v3, %s12764_s24  ;;  %9859 = vrot.lane.b32.xlu1 %v9853_v3, %s12766_s16 }
 0xe26   : > { %9864 = vrot.lane.b32.xlu0 %v9853_v3, %s10011_s30  ;;  %9869 = vrot.lane.b32.xlu1 %v9853_v3, %s10028_s27 }
 0xe2a   : > { %9874 = vrot.lane.b32.xlu0 %v9853_v3, %s12767_s29  ;;  %9879 = vrot.lane.b32.xlu1 %v9853_v3, %s10029_s17 }
 0xe2e   : > { %9884 = vrot.lane.b32.xlu0 %v9853_v3, %s10025_s25  ;;  %7102 = vrot.lane.b32.xlu1 %v12342_v10, %s12770_s21 }
 0xe32   : > { %v6788_v16 = vpop.permute.xlu0 %6787 }
 0xe33   : > { %v12368_v9 = vsel %vm5980_vm0, %v6786_v14, %v6788_v16  ;;  %v6790_v27 = vpop.permute.xlu1 %6789 }
 0xe34   : > { %6818 = vst [vmem:[#allocation4 + $0x20] sm:$0xff] %v12368_v9  ;;  %v12372_v28 = vsel %vm5980_vm0, %v6788_v16, %v6790_v27 }
 0xe35   : > { %6819 = vst [vmem:[#allocation4 + $0x28] sm:$0xff] %v12372_v28  ;;  %v9898_v54 = vpack.i.bf16 %v12372_v28, %v12368_v9 }
 0xe36   : > { %v6792_v0 = vpop.permute.xlu0 %6791 }
 0xe37   : > { %v12378_v62 = vsel %vm5980_vm0, %v6790_v27, %v6792_v0  ;;  %v6794_v59 = vpop.permute.xlu1 %6793  ;;  %9899 = vrot.lane.b32.xlu0 %v9898_v54, %s10011_s30  ;;  %9889 = vrot.lane.b32.xlu1 %v9898_v54, %s12764_s24 }
 0xe38   : > { %6820 = vst [vmem:[#allocation4 + $0x30] sm:$0xff] %v12378_v62  ;;  %v12384_v1 = vsel %vm5980_vm0, %v6792_v0, %v6794_v59 }
 0xe39   : > { %6821 = vst [vmem:[#allocation4 + $0x38] sm:$0xff] %v12384_v1  ;;  %v9923_v55 = vpack.i.bf16 %v12384_v1, %v12378_v62 }
 0xe3b   : > { %9904 = vrot.lane.b32.xlu0 %v9898_v54, %s10028_s27  ;;  %9894 = vrot.lane.b32.xlu1 %v9898_v54, %s12766_s16 }
 0xe3f   : > { %9914 = vrot.lane.b32.xlu0 %v9898_v54, %s10029_s17  ;;  %9909 = vrot.lane.b32.xlu1 %v9898_v54, %s12767_s29 }
 0xe43   : > { %9919 = vrot.lane.b32.xlu1 %v9898_v54, %s10025_s25  ;;  %6961 = vrot.lane.b32.xlu0 %v12378_v62, %s10028_s27 }
 0xe44   : > { %v6796_v5 = vpop.permute.xlu0 %6795 }
 0xe45   : > { %v6804_v49 = vsel %vm5980_vm0, %v6794_v59, %v6796_v5 }
 0xe46   : > { %6822 = vst.msk [vmem:[#allocation4 + $0x40] sm:$0xff] %vm6007_vm4, %v6804_v49 }
 0xe47   : > { %7032 = vrot.lane.b32.xlu0 %v12378_v62, %s10029_s17  ;;  %6926 = vrot.lane.b32.xlu1 %v12378_v62, %s10011_s30 }
 0xe4b   : > { %9924 = vrot.lane.b32.xlu0 %v9923_v55, %s12764_s24  ;;  %6996 = vrot.lane.b32.xlu1 %v12378_v62, %s12767_s29 }
 0xe4d   : > { %v12412_v12 = vld [vmem:[#allocation4 + $0x40] sm:$0xff] }
 0xe4e   : > { %v9938_v32 = vpack.i.bf16 %v12412_v12, %v12384_v1 }
 0xe4f   : > { %9929 = vrot.lane.b32.xlu0 %v9923_v55, %s12766_s16  ;;  %7070 = vrot.lane.b32.xlu1 %v12378_v62, %s10025_s25 }
 0xe53   : > { %7104 = vrot.lane.b32.xlu0 %v12368_v9, %s12770_s21  ;;  %7106 = vrot.lane.b32.xlu1 %v12372_v28, %s12770_s21 }
 0xe57   : > { %7108 = vrot.lane.b32.xlu0 %v12378_v62, %s12770_s21  ;;  %6895 = vrot.lane.b32.xlu1 %v12412_v12, %s12766_s16 }
 0xe5b   : > { %9939 = vrot.lane.b32.xlu1 %v9938_v32, %s10028_s27  ;;  %6860 = vrot.lane.b32.xlu0 %v12412_v12, %s12764_s24 }
 0xe5f   : > { %9949 = vrot.lane.b32.xlu1 %v9938_v32, %s10029_s17  ;;  %9934 = vrot.lane.b32.xlu0 %v9938_v32, %s10011_s30 }
 0xe63   : > { %7038 = vrot.lane.b32.xlu1 %v6834_v37, %s10029_s17  ;;  %9944 = vrot.lane.b32.xlu0 %v9938_v32, %s12767_s29 }
 0xe67   : > { %7110 = vrot.lane.b32.xlu1 %v12384_v1, %s12770_s21  ;;  %9954 = vrot.lane.b32.xlu0 %v9938_v32, %s10025_s25 }
 0xe6b   : > { %7076 = vrot.lane.b32.xlu0 %v6834_v37, %s10025_s25  ;;  %7114 = vrot.lane.b32.xlu1 %v6834_v37, %s12770_s21 }
 0xe6f   : > { %7112 = vrot.lane.b32.xlu0 %v12412_v12, %s12770_s21  ;;  %s8792_s21 = smul.u32 36, %s12791_s19 }
 0xe70   : > { %v12437_v41 = vpop.permute.xlu1 %7096 }
 0xe71   : > { %s494_s27 = scalar_lea.vmem %s12726_s15, %s8792_s21 }
 0xe73   : > { %7136 = vperm.xlu0 %8941, %v6824_v43  }
 0xe74   : > { %v12439_v22 = vpop.permute.xlu1 %7098 }
 0xe84   : > { %v12441_v17 = vpop.permute.xlu1 %9819  ;;  %v12443_v61 = vpop.permute.xlu0 %9829 }
 0xe85   : > { %v9822_v31 = vunpack.i.h.bf16 %v12441_v17  ;;  %v9821_v45 = vunpack.i.l.bf16 %v12441_v17  ;;  %v9832_v20 = vunpack.i.h.bf16 %v12443_v61  ;;  %v9831_v42 = vunpack.i.l.bf16 %v12443_v61 }
 0xe87   : > { %v6863_v15 = vsel %vm2147_vm7, %v9821_v45, %v9822_v31  ;;  %v6933_v21 = vsel %vm5095_vm9, %v9831_v42, %v9832_v20 }
 0xe88   : > { %v12450_v52 = vpop.permute.xlu1 %9824  ;;  %v12452_v48 = vpop.permute.xlu0 %9839  ;;  %v8708_v40 = vpack.c.bf16 %v6863_v15, %v12328_v7 }
 0xe89   : > { %v9827_v18 = vunpack.i.h.bf16 %v12450_v52  ;;  %v9826_v44 = vunpack.i.l.bf16 %v12450_v52  ;;  %v9842_v39 = vunpack.i.h.bf16 %v12452_v48  ;;  %v9841_v6 = vunpack.i.l.bf16 %v12452_v48 }
 0xe8a   : > { %8709 = vmatprep.subr.bf16.mxu1 %v8708_v40 }
 0xe8b   : > { %v6898_v51 = vsel %vm2192_vm8, %v9826_v44, %v9827_v18  ;;  %v7003_v27 = vsel %vm2372_vm14, %v9841_v6, %v9842_v39 }
 0xe8c   : > { %v12455_v60 = vpop.permute.xlu1 %9834  ;;  %v12457_v8 = vpop.permute.xlu0 %9849  ;;  %v8712_v30 = vpack.c.bf16 %v6933_v21, %v6898_v51 }
 0xe8d   : > { %v9837_v35 = vunpack.i.h.bf16 %v12455_v60  ;;  %v9836_v19 = vunpack.i.l.bf16 %v12455_v60  ;;  %v9852_v34 = vunpack.i.h.bf16 %v12457_v8  ;;  %v9851_v14 = vunpack.i.l.bf16 %v12457_v8 }
 0xe8f   : > { %v6968_v25 = vsel %vm5166_vm12, %v9836_v19, %v9837_v35  ;;  %v7079_v43 = vsel %vm5390_vm15, %v9851_v14, %v9852_v34 }
 0xe90   : > { %v12459_v46 = vpop.permute.xlu1 %9844  ;;  %v12461_v57 = vpop.permute.xlu0 %7100  ;;  %v8716_v0 = vpack.c.bf16 %v7003_v27, %v6968_v25 }
 0xe91   : > { %v9847_v58 = vunpack.i.h.bf16 %v12459_v46  ;;  %v9846_v23 = vunpack.i.l.bf16 %v12459_v46 }
 0xe93   : > { %v7041_v59 = vsel %vm5313_vm10, %v9846_v23, %v9847_v58 }
 0xe94   : > { %v12467_v36 = vpop.permute.xlu1 %9859  ;;  %v12469_v26 = vpop.permute.xlu0 %9854  ;;  %v8720_v15 = vpack.c.bf16 %v7079_v43, %v7041_v59 }
 0xe95   : > { %v9856_v63 = vunpack.i.l.bf16 %v12469_v26  ;;  %v9861_v56 = vunpack.i.l.bf16 %v12467_v36  ;;  %v9857_v51 = vunpack.i.h.bf16 %v12469_v26 }
 0xe97   : > { %v6862_v50 = vsel %vm2147_vm7, %v9856_v63, %v9821_v45  ;;  %v6897_v33 = vsel %vm2192_vm8, %v9861_v56, %v9826_v44  ;;  %v12531_v56 = vld [vmem:[%s12724_s13] sm:$0x7]  ;;  %v6864_v26 = vsel %vm2147_vm7, %v9822_v31, %v9857_v51 }
 0xe98   : > { %v8710_v47 = vpack.c.bf16 %v6862_v50, %v12331_v4  ;;  %v12482_v24 = vpop.permute.xlu1 %9869  ;;  %v12484_v13 = vpop.permute.xlu0 %9864  ;;  %v7116_v50 = vsel %vm5467_vm13, %v12437_v41, %v12439_v22  ;;  %v8726_v31 = vpack.c.bf16 %v6864_v26, %v12338_v29 }
 0xe99   : > { %v9866_v38 = vunpack.i.l.bf16 %v12484_v13  ;;  %v9871_v7 = vunpack.i.l.bf16 %v12482_v24  ;;  %v9872_v61 = vunpack.i.h.bf16 %v12482_v24 }
 0xe9a   : > { %8711 = vmatpush1.bf16.msra.mxu1 %v8710_v47 }
 0xe9b   : > { %v6932_v4 = vsel %vm5095_vm9, %v9866_v38, %v9831_v42  ;;  %8713 = vmatprep.subr.bf16.mxu1 %v8712_v30  ;;  %v6967_v5 = vsel %vm5166_vm12, %v9871_v7, %v9836_v19  ;;  %v7117_v19 = vsel %vm5467_vm13, %v12439_v22, %v12461_v57  ;;  %v9867_v38 = vunpack.i.h.bf16 %v12484_v13 }
 0xe9c   : > { %v8714_v2 = vpack.c.bf16 %v6932_v4, %v6897_v33  ;;  %v12500_v3 = vpop.permute.xlu1 %9879  ;;  %v12502_v16 = vpop.permute.xlu0 %9874  ;;  %v9862_v22 = vunpack.i.h.bf16 %v12467_v36  ;;  %v6969_v59 = vsel %vm5166_vm12, %v9837_v35, %v9872_v61 }
 0xe9d   : > { %v9876_v54 = vunpack.i.l.bf16 %v12502_v16  ;;  %v9881_v49 = vunpack.i.l.bf16 %v12500_v3  ;;  %v6934_v33 = vsel %vm5095_vm9, %v9832_v20, %v9867_v38  ;;  %v9877_v7 = vunpack.i.h.bf16 %v12502_v16 }
 0xe9e   : > { %8715 = vmatpush1.bf16.msra.mxu1 %v8714_v2  ;;  %v6899_v29 = vsel %vm2192_vm8, %v9827_v18, %v9862_v22  ;;  %v9882_v48 = vunpack.i.h.bf16 %v12500_v3 }
 0xe9f   : > { %v7002_v55 = vsel %vm2372_vm14, %v9876_v54, %v9841_v6  ;;  %8717 = vmatprep.subr.bf16.mxu1 %v8716_v0  ;;  %v7040_v40 = vsel %vm5313_vm10, %v9881_v49, %v9846_v23  ;;  %v8730_v16 = vpack.c.bf16 %v6934_v33, %v6899_v29  ;;  %v7004_v54 = vsel %vm2372_vm14, %v9842_v39, %v9877_v7 }
 0xea0   : > { %v8718_v32 = vpack.c.bf16 %v7002_v55, %v6967_v5  ;;  %v12514_v37 = vpop.permute.xlu0 %9884  ;;  %v12522_v63 = vpop.permute.xlu1 %7102  ;;  %v8734_v55 = vpack.c.bf16 %v7004_v54, %v6969_v59  ;;  %v7042_v3 = vsel %vm5313_vm10, %v9847_v58, %v9882_v48 }
 0xea1   : > { %v9886_v45 = vunpack.i.l.bf16 %v12514_v37  ;;  %v9887_v0 = vunpack.i.h.bf16 %v12514_v37 }
 0xea2   : > { %8719 = vmatpush1.bf16.msra.mxu1 %v8718_v32 }
 0xea3   : > { %v7078_v44 = vsel %vm5390_vm15, %v9886_v45, %v9851_v14  ;;  %8721 = vmatprep.subr.bf16.mxu1 %v8720_v15  ;;  %v7080_v37 = vsel %vm5390_vm15, %v9852_v34, %v9887_v0 }
 0xea4   : > { %v8722_v42 = vpack.c.bf16 %v7078_v44, %v7040_v40  ;;  %v8738_v8 = vpack.c.bf16 %v7080_v37, %v7042_v3 }
 0xea6   : > { %8723 = vmatpush1.bf16.msra.mxu1 %v8722_v42 }
 0xea7   : > { %7158 = vmatprep.subr.mxu1 %v7117_v19 }
 0xea9   : > { %v12536_v6 = vpop.permute.xlu1 %9889  ;;  %v12538_v47 = vpop.permute.xlu0 %9899 }
 0xeaa   : > { %v9891_v21 = vunpack.i.l.bf16 %v12536_v6  ;;  %7159 = vmatpush1.msra.mxu1 %v7116_v50  ;;  %v9901_v30 = vunpack.i.l.bf16 %v12538_v47  ;;  %v9892_v34 = vunpack.i.h.bf16 %v12536_v6 }
 0xeab   : > { %7711 = vmatmul.mubr.msk.f32.vlgmr.msra.gmra.mrb[72].mxu1 %vm6325_vm3, %v12531_v56 }
 0xeac   : > { %v6865_v41 = vsel %vm2147_vm7, %v9857_v51, %v9891_v21  ;;  %7348 = vmatprep.mubr.f32.mxu1 %v11070_v53  ;;  %v6866_v19 = vsel %vm2147_vm7, %v9891_v21, %v9892_v34  ;;  %v9902_v51 = vunpack.i.h.bf16 %v12538_v47 }
 0xead   : > { %v12551_v23 = vpop.permute.xlu1 %9894  ;;  %v12553_v25 = vpop.permute.xlu0 %9904  ;;  %v8724_v17 = vpack.c.bf16 %v6865_v41, %v12342_v10  ;;  %v6935_v10 = vsel %vm5095_vm9, %v9867_v38, %v9901_v30  ;;  %v8742_v38 = vpack.c.bf16 %v6866_v19, %v12368_v9 }
 0xeae   : > { %v9896_v13 = vunpack.i.l.bf16 %v12551_v23  ;;  %v9906_v4 = vunpack.i.l.bf16 %v12553_v25  ;;  %v9897_v46 = vunpack.i.h.bf16 %v12551_v23  ;;  %v9907_v23 = vunpack.i.h.bf16 %v12553_v25 }
 0xeaf   : > { %8725 = vmatprep.subr.bf16.mxu0 %v8724_v17  ;;  %v6936_v9 = vsel %vm5095_vm9, %v9901_v30, %v9902_v51 }
 0xeb0   : > { %8727 = vmatpush1.bf16.msra.mxu0 %v8726_v31  ;;  %v6900_v36 = vsel %vm2192_vm8, %v9862_v22, %v9896_v13  ;;  %v6970_v18 = vsel %vm5166_vm12, %v9872_v61, %v9906_v4  ;;  %v6901_v21 = vsel %vm2192_vm8, %v9896_v13, %v9897_v46  ;;  %v6971_v54 = vsel %vm5166_vm12, %v9906_v4, %v9907_v23 }
 0xeb1   : > { %v12571_v14 = vpop.permute.xlu1 %9909  ;;  %v12573_v20 = vpop.permute.xlu0 %9914  ;;  %v8728_v2 = vpack.c.bf16 %v6935_v10, %v6900_v36  ;;  %v8746_v13 = vpack.c.bf16 %v6936_v9, %v6901_v21 }
 0xeb2   : > { %v9911_v27 = vunpack.i.l.bf16 %v12571_v14  ;;  %v9916_v52 = vunpack.i.l.bf16 %v12573_v20  ;;  %v9912_v41 = vunpack.i.h.bf16 %v12571_v14  ;;  %v7118_v14 = vsel %vm5467_vm13, %v12461_v57, %v12522_v63 }
 0xeb3   : > { %8729 = vmatprep.subr.bf16.mxu0 %v8728_v2  ;;  %v9917_v30 = vunpack.i.h.bf16 %v12573_v20 }
 0xeb4   : > { %8731 = vmatpush1.bf16.msra.mxu0 %v8730_v16  ;;  %v7005_v24 = vsel %vm2372_vm14, %v9877_v7, %v9911_v27  ;;  %v7043_v60 = vsel %vm5313_vm10, %v9882_v48, %v9916_v52  ;;  %v7006_v47 = vsel %vm2372_vm14, %v9911_v27, %v9912_v41 }
 0xeb5   : > { %v12589_v5 = vpop.permute.xlu1 %9919  ;;  %v12591_v39 = vpop.permute.xlu0 %6961  ;;  %v8732_v49 = vpack.c.bf16 %v7005_v24, %v6970_v18  ;;  %v8750_v57 = vpack.c.bf16 %v7006_v47, %v6971_v54  ;;  %v7044_v25 = vsel %vm5313_vm10, %v9916_v52, %v9917_v30 }
 0xeb6   : > { %v9921_v32 = vunpack.i.l.bf16 %v12589_v5  ;;  %v9922_v10 = vunpack.i.h.bf16 %v12589_v5  ;;  %v6972_v29 = vsel %vm5166_vm12, %v9907_v23, %v12591_v39 }
 0xeb7   : > { %8733 = vmatprep.subr.bf16.mxu0 %v8732_v49 }
 0xeb8   : > { %8735 = vmatpush1.bf16.msra.mxu0 %v8734_v55  ;;  %v7081_v35 = vsel %vm5390_vm15, %v9887_v0, %v9921_v32  ;;  %v7082_v27 = vsel %vm5390_vm15, %v9921_v32, %v9922_v10 }
 0xeb9   : > { %v12604_v43 = vpop.permute.xlu1 %6926  ;;  %v12606_v45 = vpop.permute.xlu0 %7032  ;;  %v8736_v15 = vpack.c.bf16 %v7081_v35, %v7043_v60  ;;  %v8754_v49 = vpack.c.bf16 %v7082_v27, %v7044_v25 }
 0xeba   : > { %v6937_v17 = vsel %vm5095_vm9, %v9902_v51, %v12604_v43 }
 0xebb   : > { %8737 = vmatprep.subr.bf16.mxu0 %v8736_v15 }
 0xebc   : > { %8739 = vmatpush1.bf16.msra.mxu0 %v8738_v8 }
 0xebd   : > { %v12609_v40 = vpop.permute.xlu1 %6996  ;;  %v9925_v44 = vpop.permute.xlu0 %9924 }
 0xebe   : > { %v9926_v42 = vunpack.i.l.bf16 %v9925_v44  ;;  %v7007_v31 = vsel %vm2372_vm14, %v9912_v41, %v12609_v40  ;;  %v9927_v0 = vunpack.i.h.bf16 %v9925_v44 }
 0xebf   : > { %v8748_v2 = vpack.c.bf16 %v7007_v31, %v6972_v29 }
 0xec0   : > { %v6867_v58 = vsel %vm2147_vm7, %v9892_v34, %v9926_v42  ;;  %v6868_v4 = vsel %vm2147_vm7, %v9926_v42, %v9927_v0 }
 0xec1   : > { %v12615_v50 = vpop.permute.xlu1 %7070  ;;  %v12617_v26 = vpop.permute.xlu0 %9929  ;;  %v8740_v6 = vpack.c.bf16 %v6867_v58, %v12372_v28  ;;  %v8758_v32 = vpack.c.bf16 %v6868_v4, %v12378_v62 }
 0xec2   : > { %v9931_v22 = vunpack.i.l.bf16 %v12617_v26  ;;  %v7083_v16 = vsel %vm5390_vm15, %v9922_v10, %v12615_v50  ;;  %v9932_v37 = vunpack.i.h.bf16 %v12617_v26 }
 0xec3   : > { %8741 = vmatprep.subr.bf16.mxu1 %v8740_v6 }
 0xec4   : > { %8743 = vmatpush1.bf16.msra.mxu1 %v8742_v38  ;;  %v6902_v28 = vsel %vm2192_vm8, %v9897_v46, %v9931_v22  ;;  %v6903_v8 = vsel %vm2192_vm8, %v9931_v22, %v9932_v37 }
 0xec5   : > { %v7107_v33 = vpop.permute.xlu1 %7106  ;;  %v7105_v7 = vpop.permute.xlu0 %7104  ;;  %v8744_v36 = vpack.c.bf16 %v6937_v17, %v6902_v28 }
 0xec6   : > { %v7119_v61 = vsel %vm5467_vm13, %v12522_v63, %v7105_v7  ;;  %v7045_v63 = vsel %vm5313_vm10, %v9917_v30, %v12606_v45  ;;  %v7120_v34 = vsel %vm5467_vm13, %v7105_v7, %v7107_v33 }
 0xec7   : > { %7229 = vmatprep.subr.mxu0 %v7119_v61  ;;  %8745 = vmatprep.subr.bf16.mxu1 %v8744_v36  ;;  %v8752_v59 = vpack.c.bf16 %v7083_v16, %v7045_v63 }
 0xec8   : > { %7230 = vmatpush1.msra.mxu0 %v7118_v14  ;;  %8747 = vmatpush1.bf16.msra.mxu1 %v8746_v13 }
 0xec9   : > { %v6896_v18 = vpop.permute.xlu1 %6895  ;;  %v12648_v24 = vpop.permute.xlu0 %7108  ;;  %7712 = vmatmul.mubr.msk.f32.vlgmr.msra.gmra.mrb[42].mxu0 %vm6325_vm3, %v12531_v56  ;;  %8749 = vmatprep.subr.bf16.mxu1 %v8748_v2 }
 0xeca   : > { %7419 = vmatprep.mubr.f32.mxu0 %v11070_v53  ;;  %v7121_v20 = vsel %vm5467_vm13, %v7107_v33, %v12648_v24 }
 0xecc   : > { %8751 = vmatpush1.bf16.msra.mxu1 %v8750_v57 }
 0xecd   : > { %v9940_v48 = vpop.permute.xlu1 %9939  ;;  %v6861_v5 = vpop.permute.xlu0 %6860  ;;  %8753 = vmatprep.subr.bf16.mxu1 %v8752_v59 }
 0xece   : > { %v6869_v55 = vsel %vm2147_vm7, %v9927_v0, %v6861_v5  ;;  %v9942_v44 = vunpack.i.h.bf16 %v9940_v48  ;;  %v9941_v42 = vunpack.i.l.bf16 %v9940_v48  ;;  %v8773_v62 = vpack.c.bf16 %v6861_v5, %v12412_v12 }
 0xecf   : > { %v8756_v60 = vpack.c.bf16 %v6869_v55, %v12384_v1  ;;  %v6904_v1 = vsel %vm2192_vm8, %v9932_v37, %v6896_v18  ;;  %vm7516_vm7 = vcmask 518144  }
 0xed0   : > { %8755 = vmatpush1.bf16.msra.mxu1 %v8754_v49  ;;  %v6973_v12 = vsel %vm5166_vm12, %v12591_v39, %v9941_v42  ;;  %v6974_v41 = vsel %vm5166_vm12, %v9941_v42, %v9942_v44 }
 0xed1   : > { %v9935_v35 = vpop.permute.xlu0 %9934  ;;  %7300 = vmatprep.subr.mxu1 %v7121_v20  ;;  %8757 = vmatprep.subr.bf16.mxu0 %v8756_v60  ;;  %v9950_v52 = vpop.permute.xlu1 %9949 }
 0xed2   : > { %v9937_v3 = vunpack.i.h.bf16 %v9935_v35  ;;  %v9936_v15 = vunpack.i.l.bf16 %v9935_v35  ;;  %8759 = vmatpush1.bf16.msra.mxu0 %v8758_v32  ;;  %v9952_v22 = vunpack.i.h.bf16 %v9950_v52 }
 0xed4   : > { %v6938_v19 = vsel %vm5095_vm9, %v12604_v43, %v9936_v15  ;;  %7301 = vmatpush1.msra.mxu1 %v7120_v34  ;;  %v6939_v46 = vsel %vm5095_vm9, %v9936_v15, %v9937_v3  ;;  %v9951_v43 = vunpack.i.l.bf16 %v9950_v52  ;;  %v8776_v21 = vpack.c.bf16 %v9937_v3, %v6896_v18 }
 0xed5   : > { %v8762_v58 = vpack.c.bf16 %v6938_v19, %v6903_v8  ;;  %v9945_v51 = vpop.permute.xlu0 %9944  ;;  %7713 = vmatmul.mubr.msk.f32.vlgmr.msra.gmra.mrb[74].mxu1 %vm6325_vm3, %v12531_v56  ;;  %8772 = vmatprep.subr.bf16.mxu1 %v12785_v11  ;;  %v8760_v26 = vpack.c.bf16 %v6939_v46, %v6904_v1  ;;  %v7039_v23 = vpop.permute.xlu1 %7038 }
 0xed6   : > { %v9947_v6 = vunpack.i.h.bf16 %v9945_v51  ;;  %v9946_v38 = vunpack.i.l.bf16 %v9945_v51  ;;  %8774 = vmatpush3.bf16.msra.mxu1 %v8773_v62  ;;  %8179 = vmatprep.mubr.msk.f32.mxu1 %vm10030_vm1, %v11070_v53  ;;  %v7046_v36 = vsel %vm5313_vm10, %v12606_v45, %v9951_v43  ;;  %v7048_v2 = vsel %vm5313_vm10, %v9952_v22, %v7039_v23 }
 0xed7   : > { %8761 = vmatprep.subr.bf16.mxu0 %v8760_v26  ;;  %8775 = vmatprep.subr.bf16.mxu1 %v12785_v11 }
 0xed8   : > { %v7008_v17 = vsel %vm2372_vm14, %v12609_v40, %v9946_v38  ;;  %8763 = vmatpush1.bf16.msra.mxu0 %v8762_v58  ;;  %v7009_v31 = vsel %vm2372_vm14, %v9946_v38, %v9947_v6  ;;  %v8779_v13 = vpack.c.bf16 %v9947_v6, %v9942_v44  ;;  %v7047_v40 = vsel %vm5313_vm10, %v9951_v43, %v9952_v22 }
 0xed9   : > { %v8766_v28 = vpack.c.bf16 %v7008_v17, %v6973_v12  ;;  %v9955_v9 = vpop.permute.xlu0 %9954  ;;  %v8764_v33 = vpack.c.bf16 %v7009_v31, %v6974_v41  ;;  %v7111_v30 = vpop.permute.xlu1 %7110 }
 0xeda   : > { %v9957_v7 = vunpack.i.h.bf16 %v9955_v9  ;;  %v9956_v39 = vunpack.i.l.bf16 %v9955_v9  ;;  %8777 = vmatpush3.bf16.msra.mxu1 %v8776_v21  ;;  %v7122_v18 = vsel %vm5467_vm13, %v12648_v24, %v7111_v30 }
 0xedb   : > { %8765 = vmatprep.subr.bf16.mxu0 %v8764_v33  ;;  %8778 = vmatprep.subr.bf16.mxu1 %v12785_v11 }
 0xedc   : > { %v7084_v10 = vsel %vm5390_vm15, %v12615_v50, %v9956_v39  ;;  %8767 = vmatpush1.bf16.msra.mxu0 %v8766_v28  ;;  %v7085_v29 = vsel %vm5390_vm15, %v9956_v39, %v9957_v7 }
 0xedd   : > { %v8770_v61 = vpack.c.bf16 %v7084_v10, %v7046_v36  ;;  %v7077_v14 = vpop.permute.xlu0 %7076  ;;  %v8768_v47 = vpack.c.bf16 %v7085_v29, %v7047_v40  ;;  %v7115_v54 = vpop.permute.xlu1 %7114 }
 0xede   : > { %v7086_v45 = vsel %vm5390_vm15, %v9957_v7, %v7077_v14  ;;  %8780 = vmatpush3.bf16.msra.mxu1 %v8779_v13 }
 0xedf   : > { %v8782_v16 = vpack.c.bf16 %v7086_v45, %v7048_v2  ;;  %8769 = vmatprep.subr.bf16.mxu0 %v8768_v47  ;;  %8781 = vmatprep.subr.bf16.mxu1 %v12785_v11 }
 0xee0   : > { %8771 = vmatpush1.bf16.msra.mxu0 %v8770_v61 }
 0xee1   : > { %v7113_v50 = vpop.permute.xlu0 %7112 }
 0xee2   : > { %8783 = vmatpush3.bf16.msra.mxu1 %v8782_v16  ;;  %v7123_v0 = vsel %vm5467_vm13, %v7111_v30, %v7113_v50  ;;  %v7124_v57 = vsel %vm5467_vm13, %v7113_v50, %v7115_v54 }
 0xee3   : > { %7371 = vmatprep.subr.mxu0 %v7123_v0  ;;  %8177 = vmatprep.subr.mxu1 %v11070_v53 }
 0xee4   : > { %7372 = vmatpush1.msra.mxu0 %v7122_v18 }
 0xee5   : > { %7714 = vmatmul.mubr.msk.f32.vlgmr.msra.gmra.mrb[44].mxu0 %vm6325_vm3, %v12531_v56 }
 0xee6   : > { %8178 = vmatpush3.msra.mxu1 %v7124_v57 }
 0xee7   : > { %8180 = vmatmul.mubr.msk.f32.vlgmr.msra.gmra.mrb[76].mxu1 %vm6325_vm3, %v12531_v56 }
 0xef2   : > { %v7137_v11 = vpop.permute.xlu0 %7136 }
 0xf7e   : > { %v7208_v63 = vpop.f32.mrb[72].mxu1 }
 0xf7f   : > { %v7209_v27 = vadd.f32 %v7208_v63, %v7137_v11  ;;  %v7210_v59 = vpop.f32.mrb[73].mxu1 }
 0xf80   : > { %v7211_v25 = vadd.f32 %v7210_v59, %v7137_v11 }
 0xf82   : > { %v7504_v53 = vcombine.low %v7209_v27, %v7211_v25 }
 0xf84   : > { %7512 = vst [vmem:[%s494_s27] sm:$0x77] %v7504_v53 }
 0xf9c   : > { %v7279_v24 = vpop.f32.mrb[42].mxu0 }
 0xf9d   : > { %v7280_v4 = vadd.f32 %v7279_v24, %v7137_v11  ;;  %v7281_v48 = vpop.f32.mrb[43].mxu0 }
 0xf9e   : > { %v7282_v5 = vadd.f32 %v7281_v48, %v7137_v11 }
 0xfa0   : > { %v7505_v49 = vcombine.low %v7280_v4, %v7282_v5 }
 0xfa2   : > { %7513 = vst [vmem:[%s494_s27 + $0x8] sm:$0x77] %v7505_v49 }
 0xfa8   : > { %v7350_v55 = vpop.f32.mrb[74].mxu1 }
 0xfa9   : > { %v7351_v56 = vadd.f32 %v7350_v55, %v7137_v11  ;;  %v7352_v37 = vpop.f32.mrb[75].mxu1 }
 0xfaa   : > { %v7353_v60 = vadd.f32 %v7352_v37, %v7137_v11 }
 0xfac   : > { %v7506_v32 = vcombine.low %v7351_v56, %v7353_v60 }
 0xfae   : > { %7514 = vst [vmem:[%s494_s27 + $0x10] sm:$0x77] %v7506_v32 }
 0xfb8   : > { %v7421_v20 = vpop.f32.mrb[44].mxu0 }
 0xfb9   : > { %v7422_v35 = vadd.f32 %v7421_v20, %v7137_v11  ;;  %v7423_v52 = vpop.f32.mrb[45].mxu0 }
 0xfba   : > { %v7424_v3 = vadd.f32 %v7423_v52, %v7137_v11  ;;  %v7492_v15 = vpop.f32.mrb[76].mxu1 }
 0xfbb   : > { %v7493_v8 = vadd.f32 %v7492_v15, %v7137_v11  ;;  %v8181_v34 = vpop.f32.mrb[77].mxu1 }
 0xfbc   : > { %v7507_v44 = vcombine.low %v7422_v35, %v7424_v3 }
 0xfbd   : > { %7517 = vst.msk [vmem:[%s494_s27 + $0x20] sm:$0x7] %vm7516_vm7, %v7493_v8 }
 0xfbe   : > { %7515 = vst [vmem:[%s494_s27 + $0x18] sm:$0x77] %v7507_v44 }
 0xfbf PF: > { %s25_s18 = sadd.s32 1, %s9969_s18  }
 0xfc0   : > { %p22_p4 = scmp.ge.s32.totalorder %s25_s18, 4  }
 0xfc2   :  { %24 = sbr.rel (!%p22_p4) target bundleno = 1 (0x1), region = 110 }

</bundles_post_ra>
